<compile_context>
chip_gen: v7x
topology: tpu7x:2x2x1
jax: 0.10.0
libtpu: 0.0.40
codegen_flags: <defaults>
</compile_context>

<pallas_src>
import math

import jax
import jax.numpy as jnp
from jax.experimental import pallas as pl
from jax.experimental.pallas import tpu as pltpu

# fp32 matmul precision everywhere (kernel, interpret path, reference) so the
# parity assertions are meaningful on TPU.
jax.config.update("jax_default_matmul_precision", "float32")

# --- small, forward-consistent config (DistilBERT-like encoder) -------------
BATCH      = 2
SEQ        = 8          # module uses 512 tokens; small here
HIDDEN     = 32         # module uses 768; small here
N_HEADS    = 4
HEAD_DIM   = HIDDEN // N_HEADS
FFN        = 64
N_LAYERS   = 2
VOCAB      = 100
MAX_POS    = 512
NUM_LABELS = 5          # config.num_tags
LABEL_PAD  = 128        # lane-dense classifier slab width
LN_EPS     = 1e-12
BB         = 2          # batch rows per encoder grid step (4-8 at real dims)
NEG_INF    = -1e30


# --------------------------- kernel helpers ---------------------------------
def _layer_norm(x, g, b):
    # torch.nn.LayerNorm semantics: biased variance, eps inside rsqrt.
    mu = jnp.mean(x, axis=-1, keepdims=True)
    var = jnp.mean(jnp.square(x - mu), axis=-1, keepdims=True)
    return (x - mu) * jax.lax.rsqrt(var + LN_EPS) * g + b


def _dot_nt(a, b):
    # a @ b.T without materializing the transpose (MXU-native 'nt' contraction)
    return jax.lax.dot_general(a, b, (((1,), (1,)), ((), ())),
                               preferred_element_type=jnp.float32)


# --------------------- fused encoder stack (all layers) ---------------------
def _encoder_stack_kernel(x_ref, bias_ref, eg_ref, eb_ref,
                          wqkv_ref, bqkv_ref, wo_ref, bo_ref, g1_ref, b1_ref,
                          wi_ref, bi_ref, wf_ref, bf_ref, g2_ref, b2_ref,
                          o_ref, act_ref):
    l = pl.program_id(1)

    # Layer-0 prologue: fused embedding LayerNorm initializes the residual
    # stream in the VMEM scratch buffer, which stays resident across the
    # (innermost) layer grid axis -- no HBM activation round trips.
    @pl.when(l == 0)
    def _():
        act_ref[...] = _layer_norm(x_ref[...], eg_ref[...], eb_ref[...])

    x = act_ref[...]                                       # (BB*S, H)

    # ---- fused QKV projection: one wide MXU matmul --------------------------
    # 1/sqrt(HEAD_DIM) is folded into the Q columns of wqkv at init.
    qkv = jnp.dot(x, wqkv_ref[0],
                  preferred_element_type=jnp.float32) + bqkv_ref[0]   # (BB*S, 3H)

    # ---- attention: per (batch-row, head) score/softmax/context -------------
    # Heads are static lane slices of the fused QKV result; context heads are
    # concatenated back along lanes so the output projection is one dense
    # (rows, H) @ (H, H) matmul.
    # TODO(synk): at real SEQ, tile over query rows (flash-style) instead of
    #             materializing full (S, S) score blocks.
    ctx_rows = []
    for bb in range(BB):
        qkv_b = qkv[bb * SEQ:(bb + 1) * SEQ]               # (S, 3H)
        bias_b = bias_ref[bb]                              # (1, S) key-pad bias
        heads = []
        for h in range(N_HEADS):
            c0 = h * HEAD_DIM
            q = qkv_b[:, c0:c0 + HEAD_DIM]
            k = qkv_b[:, HIDDEN + c0:HIDDEN + c0 + HEAD_DIM]
            v = qkv_b[:, 2 * HIDDEN + c0:2 * HIDDEN + c0 + HEAD_DIM]
            s = _dot_nt(q, k) + bias_b                     # (S, S)
            s = s - jnp.max(s, axis=-1, keepdims=True)
            e = jnp.exp(s)
            p = e / jnp.sum(e, axis=-1, keepdims=True)     # exact divide
            heads.append(jnp.dot(p, v, preferred_element_type=jnp.float32))
        ctx_rows.append(jnp.concatenate(heads, axis=-1))   # (S, H)
    ctx = jnp.concatenate(ctx_rows, axis=0)                # (BB*S, H)

    # ---- dense output projection + residual LayerNorm ----------------------
    attn = jnp.dot(ctx, wo_ref[0],
                   preferred_element_type=jnp.float32) + bo_ref[0]
    h1 = _layer_norm(x + attn, g1_ref[0], b1_ref[0])

    # ---- feed-forward -------------------------------------------------------
    f = jnp.dot(h1, wi_ref[0], preferred_element_type=jnp.float32) + bi_ref[0]
    f = jax.nn.gelu(f, approximate=True)
    f = jnp.dot(f, wf_ref[0], preferred_element_type=jnp.float32) + bf_ref[0]
    out = _layer_norm(h1 + f, g2_ref[0], b2_ref[0])

    act_ref[...] = out                                     # carry to layer l+1

    @pl.when(l == N_LAYERS - 1)
    def _():
        o_ref[...] = out.astype(o_ref.dtype)


def encoder_stack(emb2d, mask_bias, p):
    rows, H = emb2d.shape                  # rows = B*S
    assert BATCH % BB == 0
    block_rows = BB * SEQ

    weight_args = [p['wqkv'], p['bqkv'], p['wo'], p['bo'], p['ln1_g'], p['ln1_b'],
                   p['wi'], p['bi'], p['wf'], p['bf'], p['ln2_g'], p['ln2_b']]

    def layer_spec(arr):
        # one layer's dense slab per grid step; BlockSpec double-buffering
        # prefetches layer l+1 weights behind layer l compute.
        n = arr.ndim - 1
        return pl.BlockSpec((1,) + arr.shape[1:],
                            lambda b, l, n=n: (l,) + (0,) * n)

    in_specs = ([pl.BlockSpec((block_rows, H), lambda b, l: (b, 0)),
                 pl.BlockSpec((BB, 1, SEQ), lambda b, l: (b, 0, 0)),
                 pl.BlockSpec((1, H), lambda b, l: (0, 0)),
                 pl.BlockSpec((1, H), lambda b, l: (0, 0))]
                + [layer_spec(a) for a in weight_args])

    return pl.pallas_call(
        _encoder_stack_kernel,
        out_shape=jax.ShapeDtypeStruct((rows, H), jnp.float32),
        grid=(BATCH // BB, N_LAYERS),
        in_specs=in_specs,
        # output written once on the last layer; block index ignores l
        out_specs=pl.BlockSpec((block_rows, H), lambda b, l: (b, 0)),
        scratch_shapes=[pltpu.VMEM((block_rows, H), jnp.float32)],
        compiler_params=pltpu.CompilerParams(
            dimension_semantics=("parallel", "arbitrary"),
            vmem_limit_bytes=32 * 1024 * 1024),
    )(emb2d, mask_bias, p['emb_ln_g'], p['emb_ln_b'], *weight_args)


# --------------------------- classifier + softmax ---------------------------
def _classifier_kernel(x_ref, w_ref, b_ref, o_ref):
    logits = jnp.dot(x_ref[...], w_ref[...],
                     preferred_element_type=jnp.float32) + b_ref[...]
    m = jnp.max(logits, axis=-1, keepdims=True)
    e = jnp.exp(logits - m)
    # exact divide: padded label columns carry a -1e30 bias -> exp()==0, so the
    # softmax normalizes over the real labels only and rows sum to 1 exactly.
    o_ref[...] = (e / jnp.sum(e, axis=-1, keepdims=True)).astype(o_ref.dtype)


def classifier_softmax(x2d, w_pad, b_pad):
    rows, H = x2d.shape
    tr = min(rows, 512)                    # row tile (lane-dense output slab)
    return pl.pallas_call(
        _classifier_kernel,
        out_shape=jax.ShapeDtypeStruct((rows, LABEL_PAD), jnp.float32),
        grid=(pl.cdiv(rows, tr),),
        in_specs=[pl.BlockSpec((tr, H), lambda i: (i, 0)),
                  pl.BlockSpec((H, LABEL_PAD), lambda i: (0, 0)),
                  pl.BlockSpec((1, LABEL_PAD), lambda i: (0, 0))],
        out_specs=pl.BlockSpec((tr, LABEL_PAD), lambda i: (i, 0)),
        compiler_params=pltpu.CompilerParams(
            dimension_semantics=("parallel",)),
    )(x2d, w_pad, b_pad)


# --------------------------- params & forward -------------------------------
def init_params(key):
    keys = iter(jax.random.split(key, 8))

    def w(shape):
        return jax.random.normal(next(keys), shape, jnp.float32) * 0.02

    L, H, F = N_LAYERS, HIDDEN, FFN
    wqkv = w((L, H, 3 * H))
    bqkv = jnp.zeros((L, 1, 3 * H), jnp.float32)
    # fold the 1/sqrt(HEAD_DIM) attention scale into the Q projection
    scale = 1.0 / math.sqrt(HEAD_DIM)
    wqkv = wqkv.at[:, :, :H].multiply(scale)
    bqkv = bqkv.at[:, :, :H].multiply(scale)

    cls_w = w((H, NUM_LABELS))
    cls_b = jnp.zeros((1, NUM_LABELS), jnp.float32)

    return {
        'word_emb': w((VOCAB, H)),
        'pos_emb':  w((MAX_POS, H)),
        'emb_ln_g': jnp.ones((1, H), jnp.float32),
        'emb_ln_b': jnp.zeros((1, H), jnp.float32),
        # dense fused / square attention weight slabs (review layout fix)
        'wqkv': wqkv, 'bqkv': bqkv,
        'wo': w((L, H, H)), 'bo': jnp.zeros((L, 1, H), jnp.float32),
        'ln1_g': jnp.ones((L, 1, H), jnp.float32),
        'ln1_b': jnp.zeros((L, 1, H), jnp.float32),
        'wi': w((L, H, F)), 'bi': jnp.zeros((L, 1, F), jnp.float32),
        'wf': w((L, F, H)), 'bf': jnp.zeros((L, 1, H), jnp.float32),
        'ln2_g': jnp.ones((L, 1, H), jnp.float32),
        'ln2_b': jnp.zeros((L, 1, H), jnp.float32),
        'cls_w': cls_w, 'cls_b': cls_b,
        # lane-dense padded classifier slab built once at init
        'cls_w_pad': jnp.zeros((H, LABEL_PAD), jnp.float32)
                        .at[:, :NUM_LABELS].set(cls_w),
        'cls_b_pad': jnp.full((1, LABEL_PAD), NEG_INF, jnp.float32)
                        .at[:, :NUM_LABELS].set(cls_b),
    }


def bert_model_forward(params, input_ids, attention_mask):
    """Mirrors BertModel.forward with labels=None: returns (softmax(logits),)."""
    B, S = input_ids.shape
    # embedding gathers are glue; the embedding LayerNorm is fused into the
    # encoder kernel's layer-0 prologue.
    emb = params['word_emb'][input_ids] + params['pos_emb'][None, :S, :]
    emb2d = emb.reshape(B * S, HIDDEN).astype(jnp.float32)
    # additive key-padding bias: 0 for real tokens, -1e30 for pad.
    mask_bias = (attention_mask.astype(jnp.float32) - 1.0)[:, None, :] * (-NEG_INF)
    x2d = encoder_stack(emb2d, mask_bias, params)
    probs_pad = classifier_softmax(x2d, params['cls_w_pad'], params['cls_b_pad'])
    probs = probs_pad[:, :NUM_LABELS].reshape(B, S, NUM_LABELS)
    return (probs,)


# --------------------------- pure-JAX reference ------------------------------
def _reference_forward(params, input_ids, attention_mask):
    B, S = input_ids.shape
    H, NH, HD = HIDDEN, N_HEADS, HEAD_DIM
    emb = params['word_emb'][input_ids] + params['pos_emb'][None, :S, :]

    def ln(x, g, b):
        mu = jnp.mean(x, -1, keepdims=True)
        var = jnp.mean((x - mu) ** 2, -1, keepdims=True)
        return (x - mu) * jax.lax.rsqrt(var + LN_EPS) * g + b

    x = ln(emb.astype(jnp.float32), params['emb_ln_g'], params['emb_ln_b'])
    bias = (attention_mask.astype(jnp.float32) - 1.0)[:, None, :] * (-NEG_INF)
    for l in range(N_LAYERS):
        qkv = x @ params['wqkv'][l] + params['bqkv'][l]        # scale folded in
        q, k, v = qkv[..., :H], qkv[..., H:2 * H], qkv[..., 2 * H:]
        qh = q.reshape(B, S, NH, HD).transpose(0, 2, 1, 3)
        kh = k.reshape(B, S, NH, HD).transpose(0, 2, 1, 3)
        vh = v.reshape(B, S, NH, HD).transpose(0, 2, 1, 3)
        s = jnp.einsum('bhqd,bhkd->bhqk', qh, kh) + bias[:, None]
        p = jax.nn.softmax(s, axis=-1)
        ctx = jnp.einsum('bhqk,bhkd->bhqd', p, vh)
        ctx = ctx.transpose(0, 2, 1, 3).reshape(B, S, H)
        attn = ctx @ params['wo'][l] + params['bo'][l]
        h1 = ln(x + attn, params['ln1_g'][l], params['ln1_b'][l])
        f = jax.nn.gelu(h1 @ params['wi'][l] + params['bi'][l], approximate=True)
        f = f @ params['wf'][l] + params['bf'][l]
        x = ln(h1 + f, params['ln2_g'][l], params['ln2_b'][l])
    logits = x @ params['cls_w'] + params['cls_b']
    return jax.nn.softmax(logits, axis=-1)


# ------------------------------- main ----------------------------------------
if __name__ == "__main__":
    key = jax.random.PRNGKey(0)
    pkey, ikey = jax.random.split(key)
    params = init_params(pkey)

    input_ids = jax.random.randint(ikey, (BATCH, SEQ), 0, VOCAB, dtype=jnp.int32)
    attention_mask = jnp.array([[1, 1, 1, 1, 1, 1, 0, 0],
                                [1, 1, 1, 1, 1, 1, 1, 1]], dtype=jnp.int32)

    outputs = bert_model_forward(params, input_ids, attention_mask)
    probs = jax.block_until_ready(outputs[0])

    assert probs.shape == (BATCH, SEQ, NUM_LABELS)
    # exact-divide softmax: rows sum to 1
    assert bool(jnp.allclose(jnp.sum(probs, axis=-1), 1.0, atol=1e-3))
    # match the pure-JAX reference forward
    ref = _reference_forward(params, input_ids, attention_mask)
    assert bool(jnp.allclose(probs, ref, atol=2e-3)), float(
        jnp.max(jnp.abs(probs - ref)))
    print("KERNEL_OK")
</pallas_src>

<mosaic_0001>
module attributes {stable_mosaic.version = 11 : i64} {
  func.func @_encoder_stack_kernel(%arg0: i32, %arg1: i32, %arg2: memref<16x32xf32, #tpu.memory_space<vmem>>, %arg3: memref<2x1x8xf32, #tpu.memory_space<vmem>>, %arg4: memref<1x32xf32, #tpu.memory_space<vmem>>, %arg5: memref<1x32xf32, #tpu.memory_space<vmem>>, %arg6: memref<1x32x96xf32, #tpu.memory_space<vmem>>, %arg7: memref<1x1x96xf32, #tpu.memory_space<vmem>>, %arg8: memref<1x32x32xf32, #tpu.memory_space<vmem>>, %arg9: memref<1x1x32xf32, #tpu.memory_space<vmem>>, %arg10: memref<1x1x32xf32, #tpu.memory_space<vmem>>, %arg11: memref<1x1x32xf32, #tpu.memory_space<vmem>>, %arg12: memref<1x32x64xf32, #tpu.memory_space<vmem>>, %arg13: memref<1x1x64xf32, #tpu.memory_space<vmem>>, %arg14: memref<1x64x32xf32, #tpu.memory_space<vmem>>, %arg15: memref<1x1x32xf32, #tpu.memory_space<vmem>>, %arg16: memref<1x1x32xf32, #tpu.memory_space<vmem>>, %arg17: memref<1x1x32xf32, #tpu.memory_space<vmem>>, %arg18: memref<16x32xf32, #tpu.memory_space<vmem>>, %arg19: memref<16x32xf32, #tpu.memory_space<vmem>>) attributes {dimension_semantics = [#tpu.dimension_semantics<parallel>, #tpu.dimension_semantics<arbitrary>], iteration_bounds = array<i64: 1, 2>, scalar_prefetch = 0 : i64, scratch_operands = 1 : i64, tpu.core_type = #tpu.core_type<tc>, window_params = [{transform_indices = @transform_0, window_bounds = array<i64: 16, 32>}, {transform_indices = @transform_1, window_bounds = array<i64: 2, 1, 8>}, {pipeline_mode = #tpu.pipeline_mode<synchronous>, transform_indices = @transform_2, window_bounds = array<i64: 1, 32>}, {pipeline_mode = #tpu.pipeline_mode<synchronous>, transform_indices = @transform_3, window_bounds = array<i64: 1, 32>}, {transform_indices = @transform_4, window_bounds = array<i64: 1, 32, 96>}, {transform_indices = @transform_5, window_bounds = array<i64: 1, 1, 96>}, {transform_indices = @transform_6, window_bounds = array<i64: 1, 32, 32>}, {transform_indices = @transform_7, window_bounds = array<i64: 1, 1, 32>}, {transform_indices = @transform_8, window_bounds = array<i64: 1, 1, 32>}, {transform_indices = @transform_9, window_bounds = array<i64: 1, 1, 32>}, {transform_indices = @transform_10, window_bounds = array<i64: 1, 32, 64>}, {transform_indices = @transform_11, window_bounds = array<i64: 1, 1, 64>}, {transform_indices = @transform_12, window_bounds = array<i64: 1, 64, 32>}, {transform_indices = @transform_13, window_bounds = array<i64: 1, 1, 32>}, {transform_indices = @transform_14, window_bounds = array<i64: 1, 1, 32>}, {transform_indices = @transform_15, window_bounds = array<i64: 1, 1, 32>}, {transform_indices = @transform_16, window_bounds = array<i64: 16, 32>}]} {
    %c0_i32 = arith.constant 0 : i32
    %0 = arith.cmpi eq, %arg1, %c0_i32 : i32
    %1 = arith.extui %0 : i1 to i32
    %c0_i32_0 = arith.constant 0 : i32
    %2 = arith.cmpi ne, %1, %c0_i32_0 : i32
    scf.if %2 {
      %c0_95 = arith.constant 0 : index
      %c0_96 = arith.constant 0 : index
      %240 = vector.load %arg2[%c0_95, %c0_96] : memref<16x32xf32, #tpu.memory_space<vmem>>, vector<16x32xf32>
      %c0_97 = arith.constant 0 : index
      %c0_98 = arith.constant 0 : index
      %241 = vector.load %arg4[%c0_97, %c0_98] : memref<1x32xf32, #tpu.memory_space<vmem>>, vector<1x32xf32>
      %c0_99 = arith.constant 0 : index
      %c0_100 = arith.constant 0 : index
      %242 = vector.load %arg5[%c0_99, %c0_100] : memref<1x32xf32, #tpu.memory_space<vmem>>, vector<1x32xf32>
      %cst_101 = arith.constant dense<0.000000e+00> : vector<16xf32>
      %243 = vector.multi_reduction <add>, %240, %cst_101 [1] : vector<16x32xf32> to vector<16xf32>
      %244 = vector.shape_cast %243 : vector<16xf32> to vector<16x1xf32>
      %cst_102 = arith.constant 3.200000e+01 : f32
      %245 = vector.broadcast %cst_102 : f32 to vector<16x1xf32>
      %246 = arith.divf %244, %245 : vector<16x1xf32>
      %247 = vector.broadcast %246 : vector<16x1xf32> to vector<16x32xf32>
      %248 = arith.subf %240, %247 : vector<16x32xf32>
      %249 = arith.mulf %248, %248 : vector<16x32xf32>
      %cst_103 = arith.constant dense<0.000000e+00> : vector<16xf32>
      %250 = vector.multi_reduction <add>, %249, %cst_103 [1] : vector<16x32xf32> to vector<16xf32>
      %251 = vector.shape_cast %250 : vector<16xf32> to vector<16x1xf32>
      %cst_104 = arith.constant 3.200000e+01 : f32
      %252 = vector.broadcast %cst_104 : f32 to vector<16x1xf32>
      %253 = arith.divf %251, %252 : vector<16x1xf32>
      %254 = vector.broadcast %246 : vector<16x1xf32> to vector<16x32xf32>
      %255 = arith.subf %240, %254 : vector<16x32xf32>
      %cst_105 = arith.constant 9.99999996E-13 : f32
      %256 = vector.broadcast %cst_105 : f32 to vector<16x1xf32>
      %257 = arith.addf %253, %256 : vector<16x1xf32>
      %258 = math.rsqrt %257 : vector<16x1xf32>
      %259 = vector.broadcast %258 : vector<16x1xf32> to vector<16x32xf32>
      %260 = arith.mulf %255, %259 : vector<16x32xf32>
      %261 = vector.broadcast %241 : vector<1x32xf32> to vector<16x32xf32>
      %262 = arith.mulf %260, %261 : vector<16x32xf32>
      %263 = vector.broadcast %242 : vector<1x32xf32> to vector<16x32xf32>
      %264 = arith.addf %262, %263 : vector<16x32xf32>
      %c0_106 = arith.constant 0 : index
      %c0_107 = arith.constant 0 : index
      %265 = vector.load %arg19[%c0_106, %c0_107] : memref<16x32xf32, #tpu.memory_space<vmem>>, vector<16x32xf32>
      tpu.vector_store %arg19[%c0_106, %c0_107], %264 {strides = array<i32>} : memref<16x32xf32, #tpu.memory_space<vmem>>, vector<16x32xf32>,
    } else {
    }
    %c0 = arith.constant 0 : index
    %c0_1 = arith.constant 0 : index
    %3 = vector.load %arg19[%c0, %c0_1] : memref<16x32xf32, #tpu.memory_space<vmem>>, vector<16x32xf32>
    %c0_2 = arith.constant 0 : index
    %c0_3 = arith.constant 0 : index
    %c0_4 = arith.constant 0 : index
    %4 = vector.load %arg6[%c0_2, %c0_3, %c0_4] : memref<1x32x96xf32, #tpu.memory_space<vmem>>, vector<1x32x96xf32>
    %5 = vector.shape_cast %4 : vector<1x32x96xf32> to vector<32x96xf32>
    %cst = arith.constant dense<0.000000e+00> : vector<16x96xf32>
    %6 = tpu.matmul %3, %5, %cst {dimension_numbers = #tpu.dot_dimension_numbers<[1], [0], [0], [1], [0, 0, 1, 1], [], []>, precision = #tpu.contract_precision<fp32>} : vector<16x32xf32>, vector<32x96xf32>, vector<16x96xf32> -> vector<16x96xf32>
    %c0_5 = arith.constant 0 : index
    %c0_6 = arith.constant 0 : index
    %c0_7 = arith.constant 0 : index
    %7 = vector.load %arg7[%c0_5, %c0_6, %c0_7] : memref<1x1x96xf32, #tpu.memory_space<vmem>>, vector<1x1x96xf32>
    %8 = vector.shape_cast %7 : vector<1x1x96xf32> to vector<1x96xf32>
    %9 = vector.broadcast %8 : vector<1x96xf32> to vector<16x96xf32>
    %10 = arith.addf %6, %9 : vector<16x96xf32>
    %11 = vector.extract_strided_slice %10 {offsets = [0, 0], sizes = [8, 96], strides = [1, 1]} : vector<16x96xf32> to vector<8x96xf32>
    %c0_8 = arith.constant 0 : index
    %c0_9 = arith.constant 0 : index
    %c0_10 = arith.constant 0 : index
    %12 = vector.load %arg3[%c0_8, %c0_9, %c0_10] : memref<2x1x8xf32, #tpu.memory_space<vmem>>, vector<1x1x8xf32>
    %13 = vector.shape_cast %12 : vector<1x1x8xf32> to vector<1x8xf32>
    %14 = vector.extract_strided_slice %11 {offsets = [0, 0], sizes = [8, 8], strides = [1, 1]} : vector<8x96xf32> to vector<8x8xf32>
    %15 = vector.extract_strided_slice %11 {offsets = [0, 32], sizes = [8, 8], strides = [1, 1]} : vector<8x96xf32> to vector<8x8xf32>
    %16 = vector.extract_strided_slice %11 {offsets = [0, 64], sizes = [8, 8], strides = [1, 1]} : vector<8x96xf32> to vector<8x8xf32>
    %cst_11 = arith.constant dense<0.000000e+00> : vector<8x8xf32>
    %17 = tpu.matmul %14, %15, %cst_11 {dimension_numbers = #tpu.dot_dimension_numbers<[1], [1], [0], [0], [0, 0, 1, 0], [], []>, precision = #tpu.contract_precision<fp32>} : vector<8x8xf32>, vector<8x8xf32>, vector<8x8xf32> -> vector<8x8xf32>
    %18 = vector.broadcast %13 : vector<1x8xf32> to vector<8x8xf32>
    %19 = arith.addf %17, %18 : vector<8x8xf32>
    %cst_12 = arith.constant dense<0xFF800000> : vector<8xf32>
    %20 = vector.multi_reduction <maximumf>, %19, %cst_12 [1] : vector<8x8xf32> to vector<8xf32>
    %21 = vector.shape_cast %20 : vector<8xf32> to vector<8x1xf32>
    %22 = vector.broadcast %21 : vector<8x1xf32> to vector<8x8xf32>
    %23 = arith.subf %19, %22 : vector<8x8xf32>
    %24 = math.exp %23 : vector<8x8xf32>
    %cst_13 = arith.constant dense<0.000000e+00> : vector<8xf32>
    %25 = vector.multi_reduction <add>, %24, %cst_13 [1] : vector<8x8xf32> to vector<8xf32>
    %26 = vector.shape_cast %25 : vector<8xf32> to vector<8x1xf32>
    %27 = vector.broadcast %26 : vector<8x1xf32> to vector<8x8xf32>
    %28 = arith.divf %24, %27 : vector<8x8xf32>
    %cst_14 = arith.constant dense<0.000000e+00> : vector<8x8xf32>
    %29 = tpu.matmul %28, %16, %cst_14 {dimension_numbers = #tpu.dot_dimension_numbers<[1], [0], [0], [1], [0, 0, 1, 1], [], []>, precision = #tpu.contract_precision<fp32>} : vector<8x8xf32>, vector<8x8xf32>, vector<8x8xf32> -> vector<8x8xf32>
    %30 = vector.extract_strided_slice %11 {offsets = [0, 8], sizes = [8, 8], strides = [1, 1]} : vector<8x96xf32> to vector<8x8xf32>
    %31 = vector.extract_strided_slice %11 {offsets = [0, 40], sizes = [8, 8], strides = [1, 1]} : vector<8x96xf32> to vector<8x8xf32>
    %32 = vector.extract_strided_slice %11 {offsets = [0, 72], sizes = [8, 8], strides = [1, 1]} : vector<8x96xf32> to vector<8x8xf32>
    %cst_15 = arith.constant dense<0.000000e+00> : vector<8x8xf32>
    %33 = tpu.matmul %30, %31, %cst_15 {dimension_numbers = #tpu.dot_dimension_numbers<[1], [1], [0], [0], [0, 0, 1, 0], [], []>, precision = #tpu.contract_precision<fp32>} : vector<8x8xf32>, vector<8x8xf32>, vector<8x8xf32> -> vector<8x8xf32>
    %34 = vector.broadcast %13 : vector<1x8xf32> to vector<8x8xf32>
    %35 = arith.addf %33, %34 : vector<8x8xf32>
    %cst_16 = arith.constant dense<0xFF800000> : vector<8xf32>
    %36 = vector.multi_reduction <maximumf>, %35, %cst_16 [1] : vector<8x8xf32> to vector<8xf32>
    %37 = vector.shape_cast %36 : vector<8xf32> to vector<8x1xf32>
    %38 = vector.broadcast %37 : vector<8x1xf32> to vector<8x8xf32>
    %39 = arith.subf %35, %38 : vector<8x8xf32>
    %40 = math.exp %39 : vector<8x8xf32>
    %cst_17 = arith.constant dense<0.000000e+00> : vector<8xf32>
    %41 = vector.multi_reduction <add>, %40, %cst_17 [1] : vector<8x8xf32> to vector<8xf32>
    %42 = vector.shape_cast %41 : vector<8xf32> to vector<8x1xf32>
    %43 = vector.broadcast %42 : vector<8x1xf32> to vector<8x8xf32>
    %44 = arith.divf %40, %43 : vector<8x8xf32>
    %cst_18 = arith.constant dense<0.000000e+00> : vector<8x8xf32>
    %45 = tpu.matmul %44, %32, %cst_18 {dimension_numbers = #tpu.dot_dimension_numbers<[1], [0], [0], [1], [0, 0, 1, 1], [], []>, precision = #tpu.contract_precision<fp32>} : vector<8x8xf32>, vector<8x8xf32>, vector<8x8xf32> -> vector<8x8xf32>
    %46 = vector.extract_strided_slice %11 {offsets = [0, 16], sizes = [8, 8], strides = [1, 1]} : vector<8x96xf32> to vector<8x8xf32>
    %47 = vector.extract_strided_slice %11 {offsets = [0, 48], sizes = [8, 8], strides = [1, 1]} : vector<8x96xf32> to vector<8x8xf32>
    %48 = vector.extract_strided_slice %11 {offsets = [0, 80], sizes = [8, 8], strides = [1, 1]} : vector<8x96xf32> to vector<8x8xf32>
    %cst_19 = arith.constant dense<0.000000e+00> : vector<8x8xf32>
    %49 = tpu.matmul %46, %47, %cst_19 {dimension_numbers = #tpu.dot_dimension_numbers<[1], [1], [0], [0], [0, 0, 1, 0], [], []>, precision = #tpu.contract_precision<fp32>} : vector<8x8xf32>, vector<8x8xf32>, vector<8x8xf32> -> vector<8x8xf32>
    %50 = vector.broadcast %13 : vector<1x8xf32> to vector<8x8xf32>
    %51 = arith.addf %49, %50 : vector<8x8xf32>
    %cst_20 = arith.constant dense<0xFF800000> : vector<8xf32>
    %52 = vector.multi_reduction <maximumf>, %51, %cst_20 [1] : vector<8x8xf32> to vector<8xf32>
    %53 = vector.shape_cast %52 : vector<8xf32> to vector<8x1xf32>
    %54 = vector.broadcast %53 : vector<8x1xf32> to vector<8x8xf32>
    %55 = arith.subf %51, %54 : vector<8x8xf32>
    %56 = math.exp %55 : vector<8x8xf32>
    %cst_21 = arith.constant dense<0.000000e+00> : vector<8xf32>
    %57 = vector.multi_reduction <add>, %56, %cst_21 [1] : vector<8x8xf32> to vector<8xf32>
    %58 = vector.shape_cast %57 : vector<8xf32> to vector<8x1xf32>
    %59 = vector.broadcast %58 : vector<8x1xf32> to vector<8x8xf32>
    %60 = arith.divf %56, %59 : vector<8x8xf32>
    %cst_22 = arith.constant dense<0.000000e+00> : vector<8x8xf32>
    %61 = tpu.matmul %60, %48, %cst_22 {dimension_numbers = #tpu.dot_dimension_numbers<[1], [0], [0], [1], [0, 0, 1, 1], [], []>, precision = #tpu.contract_precision<fp32>} : vector<8x8xf32>, vector<8x8xf32>, vector<8x8xf32> -> vector<8x8xf32>
    %62 = vector.extract_strided_slice %11 {offsets = [0, 24], sizes = [8, 8], strides = [1, 1]} : vector<8x96xf32> to vector<8x8xf32>
    %63 = vector.extract_strided_slice %11 {offsets = [0, 56], sizes = [8, 8], strides = [1, 1]} : vector<8x96xf32> to vector<8x8xf32>
    %64 = vector.extract_strided_slice %11 {offsets = [0, 88], sizes = [8, 8], strides = [1, 1]} : vector<8x96xf32> to vector<8x8xf32>
    %cst_23 = arith.constant dense<0.000000e+00> : vector<8x8xf32>
    %65 = tpu.matmul %62, %63, %cst_23 {dimension_numbers = #tpu.dot_dimension_numbers<[1], [1], [0], [0], [0, 0, 1, 0], [], []>, precision = #tpu.contract_precision<fp32>} : vector<8x8xf32>, vector<8x8xf32>, vector<8x8xf32> -> vector<8x8xf32>
    %66 = vector.broadcast %13 : vector<1x8xf32> to vector<8x8xf32>
    %67 = arith.addf %65, %66 : vector<8x8xf32>
    %cst_24 = arith.constant dense<0xFF800000> : vector<8xf32>
    %68 = vector.multi_reduction <maximumf>, %67, %cst_24 [1] : vector<8x8xf32> to vector<8xf32>
    %69 = vector.shape_cast %68 : vector<8xf32> to vector<8x1xf32>
    %70 = vector.broadcast %69 : vector<8x1xf32> to vector<8x8xf32>
    %71 = arith.subf %67, %70 : vector<8x8xf32>
    %72 = math.exp %71 : vector<8x8xf32>
    %cst_25 = arith.constant dense<0.000000e+00> : vector<8xf32>
    %73 = vector.multi_reduction <add>, %72, %cst_25 [1] : vector<8x8xf32> to vector<8xf32>
    %74 = vector.shape_cast %73 : vector<8xf32> to vector<8x1xf32>
    %75 = vector.broadcast %74 : vector<8x1xf32> to vector<8x8xf32>
    %76 = arith.divf %72, %75 : vector<8x8xf32>
    %cst_26 = arith.constant dense<0.000000e+00> : vector<8x8xf32>
    %77 = tpu.matmul %76, %64, %cst_26 {dimension_numbers = #tpu.dot_dimension_numbers<[1], [0], [0], [1], [0, 0, 1, 1], [], []>, precision = #tpu.contract_precision<fp32>} : vector<8x8xf32>, vector<8x8xf32>, vector<8x8xf32> -> vector<8x8xf32>
    %78 = tpu.concatenate %29, %45, %61, %77 in 1 : vector<8x8xf32>, vector<8x8xf32>, vector<8x8xf32>, vector<8x8xf32> -> vector<8x32xf32>
    %79 = vector.extract_strided_slice %10 {offsets = [8, 0], sizes = [8, 96], strides = [1, 1]} : vector<16x96xf32> to vector<8x96xf32>
    %c1 = arith.constant 1 : index
    %c0_27 = arith.constant 0 : index
    %c0_28 = arith.constant 0 : index
    %80 = vector.load %arg3[%c1, %c0_27, %c0_28] : memref<2x1x8xf32, #tpu.memory_space<vmem>>, vector<1x1x8xf32>
    %81 = vector.shape_cast %80 : vector<1x1x8xf32> to vector<1x8xf32>
    %82 = vector.extract_strided_slice %79 {offsets = [0, 0], sizes = [8, 8], strides = [1, 1]} : vector<8x96xf32> to vector<8x8xf32>
    %83 = vector.extract_strided_slice %79 {offsets = [0, 32], sizes = [8, 8], strides = [1, 1]} : vector<8x96xf32> to vector<8x8xf32>
    %84 = vector.extract_strided_slice %79 {offsets = [0, 64], sizes = [8, 8], strides = [1, 1]} : vector<8x96xf32> to vector<8x8xf32>
    %cst_29 = arith.constant dense<0.000000e+00> : vector<8x8xf32>
    %85 = tpu.matmul %82, %83, %cst_29 {dimension_numbers = #tpu.dot_dimension_numbers<[1], [1], [0], [0], [0, 0, 1, 0], [], []>, precision = #tpu.contract_precision<fp32>} : vector<8x8xf32>, vector<8x8xf32>, vector<8x8xf32> -> vector<8x8xf32>
    %86 = vector.broadcast %81 : vector<1x8xf32> to vector<8x8xf32>
    %87 = arith.addf %85, %86 : vector<8x8xf32>
    %cst_30 = arith.constant dense<0xFF800000> : vector<8xf32>
    %88 = vector.multi_reduction <maximumf>, %87, %cst_30 [1] : vector<8x8xf32> to vector<8xf32>
    %89 = vector.shape_cast %88 : vector<8xf32> to vector<8x1xf32>
    %90 = vector.broadcast %89 : vector<8x1xf32> to vector<8x8xf32>
    %91 = arith.subf %87, %90 : vector<8x8xf32>
    %92 = math.exp %91 : vector<8x8xf32>
    %cst_31 = arith.constant dense<0.000000e+00> : vector<8xf32>
    %93 = vector.multi_reduction <add>, %92, %cst_31 [1] : vector<8x8xf32> to vector<8xf32>
    %94 = vector.shape_cast %93 : vector<8xf32> to vector<8x1xf32>
    %95 = vector.broadcast %94 : vector<8x1xf32> to vector<8x8xf32>
    %96 = arith.divf %92, %95 : vector<8x8xf32>
    %cst_32 = arith.constant dense<0.000000e+00> : vector<8x8xf32>
    %97 = tpu.matmul %96, %84, %cst_32 {dimension_numbers = #tpu.dot_dimension_numbers<[1], [0], [0], [1], [0, 0, 1, 1], [], []>, precision = #tpu.contract_precision<fp32>} : vector<8x8xf32>, vector<8x8xf32>, vector<8x8xf32> -> vector<8x8xf32>
    %98 = vector.extract_strided_slice %79 {offsets = [0, 8], sizes = [8, 8], strides = [1, 1]} : vector<8x96xf32> to vector<8x8xf32>
    %99 = vector.extract_strided_slice %79 {offsets = [0, 40], sizes = [8, 8], strides = [1, 1]} : vector<8x96xf32> to vector<8x8xf32>
    %100 = vector.extract_strided_slice %79 {offsets = [0, 72], sizes = [8, 8], strides = [1, 1]} : vector<8x96xf32> to vector<8x8xf32>
    %cst_33 = arith.constant dense<0.000000e+00> : vector<8x8xf32>
    %101 = tpu.matmul %98, %99, %cst_33 {dimension_numbers = #tpu.dot_dimension_numbers<[1], [1], [0], [0], [0, 0, 1, 0], [], []>, precision = #tpu.contract_precision<fp32>} : vector<8x8xf32>, vector<8x8xf32>, vector<8x8xf32> -> vector<8x8xf32>
    %102 = vector.broadcast %81 : vector<1x8xf32> to vector<8x8xf32>
    %103 = arith.addf %101, %102 : vector<8x8xf32>
    %cst_34 = arith.constant dense<0xFF800000> : vector<8xf32>
    %104 = vector.multi_reduction <maximumf>, %103, %cst_34 [1] : vector<8x8xf32> to vector<8xf32>
    %105 = vector.shape_cast %104 : vector<8xf32> to vector<8x1xf32>
    %106 = vector.broadcast %105 : vector<8x1xf32> to vector<8x8xf32>
    %107 = arith.subf %103, %106 : vector<8x8xf32>
    %108 = math.exp %107 : vector<8x8xf32>
    %cst_35 = arith.constant dense<0.000000e+00> : vector<8xf32>
    %109 = vector.multi_reduction <add>, %108, %cst_35 [1] : vector<8x8xf32> to vector<8xf32>
    %110 = vector.shape_cast %109 : vector<8xf32> to vector<8x1xf32>
    %111 = vector.broadcast %110 : vector<8x1xf32> to vector<8x8xf32>
    %112 = arith.divf %108, %111 : vector<8x8xf32>
    %cst_36 = arith.constant dense<0.000000e+00> : vector<8x8xf32>
    %113 = tpu.matmul %112, %100, %cst_36 {dimension_numbers = #tpu.dot_dimension_numbers<[1], [0], [0], [1], [0, 0, 1, 1], [], []>, precision = #tpu.contract_precision<fp32>} : vector<8x8xf32>, vector<8x8xf32>, vector<8x8xf32> -> vector<8x8xf32>
    %114 = vector.extract_strided_slice %79 {offsets = [0, 16], sizes = [8, 8], strides = [1, 1]} : vector<8x96xf32> to vector<8x8xf32>
    %115 = vector.extract_strided_slice %79 {offsets = [0, 48], sizes = [8, 8], strides = [1, 1]} : vector<8x96xf32> to vector<8x8xf32>
    %116 = vector.extract_strided_slice %79 {offsets = [0, 80], sizes = [8, 8], strides = [1, 1]} : vector<8x96xf32> to vector<8x8xf32>
    %cst_37 = arith.constant dense<0.000000e+00> : vector<8x8xf32>
    %117 = tpu.matmul %114, %115, %cst_37 {dimension_numbers = #tpu.dot_dimension_numbers<[1], [1], [0], [0], [0, 0, 1, 0], [], []>, precision = #tpu.contract_precision<fp32>} : vector<8x8xf32>, vector<8x8xf32>, vector<8x8xf32> -> vector<8x8xf32>
    %118 = vector.broadcast %81 : vector<1x8xf32> to vector<8x8xf32>
    %119 = arith.addf %117, %118 : vector<8x8xf32>
    %cst_38 = arith.constant dense<0xFF800000> : vector<8xf32>
    %120 = vector.multi_reduction <maximumf>, %119, %cst_38 [1] : vector<8x8xf32> to vector<8xf32>
    %121 = vector.shape_cast %120 : vector<8xf32> to vector<8x1xf32>
    %122 = vector.broadcast %121 : vector<8x1xf32> to vector<8x8xf32>
    %123 = arith.subf %119, %122 : vector<8x8xf32>
    %124 = math.exp %123 : vector<8x8xf32>
    %cst_39 = arith.constant dense<0.000000e+00> : vector<8xf32>
    %125 = vector.multi_reduction <add>, %124, %cst_39 [1] : vector<8x8xf32> to vector<8xf32>
    %126 = vector.shape_cast %125 : vector<8xf32> to vector<8x1xf32>
    %127 = vector.broadcast %126 : vector<8x1xf32> to vector<8x8xf32>
    %128 = arith.divf %124, %127 : vector<8x8xf32>
    %cst_40 = arith.constant dense<0.000000e+00> : vector<8x8xf32>
    %129 = tpu.matmul %128, %116, %cst_40 {dimension_numbers = #tpu.dot_dimension_numbers<[1], [0], [0], [1], [0, 0, 1, 1], [], []>, precision = #tpu.contract_precision<fp32>} : vector<8x8xf32>, vector<8x8xf32>, vector<8x8xf32> -> vector<8x8xf32>
    %130 = vector.extract_strided_slice %79 {offsets = [0, 24], sizes = [8, 8], strides = [1, 1]} : vector<8x96xf32> to vector<8x8xf32>
    %131 = vector.extract_strided_slice %79 {offsets = [0, 56], sizes = [8, 8], strides = [1, 1]} : vector<8x96xf32> to vector<8x8xf32>
    %132 = vector.extract_strided_slice %79 {offsets = [0, 88], sizes = [8, 8], strides = [1, 1]} : vector<8x96xf32> to vector<8x8xf32>
    %cst_41 = arith.constant dense<0.000000e+00> : vector<8x8xf32>
    %133 = tpu.matmul %130, %131, %cst_41 {dimension_numbers = #tpu.dot_dimension_numbers<[1], [1], [0], [0], [0, 0, 1, 0], [], []>, precision = #tpu.contract_precision<fp32>} : vector<8x8xf32>, vector<8x8xf32>, vector<8x8xf32> -> vector<8x8xf32>
    %134 = vector.broadcast %81 : vector<1x8xf32> to vector<8x8xf32>
    %135 = arith.addf %133, %134 : vector<8x8xf32>
    %cst_42 = arith.constant dense<0xFF800000> : vector<8xf32>
    %136 = vector.multi_reduction <maximumf>, %135, %cst_42 [1] : vector<8x8xf32> to vector<8xf32>
    %137 = vector.shape_cast %136 : vector<8xf32> to vector<8x1xf32>
    %138 = vector.broadcast %137 : vector<8x1xf32> to vector<8x8xf32>
    %139 = arith.subf %135, %138 : vector<8x8xf32>
    %140 = math.exp %139 : vector<8x8xf32>
    %cst_43 = arith.constant dense<0.000000e+00> : vector<8xf32>
    %141 = vector.multi_reduction <add>, %140, %cst_43 [1] : vector<8x8xf32> to vector<8xf32>
    %142 = vector.shape_cast %141 : vector<8xf32> to vector<8x1xf32>
    %143 = vector.broadcast %142 : vector<8x1xf32> to vector<8x8xf32>
    %144 = arith.divf %140, %143 : vector<8x8xf32>
    %cst_44 = arith.constant dense<0.000000e+00> : vector<8x8xf32>
    %145 = tpu.matmul %144, %132, %cst_44 {dimension_numbers = #tpu.dot_dimension_numbers<[1], [0], [0], [1], [0, 0, 1, 1], [], []>, precision = #tpu.contract_precision<fp32>} : vector<8x8xf32>, vector<8x8xf32>, vector<8x8xf32> -> vector<8x8xf32>
    %146 = tpu.concatenate %97, %113, %129, %145 in 1 : vector<8x8xf32>, vector<8x8xf32>, vector<8x8xf32>, vector<8x8xf32> -> vector<8x32xf32>
    %147 = tpu.concatenate %78, %146 in 0 : vector<8x32xf32>, vector<8x32xf32> -> vector<16x32xf32>
    %c0_45 = arith.constant 0 : index
    %c0_46 = arith.constant 0 : index
    %c0_47 = arith.constant 0 : index
    %148 = vector.load %arg8[%c0_45, %c0_46, %c0_47] : memref<1x32x32xf32, #tpu.memory_space<vmem>>, vector<1x32x32xf32>
    %149 = vector.shape_cast %148 : vector<1x32x32xf32> to vector<32x32xf32>
    %cst_48 = arith.constant dense<0.000000e+00> : vector<16x32xf32>
    %150 = tpu.matmul %147, %149, %cst_48 {dimension_numbers = #tpu.dot_dimension_numbers<[1], [0], [0], [1], [0, 0, 1, 1], [], []>, precision = #tpu.contract_precision<fp32>} : vector<16x32xf32>, vector<32x32xf32>, vector<16x32xf32> -> vector<16x32xf32>
    %c0_49 = arith.constant 0 : index
    %c0_50 = arith.constant 0 : index
    %c0_51 = arith.constant 0 : index
    %151 = vector.load %arg9[%c0_49, %c0_50, %c0_51] : memref<1x1x32xf32, #tpu.memory_space<vmem>>, vector<1x1x32xf32>
    %152 = vector.shape_cast %151 : vector<1x1x32xf32> to vector<1x32xf32>
    %153 = vector.broadcast %152 : vector<1x32xf32> to vector<16x32xf32>
    %154 = arith.addf %150, %153 : vector<16x32xf32>
    %155 = arith.addf %3, %154 : vector<16x32xf32>
    %c0_52 = arith.constant 0 : index
    %c0_53 = arith.constant 0 : index
    %c0_54 = arith.constant 0 : index
    %156 = vector.load %arg10[%c0_52, %c0_53, %c0_54] : memref<1x1x32xf32, #tpu.memory_space<vmem>>, vector<1x1x32xf32>
    %157 = vector.shape_cast %156 : vector<1x1x32xf32> to vector<1x32xf32>
    %c0_55 = arith.constant 0 : index
    %c0_56 = arith.constant 0 : index
    %c0_57 = arith.constant 0 : index
    %158 = vector.load %arg11[%c0_55, %c0_56, %c0_57] : memref<1x1x32xf32, #tpu.memory_space<vmem>>, vector<1x1x32xf32>
    %159 = vector.shape_cast %158 : vector<1x1x32xf32> to vector<1x32xf32>
    %cst_58 = arith.constant dense<0.000000e+00> : vector<16xf32>
    %160 = vector.multi_reduction <add>, %155, %cst_58 [1] : vector<16x32xf32> to vector<16xf32>
    %161 = vector.shape_cast %160 : vector<16xf32> to vector<16x1xf32>
    %cst_59 = arith.constant 3.200000e+01 : f32
    %162 = vector.broadcast %cst_59 : f32 to vector<16x1xf32>
    %163 = arith.divf %161, %162 : vector<16x1xf32>
    %164 = vector.broadcast %163 : vector<16x1xf32> to vector<16x32xf32>
    %165 = arith.subf %155, %164 : vector<16x32xf32>
    %166 = arith.mulf %165, %165 : vector<16x32xf32>
    %cst_60 = arith.constant dense<0.000000e+00> : vector<16xf32>
    %167 = vector.multi_reduction <add>, %166, %cst_60 [1] : vector<16x32xf32> to vector<16xf32>
    %168 = vector.shape_cast %167 : vector<16xf32> to vector<16x1xf32>
    %cst_61 = arith.constant 3.200000e+01 : f32
    %169 = vector.broadcast %cst_61 : f32 to vector<16x1xf32>
    %170 = arith.divf %168, %169 : vector<16x1xf32>
    %171 = vector.broadcast %163 : vector<16x1xf32> to vector<16x32xf32>
    %172 = arith.subf %155, %171 : vector<16x32xf32>
    %cst_62 = arith.constant 9.99999996E-13 : f32
    %173 = vector.broadcast %cst_62 : f32 to vector<16x1xf32>
    %174 = arith.addf %170, %173 : vector<16x1xf32>
    %175 = math.rsqrt %174 : vector<16x1xf32>
    %176 = vector.broadcast %175 : vector<16x1xf32> to vector<16x32xf32>
    %177 = arith.mulf %172, %176 : vector<16x32xf32>
    %178 = vector.broadcast %157 : vector<1x32xf32> to vector<16x32xf32>
    %179 = arith.mulf %177, %178 : vector<16x32xf32>
    %180 = vector.broadcast %159 : vector<1x32xf32> to vector<16x32xf32>
    %181 = arith.addf %179, %180 : vector<16x32xf32>
    %c0_63 = arith.constant 0 : index
    %c0_64 = arith.constant 0 : index
    %c0_65 = arith.constant 0 : index
    %182 = vector.load %arg12[%c0_63, %c0_64, %c0_65] : memref<1x32x64xf32, #tpu.memory_space<vmem>>, vector<1x32x64xf32>
    %183 = vector.shape_cast %182 : vector<1x32x64xf32> to vector<32x64xf32>
    %cst_66 = arith.constant dense<0.000000e+00> : vector<16x64xf32>
    %184 = tpu.matmul %181, %183, %cst_66 {dimension_numbers = #tpu.dot_dimension_numbers<[1], [0], [0], [1], [0, 0, 1, 1], [], []>, precision = #tpu.contract_precision<fp32>} : vector<16x32xf32>, vector<32x64xf32>, vector<16x64xf32> -> vector<16x64xf32>
    %c0_67 = arith.constant 0 : index
    %c0_68 = arith.constant 0 : index
    %c0_69 = arith.constant 0 : index
    %185 = vector.load %arg13[%c0_67, %c0_68, %c0_69] : memref<1x1x64xf32, #tpu.memory_space<vmem>>, vector<1x1x64xf32>
    %186 = vector.shape_cast %185 : vector<1x1x64xf32> to vector<1x64xf32>
    %187 = vector.broadcast %186 : vector<1x64xf32> to vector<16x64xf32>
    %188 = arith.addf %184, %187 : vector<16x64xf32>
    %189 = arith.mulf %188, %188 : vector<16x64xf32>
    %190 = arith.mulf %188, %189 : vector<16x64xf32>
    %cst_70 = arith.constant 4.471500e-02 : f32
    %191 = vector.broadcast %cst_70 : f32 to vector<16x64xf32>
    %192 = arith.mulf %191, %190 : vector<16x64xf32>
    %193 = arith.addf %188, %192 : vector<16x64xf32>
    %cst_71 = arith.constant 0.797884583 : f32
    %194 = vector.broadcast %cst_71 : f32 to vector<16x64xf32>
    %195 = arith.mulf %194, %193 : vector<16x64xf32>
    %196 = math.tanh %195 : vector<16x64xf32>
    %cst_72 = arith.constant 1.000000e+00 : f32
    %197 = vector.broadcast %cst_72 : f32 to vector<16x64xf32>
    %198 = arith.addf %197, %196 : vector<16x64xf32>
    %cst_73 = arith.constant 5.000000e-01 : f32
    %199 = vector.broadcast %cst_73 : f32 to vector<16x64xf32>
    %200 = arith.mulf %199, %198 : vector<16x64xf32>
    %201 = arith.mulf %188, %200 : vector<16x64xf32>
    %c0_74 = arith.constant 0 : index
    %c0_75 = arith.constant 0 : index
    %c0_76 = arith.constant 0 : index
    %202 = vector.load %arg14[%c0_74, %c0_75, %c0_76] : memref<1x64x32xf32, #tpu.memory_space<vmem>>, vector<1x64x32xf32>
    %203 = vector.shape_cast %202 : vector<1x64x32xf32> to vector<64x32xf32>
    %cst_77 = arith.constant dense<0.000000e+00> : vector<16x32xf32>
    %204 = tpu.matmul %201, %203, %cst_77 {dimension_numbers = #tpu.dot_dimension_numbers<[1], [0], [0], [1], [0, 0, 1, 1], [], []>, precision = #tpu.contract_precision<fp32>} : vector<16x64xf32>, vector<64x32xf32>, vector<16x32xf32> -> vector<16x32xf32>
    %c0_78 = arith.constant 0 : index
    %c0_79 = arith.constant 0 : index
    %c0_80 = arith.constant 0 : index
    %205 = vector.load %arg15[%c0_78, %c0_79, %c0_80] : memref<1x1x32xf32, #tpu.memory_space<vmem>>, vector<1x1x32xf32>
    %206 = vector.shape_cast %205 : vector<1x1x32xf32> to vector<1x32xf32>
    %207 = vector.broadcast %206 : vector<1x32xf32> to vector<16x32xf32>
    %208 = arith.addf %204, %207 : vector<16x32xf32>
    %209 = arith.addf %181, %208 : vector<16x32xf32>
    %c0_81 = arith.constant 0 : index
    %c0_82 = arith.constant 0 : index
    %c0_83 = arith.constant 0 : index
    %210 = vector.load %arg16[%c0_81, %c0_82, %c0_83] : memref<1x1x32xf32, #tpu.memory_space<vmem>>, vector<1x1x32xf32>
    %211 = vector.shape_cast %210 : vector<1x1x32xf32> to vector<1x32xf32>
    %c0_84 = arith.constant 0 : index
    %c0_85 = arith.constant 0 : index
    %c0_86 = arith.constant 0 : index
    %212 = vector.load %arg17[%c0_84, %c0_85, %c0_86] : memref<1x1x32xf32, #tpu.memory_space<vmem>>, vector<1x1x32xf32>
    %213 = vector.shape_cast %212 : vector<1x1x32xf32> to vector<1x32xf32>
    %cst_87 = arith.constant dense<0.000000e+00> : vector<16xf32>
    %214 = vector.multi_reduction <add>, %209, %cst_87 [1] : vector<16x32xf32> to vector<16xf32>
    %215 = vector.shape_cast %214 : vector<16xf32> to vector<16x1xf32>
    %cst_88 = arith.constant 3.200000e+01 : f32
    %216 = vector.broadcast %cst_88 : f32 to vector<16x1xf32>
    %217 = arith.divf %215, %216 : vector<16x1xf32>
    %218 = vector.broadcast %217 : vector<16x1xf32> to vector<16x32xf32>
    %219 = arith.subf %209, %218 : vector<16x32xf32>
    %220 = arith.mulf %219, %219 : vector<16x32xf32>
    %cst_89 = arith.constant dense<0.000000e+00> : vector<16xf32>
    %221 = vector.multi_reduction <add>, %220, %cst_89 [1] : vector<16x32xf32> to vector<16xf32>
    %222 = vector.shape_cast %221 : vector<16xf32> to vector<16x1xf32>
    %cst_90 = arith.constant 3.200000e+01 : f32
    %223 = vector.broadcast %cst_90 : f32 to vector<16x1xf32>
    %224 = arith.divf %222, %223 : vector<16x1xf32>
    %225 = vector.broadcast %217 : vector<16x1xf32> to vector<16x32xf32>
    %226 = arith.subf %209, %225 : vector<16x32xf32>
    %cst_91 = arith.constant 9.99999996E-13 : f32
    %227 = vector.broadcast %cst_91 : f32 to vector<16x1xf32>
    %228 = arith.addf %224, %227 : vector<16x1xf32>
    %229 = math.rsqrt %228 : vector<16x1xf32>
    %230 = vector.broadcast %229 : vector<16x1xf32> to vector<16x32xf32>
    %231 = arith.mulf %226, %230 : vector<16x32xf32>
    %232 = vector.broadcast %211 : vector<1x32xf32> to vector<16x32xf32>
    %233 = arith.mulf %231, %232 : vector<16x32xf32>
    %234 = vector.broadcast %213 : vector<1x32xf32> to vector<16x32xf32>
    %235 = arith.addf %233, %234 : vector<16x32xf32>
    %c0_92 = arith.constant 0 : index
    %c0_93 = arith.constant 0 : index
    %236 = vector.load %arg19[%c0_92, %c0_93] : memref<16x32xf32, #tpu.memory_space<vmem>>, vector<16x32xf32>
    tpu.vector_store %arg19[%c0_92, %c0_93], %235 {strides = array<i32>} : memref<16x32xf32, #tpu.memory_space<vmem>>, vector<16x32xf32>,
    %c1_i32 = arith.constant 1 : i32
    %237 = arith.cmpi eq, %arg1, %c1_i32 : i32
    %238 = arith.extui %237 : i1 to i32
    %c0_i32_94 = arith.constant 0 : i32
    %239 = arith.cmpi ne, %238, %c0_i32_94 : i32
    scf.if %239 {
      %c0_95 = arith.constant 0 : index
      %c0_96 = arith.constant 0 : index
      %240 = vector.load %arg18[%c0_95, %c0_96] : memref<16x32xf32, #tpu.memory_space<vmem>>, vector<16x32xf32>
      tpu.vector_store %arg18[%c0_95, %c0_96], %235 {strides = array<i32>} : memref<16x32xf32, #tpu.memory_space<vmem>>, vector<16x32xf32>,
    } else {
    }
    return
  }
  func.func @transform_0(%arg0: i32, %arg1: i32) -> (i32, i32) {
    %c0_i32 = arith.constant 0 : i32
    %c0_i32_0 = arith.constant 0 : i32
    return %arg0, %c0_i32 : i32, i32
  }
  func.func @transform_1(%arg0: i32, %arg1: i32) -> (i32, i32, i32) {
    %c0_i32 = arith.constant 0 : i32
    %c0_i32_0 = arith.constant 0 : i32
    %c0_i32_1 = arith.constant 0 : i32
    return %arg0, %c0_i32, %c0_i32_0 : i32, i32, i32
  }
  func.func @transform_2(%arg0: i32, %arg1: i32) -> (i32, i32) {
    %c0_i32 = arith.constant 0 : i32
    %c0_i32_0 = arith.constant 0 : i32
    %c0_i32_1 = arith.constant 0 : i32
    return %c0_i32, %c0_i32_0 : i32, i32
  }
  func.func @transform_3(%arg0: i32, %arg1: i32) -> (i32, i32) {
    %c0_i32 = arith.constant 0 : i32
    %c0_i32_0 = arith.constant 0 : i32
    %c0_i32_1 = arith.constant 0 : i32
    return %c0_i32, %c0_i32_0 : i32, i32
  }
  func.func @transform_4(%arg0: i32, %arg1: i32) -> (i32, i32, i32) {
    %c0_i32 = arith.constant 0 : i32
    %c0_i32_0 = arith.constant 0 : i32
    %c0_i32_1 = arith.constant 0 : i32
    return %arg1, %c0_i32, %c0_i32_0 : i32, i32, i32
  }
  func.func @transform_5(%arg0: i32, %arg1: i32) -> (i32, i32, i32) {
    %c0_i32 = arith.constant 0 : i32
    %c0_i32_0 = arith.constant 0 : i32
    %c0_i32_1 = arith.constant 0 : i32
    return %arg1, %c0_i32, %c0_i32_0 : i32, i32, i32
  }
  func.func @transform_6(%arg0: i32, %arg1: i32) -> (i32, i32, i32) {
    %c0_i32 = arith.constant 0 : i32
    %c0_i32_0 = arith.constant 0 : i32
    %c0_i32_1 = arith.constant 0 : i32
    return %arg1, %c0_i32, %c0_i32_0 : i32, i32, i32
  }
  func.func @transform_7(%arg0: i32, %arg1: i32) -> (i32, i32, i32) {
    %c0_i32 = arith.constant 0 : i32
    %c0_i32_0 = arith.constant 0 : i32
    %c0_i32_1 = arith.constant 0 : i32
    return %arg1, %c0_i32, %c0_i32_0 : i32, i32, i32
  }
  func.func @transform_8(%arg0: i32, %arg1: i32) -> (i32, i32, i32) {
    %c0_i32 = arith.constant 0 : i32
    %c0_i32_0 = arith.constant 0 : i32
    %c0_i32_1 = arith.constant 0 : i32
    return %arg1, %c0_i32, %c0_i32_0 : i32, i32, i32
  }
  func.func @transform_9(%arg0: i32, %arg1: i32) -> (i32, i32, i32) {
    %c0_i32 = arith.constant 0 : i32
    %c0_i32_0 = arith.constant 0 : i32
    %c0_i32_1 = arith.constant 0 : i32
    return %arg1, %c0_i32, %c0_i32_0 : i32, i32, i32
  }
  func.func @transform_10(%arg0: i32, %arg1: i32) -> (i32, i32, i32) {
    %c0_i32 = arith.constant 0 : i32
    %c0_i32_0 = arith.constant 0 : i32
    %c0_i32_1 = arith.constant 0 : i32
    return %arg1, %c0_i32, %c0_i32_0 : i32, i32, i32
  }
  func.func @transform_11(%arg0: i32, %arg1: i32) -> (i32, i32, i32) {
    %c0_i32 = arith.constant 0 : i32
    %c0_i32_0 = arith.constant 0 : i32
    %c0_i32_1 = arith.constant 0 : i32
    return %arg1, %c0_i32, %c0_i32_0 : i32, i32, i32
  }
  func.func @transform_12(%arg0: i32, %arg1: i32) -> (i32, i32, i32) {
    %c0_i32 = arith.constant 0 : i32
    %c0_i32_0 = arith.constant 0 : i32
    %c0_i32_1 = arith.constant 0 : i32
    return %arg1, %c0_i32, %c0_i32_0 : i32, i32, i32
  }
  func.func @transform_13(%arg0: i32, %arg1: i32) -> (i32, i32, i32) {
    %c0_i32 = arith.constant 0 : i32
    %c0_i32_0 = arith.constant 0 : i32
    %c0_i32_1 = arith.constant 0 : i32
    return %arg1, %c0_i32, %c0_i32_0 : i32, i32, i32
  }
  func.func @transform_14(%arg0: i32, %arg1: i32) -> (i32, i32, i32) {
    %c0_i32 = arith.constant 0 : i32
    %c0_i32_0 = arith.constant 0 : i32
    %c0_i32_1 = arith.constant 0 : i32
    return %arg1, %c0_i32, %c0_i32_0 : i32, i32, i32
  }
  func.func @transform_15(%arg0: i32, %arg1: i32) -> (i32, i32, i32) {
    %c0_i32 = arith.constant 0 : i32
    %c0_i32_0 = arith.constant 0 : i32
    %c0_i32_1 = arith.constant 0 : i32
    return %arg1, %c0_i32, %c0_i32_0 : i32, i32, i32
  }
  func.func @transform_16(%arg0: i32, %arg1: i32) -> (i32, i32) {
    %c0_i32 = arith.constant 0 : i32
    %c0_i32_0 = arith.constant 0 : i32
    return %arg0, %c0_i32 : i32, i32
  }
}

</mosaic_0001>

<bundles_post_ra>
// kernel: tpu_custom_call.1
= control target key start
LH: loop header
LB: loop body
LE: loop exit
PB: predicated region body
PF: predicated region fallthrough
CT: control target
= control target key end

     0   :  { %s13758_s0 = inlined_call_operand.hbm [shape: f32[16,32], index: 0, kind: input, shape index: {}]   ;;  %s13759_s1 = inlined_call_operand.vmem [shape: f32[2,1,8], index: 1, kind: input, shape index: {}]   ;;  %s13760_s2 = inlined_call_operand.hbm [shape: f32[1,32], index: 2, kind: input, shape index: {}]   ;;  %s13761_s3 = inlined_call_operand.hbm [shape: f32[1,32], index: 3, kind: input, shape index: {}]   ;;  %s13762_s4 = inlined_call_operand.vmem [shape: f32[2,32,96], index: 4, kind: input, shape index: {}]   ;;  %s13763_s5 = inlined_call_operand.vmem [shape: f32[2,1,96], index: 5, kind: input, shape index: {}]   ;;  %s13764_s6 = inlined_call_operand.vmem [shape: f32[2,32,32], index: 6, kind: input, shape index: {}]   ;;  %s13765_s7 = inlined_call_operand.vmem [shape: f32[2,1,32], index: 7, kind: input, shape index: {}]   ;;  %s13766_s8 = inlined_call_operand.vmem [shape: f32[2,1,32], index: 8, kind: input, shape index: {}]   ;;  %s13767_s9 = inlined_call_operand.vmem [shape: f32[2,1,32], index: 9, kind: input, shape index: {}]   ;;  %s13768_s10 = inlined_call_operand.vmem [shape: f32[2,32,64], index: 10, kind: input, shape index: {}]   ;;  %s13769_s11 = inlined_call_operand.vmem [shape: f32[2,1,64], index: 11, kind: input, shape index: {}]   ;;  %s13770_s12 = inlined_call_operand.vmem [shape: f32[2,64,32], index: 12, kind: input, shape index: {}]   ;;  %s13771_s13 = inlined_call_operand.vmem [shape: f32[2,1,32], index: 13, kind: input, shape index: {}]   ;;  %s13772_s14 = inlined_call_operand.vmem [shape: f32[2,1,32], index: 14, kind: input, shape index: {}]   ;;  %s13773_s15 = inlined_call_operand.vmem [shape: f32[2,1,32], index: 15, kind: input, shape index: {}]   ;;  %s13774_s16 = inlined_call_operand.hbm [shape: f32[16,32], index: 16, kind: output, shape index: {}]  }
   0x1   :  { %13784 = sst [smem:[#allocation16_spill]] %s13758_s0 }
   0x2   :  { %13785 = sst [smem:[#allocation17_spill]] %s13759_s1 }
   0x3   :  { %13786 = sst [smem:[#allocation18_spill]] %s13760_s2 }
   0x4   :  { %13787 = sst [smem:[#allocation19_spill]] %s13761_s3 }
   0x5   :  { %13788 = sst [smem:[#allocation20_spill]] %s13762_s4 }
   0x6   :  { %13789 = sst [smem:[#allocation21_spill]] %s13764_s6 }
   0x7   :  { %13790 = sst [smem:[#allocation22_spill]] %s13768_s10 }
   0x8   :  { %13791 = sst [smem:[#allocation23_spill]] %s13772_s14 }
   0x9   :  { %13792 = sst [smem:[#allocation24_spill]] %s13773_s15 }
   0xa   :  { %13793 = sst [smem:[#allocation25_spill]] %s13774_s16 }
   0xb   :  { %21 = vsyncpa [#allocation4], 0 }
   0xc   :  { %22 = vsyncpa [#allocation7], 0 }
   0xd   :  { %23 = vsyncpa [#allocation5], 0  ;;  %s12811_s21 = smov 0   ;;  %s12813_s22 = smov 0  }
   0xe   :  { %s12815_s23 = smov 0  }
   0xf LB: > { %13794 = sst [smem:[#allocation13_spill]] %s12697_s22  ;;  %s12703_s24 = smov [#allocation6]   ;;  %s12701_s23 = sphi %s12815_s23, %s29_s23   ;;  %s12697_s22 = sphi %s12813_s22, %s13826_s22   ;;  %s12693_s21 = sphi %s12811_s21, %s13825_s21  }
  0x10   : > { %13795 = sst [smem:[#allocation14_spill]] %s12701_s23  ;;  %s515_s25 = sshll.u32 %s12703_s24, 4  ;;  %s516_s25 = int_to_ptr.vmem [resolvable:$true] %s515_s25 }
  0x11   : > { %s13776_s26 = sadd.s32 4294967295, %s12701_s23   ;;  %p10777_p0 = scmp.ge.s32.totalorder %s12701_s23, 1 }
  0x12   : > { %p478_p1 = scmp.lt.s32.totalorder %s12701_s23, 3  ;;  %p12831_p2 = scmp.eq.s32.totalorder %s13776_s26, 0 }
  0x13   : > { %s38_s29 = sadd.s32 1, %s12697_s22  ;;  %s12704_s17 = smov [#allocation3]  }
  0x14   : > { %s13796_s27 = scalar_select %p12831_p2, 1, 0 }
  0x15   : > { %p12835_p3 = pnand %p10777_p0, %p478_p1  ;;  %p12848_p6 = scmp.ge.s32.totalorder %s38_s29, 2 }
  0x16   : > { %s493_s18 = sshll.u32 %s12704_s17, 4  ;;  %s13800_s2 = sld [smem:[#allocation18_spill]]  ;;  %s12852_s18 = int_to_ptr.vmem [resolvable:$true] %s493_s18 }
  0x17   : > { %s13797_s28 = scalar_select %p12835_p3, 1, 0 }
  0x18   : > { %p12442_p4 = pneg %p12835_p3 }
  0x19   : > { %s13799_s0 = scalar_select %p12848_p6, 1, 0 }
  0x1a   : > { %p12844_p5 = pnand %p12831_p2, %p12442_p4 }
  0x1c   : > { %s12557_s24 = scalar_lea.hbm %s13800_s2, 16  ;;  %p12862_p8 = pneg %p12844_p5 }
  0x1d   : > { %p12558_p7 = scmp.ne.s32.totalorder %s13800_s2, %s12557_s24  ;;  %p12564_p11 = scmp.lt.u32.totalorder %s12557_s24, %s13800_s2 }
  0x1f   : > { %p12560_p9 = pnand %p12862_p8, %p12558_p7 }
  0x21   : > { %p12561_p10 = pneg %p12560_p9 }
  0x23   : > { %p12566_p12 = pnand %p12564_p11, %p12561_p10 }
  0x25   : > { %12569 = shalt.err (!%p12566_p12)
}
  0x26   : > { %s12570_s19 = scalar_lea.vmem %s516_s25, 16  ;;  %s12577_s22 = scalar_lea.vmem %s516_s25, 32 }
  0x27   : > { %p12571_p13 = scmp.ne.s32.totalorder %s516_s25, %s12570_s19  ;;  %p12578_p4 = scmp.lt.s32.totalorder %s516_s25, %s516_s25 }
  0x28   : > { %p12579_p2 = scmp.lt.s32.totalorder %s12577_s22, %s12570_s19 }
  0x29   : > { %p12573_p0 = pnand %p12571_p13, %p12862_p8 }
  0x2a   : > { %p12580_p3 = por %p12579_p2, %p12578_p4 }
  0x2b   : > { %p12574_p1 = pneg %p12573_p0 }
  0x2d   : > { %p12581_p6 = pnand %p12580_p3, %p12574_p1 }
  0x2f   : > { %12584 = shalt.err (!%p12581_p6)
}
  0x30   : > { %12448 = dma.hbm_to_vmem [thread:$0]  (!%p12844_p5), %s13800_s2, 16, %s516_s25, [#allocation7]  }
  0x31   : > { %p13802_p7 = scmp.ne.s32.totalorder %s13799_s0, 0  ;;  %s13804_s17 = sld [smem:[#allocation16_spill]] }
  0x33   : > { %s13828_s29 = smov (%p13802_p7, %s38_s29), 0 }
  0x34   : > { %13803 = sst [smem:[#allocation15_spill]] %s13828_s29 }
  0x37   : > { %s12585_s1 = scalar_lea.hbm %s13804_s17, 256 }
  0x38   : > { %p12586_p2 = scmp.ne.s32.totalorder %s13804_s17, %s12585_s1  ;;  %p12592_p9 = scmp.lt.u32.totalorder %s12585_s1, %s13804_s17 }
  0x3a   : > { %p12588_p3 = pnand %p12586_p2, %p12862_p8 }
  0x3c   : > { %p12589_p6 = pneg %p12588_p3 }
  0x3e   : > { %p12594_p10 = pnand %p12592_p9, %p12589_p6 }
  0x40   : > { %12597 = shalt.err (!%p12594_p10)
}
  0x41   : > { %s12598_s25 = scalar_lea.vmem %s12852_s18, 256  ;;  %p12606_p0 = scmp.lt.s32.totalorder %s12852_s18, %s12852_s18 }
  0x42   : > { %p12599_p11 = scmp.ne.s32.totalorder %s12852_s18, %s12598_s25  ;;  %p12607_p1 = scmp.lt.s32.totalorder %s12598_s25, %s12598_s25 }
  0x44   : > { %p12601_p12 = pnand %p12599_p11, %p12862_p8  ;;  %p12608_p4 = por %p12607_p1, %p12606_p0 }
  0x46   : > { %p12602_p13 = pneg %p12601_p12 }
  0x48   : > { %p12609_p7 = pnand %p12608_p4, %p12602_p13 }
  0x4a   : > { %12612 = shalt.err (!%p12609_p7)
}
  0x4b   : > { %s12705_s15 = smov 128   ;;  %s12706_s1 = smov 8  }
  0x4c   : > { %12445 = dma.hbm_to_vmem [thread:$0]  (!%p12844_p5), %s13804_s17, 256, %s12852_s18, [#allocation4], %s12705_s15, %s12705_s15, %s12706_s1  }
  0x4d   : > { %s12707_s26 = smov [#allocation8]   ;;  %s13805_s3 = sld [smem:[#allocation19_spill]] }
  0x4e   : > { %s526_s20 = sshll.u32 %s12707_s26, 4  ;;  %s527_s20 = int_to_ptr.vmem [resolvable:$true] %s526_s20 }
  0x53   : > { %s12613_s19 = scalar_lea.hbm %s13805_s3, 16 }
  0x54   : > { %p12614_p2 = scmp.ne.s32.totalorder %s13805_s3, %s12613_s19  ;;  %p12620_p9 = scmp.lt.u32.totalorder %s12613_s19, %s13805_s3 }
  0x56   : > { %p12616_p3 = pnand %p12614_p2, %p12862_p8 }
  0x58   : > { %p12617_p6 = pneg %p12616_p3 }
  0x5a   : > { %p12622_p10 = pnand %p12620_p9, %p12617_p6 }
  0x5c   : > { %12625 = shalt.err (!%p12622_p10)
}
  0x5d   : > { %s12626_s18 = scalar_lea.vmem %s527_s20, 16  ;;  %s12633_s15 = scalar_lea.vmem %s527_s20, 32 }
  0x5e   : > { %p12627_p11 = scmp.ne.s32.totalorder %s527_s20, %s12626_s18  ;;  %p12634_p0 = scmp.lt.s32.totalorder %s527_s20, %s527_s20 }
  0x5f   : > { %p12635_p1 = scmp.lt.s32.totalorder %s12633_s15, %s12626_s18 }
  0x60   : > { %p12629_p12 = pnand %p12627_p11, %p12862_p8 }
  0x61   : > { %p12636_p4 = por %p12635_p1, %p12634_p0 }
  0x62   : > { %p12630_p13 = pneg %p12629_p12 }
  0x64   : > { %p12637_p7 = pnand %p12636_p4, %p12630_p13 }
  0x66   : > { %12640 = shalt.err (!%p12637_p7)
}
  0x67   : > { %12451 = dma.hbm_to_vmem [thread:$0]  (!%p12844_p5), %s13805_s3, 16, %s527_s20, [#allocation7]  }
  0x68   : > { %p13806_p2 = scmp.ne.s32.totalorder %s13797_s28, 0 }
  0x69   : > { %p13807_p3 = scmp.ne.s32.totalorder (!%p13806_p2), %s13796_s27, 0 }
  0x6a   : > { %619 = sbr.rel (%p13806_p2) target bundleno = 3692 (0xe6c), region = 84 }
  0x71   : > { %12680 = dma.done.wait (%p13807_p3), [#allocation4], 256  }
  0x72   : > { %12682 = vsyncadd (%p13807_p3), [#allocation4], 4294967040 }
  0x73   : > { %12684 = dma.done.wait (%p13807_p3), [#allocation7], 32  }
  0x74   : > { %12686 = vsyncadd (%p13807_p3), [#allocation7], 4294967264  ;;  %p721_p8 = scmp.lt.s32.totalorder %s12693_s21, 1  ;;  %s13808_s4 = sld [smem:[#allocation20_spill]] }
  0x75   : > { %s13809_s6 = sld [smem:[#allocation21_spill]]  ;;  %s13810_s10 = sld [smem:[#allocation22_spill]] }
  0x76   : > { %s12935_s2 = scalar_select %p721_p8, %s12693_s21, 1 }
  0x77   : > { %s13811_s1 = sld [smem:[#allocation23_spill]]  ;;  %p10795_p5 = scmp.ne.s32.totalorder %s12693_s21, 0 }
  0x78   : > { %s10814_s16 = sshll.u32 %s12935_s2, 5  ;;  %s750_s3 = scalar_lea.vmem %s13769_s11, %s12935_s2  ;;  %v770_v0 = vld [vmem:[#allocation3] sm:$0xff] (!%p10795_p5)  ;;  %vm774_vm0 = vcmask (!%p10795_p5), 261120   ;;  %v771_v1 = vld [vmem:[#allocation3 + $0x8] sm:$0xff] (!%p10795_p5)  ;;  %v10796_v21 = vld [vmem:[#allocation6] ss:$0 sm:$0xff] (!%p10795_p5) }
  0x79   : > { %s758_s14 = scalar_lea.vmem %s13771_s13, %s12935_s2  ;;  %v775_v2 = vsel (!%p10795_p5), %vm774_vm0, %v770_v0, 0.0  ;;  %v778_v3 = vsel (!%p10795_p5), %vm774_vm0, %v771_v1, 0.0  ;;  %v10797_v23 = vld [vmem:[#allocation8] ss:$0 sm:$0xff] (!%p10795_p5) }
  0x7a   : > { %s12945_s26 = scalar_lea.vmem %s13808_s4, %s10814_s16  ;;  %s10817_s4 = sshll.u32 %s12935_s2, 6  ;;  %776 = vadd.xlane.f32.xlu0 (!%p10795_p5), %v775_v2 }
  0x7b   : > { %s12950_s24 = scalar_lea.vmem %s13809_s6, %s10814_s16  ;;  %s12967_s27 = scalar_lea.vmem %s13810_s10, %s10814_s16 }
  0x7c   : > { %s12977_s25 = scalar_lea.vmem %s13770_s12, %s10817_s4  ;;  %s13812_s6 = sld [smem:[#allocation24_spill]] }
  0x7d   : > { %s761_s30 = scalar_lea.vmem %s13811_s1, %s12935_s2  ;;  %769 = sbr.rel (%p10795_p5) target bundleno = 439 (0x1b7), region = 100 }
  0x7e   : > { %779 = vadd.xlane.f32.xlu0 (!%p10795_p5), %v778_v3 }
  0x82   : > { %s764_s10 = scalar_lea.vmem %s13812_s6, %s12935_s2 }
 0x107   : > { %v777_v4 = vpop.xlane.xlu0 %776 }
 0x108   : > { %v782_v5 = vmul.f32 0.03125, %v777_v4 }
 0x10a   : > { %v784_v6 = vsub.f32 %v770_v0, %v782_v5 }
 0x10b   : > { %v780_v7 = vpop.xlane.xlu0 %779 }
 0x10c   : > { %v783_v8 = vmul.f32 0.03125, %v780_v7  ;;  %v786_v9 = vmul.f32 %v784_v6, %v784_v6 }
 0x10e   : > { %v785_v10 = vsub.f32 %v771_v1, %v783_v8  ;;  %v788_v11 = vsel %vm774_vm0, %v786_v9, 0.0 }
 0x10f   : > { %789 = vadd.xlane.f32.xlu1 %v788_v11 }
 0x110   : > { %v787_v12 = vmul.f32 %v785_v10, %v785_v10 }
 0x112   : > { %v791_v13 = vsel %vm774_vm0, %v787_v12, 0.0 }
 0x113   : > { %792 = vadd.xlane.f32.xlu1 %v791_v13 }
 0x19c   : > { %v790_v14 = vpop.xlane.xlu1 %789 }
 0x19d   : > { %v794_v15 = vmul.f32 0.03125, %v790_v14 }
 0x19f   : > { %v796_v16 = vadd.f32 1e-12, %v794_v15 }
 0x1a0   : > { %v793_v17 = vpop.xlane.xlu1 %792 }
 0x1a1   : > { %12507 = vrsqrt.f32 %v796_v16  ;;  %v795_v18 = vmul.f32 0.03125, %v793_v17 }
 0x1a3   : > { %v797_v19 = vadd.f32 1e-12, %v795_v18 }
 0x1a5   : > { %12509 = vrsqrt.f32 %v797_v19 }
 0x1ab   : > { %v12508_v20 = vpop.eup %12507 }
 0x1ac   : > { %v800_v22 = vmul.f32 %v12508_v20, %v784_v6 }
 0x1ae   : > { %v808_v24 = vmul.f32 %v10796_v21, %v800_v22 }
 0x1af   : > { %v12510_v25 = vpop.eup %12509 }
 0x1b0   : > { %v816_v26 = vadd.f32 %v10797_v23, %v808_v24  ;;  %v801_v27 = vmul.f32 %v12510_v25, %v785_v10 }
 0x1b2   : > { %818 = vst.msk [vmem:[#allocation2] sm:$0xff] %vm774_vm0, %v816_v26  ;;  %v809_v28 = vmul.f32 %v10796_v21, %v801_v27 }
 0x1b4   : > { %v817_v29 = vadd.f32 %v10797_v23, %v809_v28 }
 0x1b6   : > { %819 = vst.msk [vmem:[#allocation2 + $0x8] sm:$0xff] %vm774_vm0, %v817_v29 }
 0x1b7 PF: > { %v822_v30 = vld [vmem:[%s12945_s26] sm:$0xff]  ;;  %v823_v31 = vld [vmem:[%s12945_s26 + $0x8] sm:$0xff]  ;;  %v824_v32 = vld [vmem:[%s12945_s26 + $0x10] sm:$0xff]  ;;  %vm833_vm1 = vcmask 261120   ;;  %v12708_v12 = vmov 0.0   ;;  %vm12709_vm2 = vmmov 0   ;;  %s13816_s28 = scalar_lea.vmem %s13766_s8, %s12935_s2  ;;  %s13817_s6 = scalar_lea.vmem %s13767_s9, %s12935_s2 }
 0x1b8   : > { %v841_v33 = vand.u32 4294901760, %v822_v30  ;;  %v844_v34 = vand.u32 4294901760, %v823_v31  ;;  %v825_v35 = vld [vmem:[%s12945_s26 + $0x18] sm:$0xff]  ;;  %v847_v36 = vand.u32 4294901760, %v824_v32  ;;  %11244 = vmatprep.subr.mxu1 %v12708_v12  ;;  %11246 = vmatprep.mubr.msk.f32.mxu1 %vm12709_vm2, %v12708_v12  ;;  %s13813_s26 = scalar_lea.vmem %s13763_s5, %s12935_s2  ;;  %s12710_s1 = smov 88   ;;  %vm1378_vm3 = vcmask 64512  }
 0x1b9   : > { %v820_v37 = vld [vmem:[#allocation2] sm:$0xff]  ;;  %v850_v39 = vand.u32 4294901760, %v825_v35  ;;  %s12711_s29 = smov 96   ;;  %s12712_s20 = smov 112   ;;  %vm5056_vm4 = vcmask 130048   ;;  %vm5058_vm5 = vcmask 195584  }
 0x1ba   : > { %v835_v40 = vsel %vm833_vm1, %v820_v37, 0  ;;  %v13004_v42 = vpack.c.bf16 %v844_v34, %v841_v33  ;;  %v931_v45 = vsub.f32 %v822_v30, %v841_v33  ;;  %v938_v47 = vsub.f32 %v823_v31, %v844_v34  ;;  %v10798_v13 = vld [vmem:[%s13813_s26] ss:$0 sm:$0xff]  ;;  %s12713_s23 = smov 120   ;;  %s12714_s19 = smov 104  }
 0x1bb   : > { %v13006_v43 = vand.u32 4294901760, %v835_v40  ;;  %v13010_v46 = vpack.c.bf16 %v850_v39, %v847_v36  ;;  %v945_v48 = vsub.f32 %v824_v32, %v847_v36  ;;  %v952_v49 = vsub.f32 %v825_v35, %v850_v39  ;;  %s12715_s22 = smov 80   ;;  %s12716_s18 = smov 72  }
 0x1bc   : > { %11971 = vmatprep.subr.bf16.mxu0 %v13004_v42  ;;  %v932_v52 = vand.u32 4294901760, %v931_v45  ;;  %v939_v53 = vand.u32 4294901760, %v938_v47  ;;  %v11986_v8 = vpack.c.bf16 %v938_v47, %v931_v45  ;;  %s13814_s16 = sld [smem:[#allocation17_spill]]  ;;  %s12717_s0 = smov 64   ;;  %vm9920_vm6 = vcmask 523264  }
 0x1bd   : > { %v821_v38 = vld [vmem:[#allocation2 + $0x8] sm:$0xff]  ;;  %v910_v50 = vsub.f32 %v835_v40, %v13006_v43  ;;  %11973 = vmatpush3.bf16.msra.mxu0 %v13004_v42  ;;  %v946_v54 = vand.u32 4294901760, %v945_v48  ;;  %v953_v55 = vand.u32 4294901760, %v952_v49  ;;  %v11990_v9 = vpack.c.bf16 %v952_v49, %v945_v48  ;;  %s12718_s4 = smov 56   ;;  %p10809_p6 = scmp.ne.s32.totalorder %s12693_s21, 1 }
 0x1be   : > { %v838_v41 = vsel %vm833_vm1, %v821_v38, 0  ;;  %11975 = vmatprep.subr.bf16.mxu0 %v13010_v46  ;;  %v933_v58 = vsub.f32 %v931_v45, %v932_v52  ;;  %v940_v59 = vsub.f32 %v938_v47, %v939_v53  ;;  %v12002_v10 = vpack.c.bf16 %v939_v53, %v932_v52 }
 0x1bf   : > { %v13008_v44 = vand.u32 4294901760, %v838_v41  ;;  %v911_v56 = vand.u32 4294901760, %v910_v50  ;;  %v947_v60 = vsub.f32 %v945_v48, %v946_v54  ;;  %v954_v61 = vsub.f32 %v952_v49, %v953_v55 }
 0x1c0   : > { %v934_v0 = vand.u32 4294901760, %v933_v58  ;;  %v941_v1 = vand.u32 4294901760, %v940_v59  ;;  %v12006_v11 = vpack.c.bf16 %v953_v55, %v946_v54 }
 0x1c1   : > { %v920_v51 = vsub.f32 %v838_v41, %v13008_v44  ;;  %v912_v62 = vsub.f32 %v910_v50, %v911_v56  ;;  %11977 = vmatpush3.bf16.msra.mxu0 %v13010_v46  ;;  %v948_v2 = vand.u32 4294901760, %v947_v60  ;;  %v955_v3 = vand.u32 4294901760, %v954_v61 }
 0x1c2   : > { %v11978_v6 = vpack.c.bf16 %v941_v1, %v934_v0 }
 0x1c3   : > { %v921_v57 = vand.u32 4294901760, %v920_v51  ;;  %v913_v4 = vand.u32 4294901760, %v912_v62  ;;  %v11982_v7 = vpack.c.bf16 %v955_v3, %v948_v2 }
 0x1c4   : > { %11979 = vmatprep.subr.bf16.mxu0 %v11978_v6 }
 0x1c5   : > { %v922_v63 = vsub.f32 %v920_v51, %v921_v57  ;;  %11186 = vmatprep.mubr.f32.mxu0 %v913_v4 }
 0x1c7   : > { %v923_v5 = vand.u32 4294901760, %v922_v63 }
 0x1c9   : > { %11187 = vmatmul.mubr.f32.vlgmr.msra.gmra.mrb[0].mxu0 %v923_v5 }
 0x1ca   : > { %11981 = vmatpush3.bf16.msra.mxu0 %v11978_v6  ;;  %11197 = vmatprep.mubr.f32.mxu0 %v13006_v43 }
 0x1cb   : > { %11983 = vmatprep.subr.bf16.mxu0 %v11982_v7 }
 0x1ce   : > { %11985 = vmatpush3.bf16.msra.mxu0 %v11982_v7 }
 0x1cf   : > { %11987 = vmatprep.subr.bf16.mxu0 %v11986_v8 }
 0x1d1   : > { %11198 = vmatmul.mubr.f32.vlgmr.msra.gmra.mrb[0].mxu0 %v13008_v44 }
 0x1d2   : > { %11989 = vmatpush3.bf16.msra.mxu0 %v11986_v8  ;;  %11208 = vmatprep.mubr.f32.mxu0 %v910_v50 }
 0x1d3   : > { %11991 = vmatprep.subr.bf16.mxu0 %v11990_v9 }
 0x1d6   : > { %11993 = vmatpush3.bf16.msra.mxu0 %v11990_v9 }
 0x1d7   : > { %11995 = vmatprep.subr.bf16.mxu0 %v13004_v42 }
 0x1d9   : > { %11209 = vmatmul.mubr.f32.vlgmr.msra.gmra.mrb[0].mxu0 %v920_v51 }
 0x1da   : > { %11997 = vmatpush3.bf16.msra.mxu0 %v13004_v42  ;;  %11219 = vmatprep.mubr.f32.mxu0 %v911_v56 }
 0x1db   : > { %11999 = vmatprep.subr.bf16.mxu0 %v13010_v46 }
 0x1de   : > { %12001 = vmatpush3.bf16.msra.mxu0 %v13010_v46 }
 0x1df   : > { %12003 = vmatprep.subr.bf16.mxu0 %v12002_v10 }
 0x1e1   : > { %11220 = vmatmul.mubr.f32.vlgmr.msra.gmra.mrb[0].mxu0 %v921_v57 }
 0x1e2   : > { %12005 = vmatpush3.bf16.msra.mxu0 %v12002_v10  ;;  %11230 = vmatprep.mubr.f32.mxu0 %v13006_v43 }
 0x1e3   : > { %12007 = vmatprep.subr.bf16.mxu0 %v12006_v11 }
 0x1e6   : > { %12009 = vmatpush3.bf16.msra.mxu0 %v12006_v11 }
 0x1e7   : > { %12011 = vmatprep.subr.bf16.mxu0 %v13004_v42 }
 0x1e9   : > { %11231 = vmatmul.mubr.f32.vlgmr.msra.gmra.mrb[0].mxu0 %v13008_v44 }
 0x1ea   : > { %12013 = vmatpush3.bf16.msra.mxu0 %v13004_v42  ;;  %11241 = vmatprep.mubr.f32.mxu0 %v13006_v43 }
 0x1eb   : > { %12015 = vmatprep.subr.bf16.mxu0 %v13010_v46 }
 0x1ee   : > { %12017 = vmatpush3.bf16.msra.mxu0 %v13010_v46 }
 0x1ef   : > { %11304 = vmatprep.subr.mxu0 %v12708_v12 }
 0x1f1   : > { %11242 = vmatmul.mubr.f32.vlgmr.msra.gmra.mrb[0].mxu0 %v13008_v44 }
 0x1f2   : > { %11306 = vmatprep.mubr.msk.f32.mxu0 %vm12709_vm2, %v12708_v12 }
 0x2c4   : > { %v11243_v14 = vpop.f32.mrb[0].mxu0 }
 0x2c5   : > { %v1358_v15 = vpop.f32.mrb[1].mxu0  ;;  %v13051_v17 = vadd.f32 %v11243_v14, %v10798_v13 }
 0x2c6   : > { %v13043_v16 = vadd.f32 %v10798_v13, %v1358_v15 }
 0x2c7   : > { %v5071_v10 = vsel %vm1378_vm3, %v13051_v17, 0 }
 0x2c8   : > { %2294 = vrot.lane.b32.xlu1 %v13043_v16, %s12710_s1  ;;  %1376 = vrot.lane.b32.xlu0 %v13043_v16, %s12711_s29  ;;  %v1379_v18 = vsel %vm1378_vm3, %v13043_v16, 0  ;;  %v5141_v13 = vand.u32 4294901760, %v5071_v10 }
 0x2c9   : > { %v13063_v19 = vand.u32 4294901760, %v1379_v18 }
 0x2ca   : > { %v5142_v15 = vsub.f32 %v5071_v10, %v5141_v13 }
 0x2cb   : > { %v1450_v20 = vsub.f32 %v1379_v18, %v13063_v19 }
 0x2cc   : > { %3209 = vrot.lane.b32.xlu1 %v13043_v16, %s12712_s20  ;;  %2292 = vrot.lane.b32.xlu0 %v13043_v16, %s12713_s23 }
 0x2cd   : > { %v1451_v21 = vand.u32 4294901760, %v1450_v20 }
 0x2cf   : > { %v1452_v26 = vsub.f32 %v1450_v20, %v1451_v21 }
 0x2d0   : > { %4126 = vrot.lane.b32.xlu1 %v13043_v16, %s12714_s19  ;;  %3211 = vrot.lane.b32.xlu0 %v13043_v16, %s12715_s22 }
 0x2d1   : > { %v1453_v33 = vand.u32 4294901760, %v1452_v26 }
 0x2d4   : > { %5069 = vrot.lane.b32.xlu1 %v13051_v17, %s12711_s29  ;;  %4128 = vrot.lane.b32.xlu0 %v13043_v16, %s12716_s18  ;;  %s12720_s29 = smov 40  }
 0x2d8   : > { %5986 = vrot.lane.b32.xlu1 %v13051_v17, %s12710_s1  ;;  %5984 = vrot.lane.b32.xlu0 %v13051_v17, %s12713_s23  ;;  %s12719_s1 = smov 48   ;;  %s12722_s23 = smov 16  }
 0x2dc   : > { %6903 = vrot.lane.b32.xlu1 %v13051_v17, %s12715_s22  ;;  %6901 = vrot.lane.b32.xlu0 %v13051_v17, %s12712_s20  ;;  %s12721_s20 = smov 8  }
 0x2e0   : > { %7820 = vrot.lane.b32.xlu1 %v13051_v17, %s12716_s18  ;;  %7818 = vrot.lane.b32.xlu0 %v13051_v17, %s12714_s19  ;;  %s12723_s19 = smov 24   ;;  %s13815_s18 = scalar_lea.vmem %s13765_s7, %s12935_s2 }
 0x33a   : > { %v2295_v22 = vpop.permute.xlu1 %2294  ;;  %v1377_v23 = vpop.permute.xlu0 %1376 }
 0x33b   : > { %v2298_v24 = vsel %vm1378_vm3, %v2295_v22, 0  ;;  %v1381_v25 = vsel %vm1378_vm3, %v1377_v23, 0 }
 0x33c   : > { %v13068_v27 = vand.u32 4294901760, %v2298_v24  ;;  %v1384_v28 = vand.u32 4294901760, %v1381_v25 }
 0x33e   : > { %v2378_v29 = vsub.f32 %v2298_v24, %v13068_v27  ;;  %v1461_v30 = vsub.f32 %v1381_v25, %v1384_v28  ;;  %11305 = vmatpush3.xpose.msra.mxu0 %v13068_v27  ;;  %11245 = vmatpush3.xpose.msra.mxu1 %v1384_v28  ;;  %v2293_v31 = vpop.permute.xlu0 %2292  ;;  %v3210_v45 = vpop.permute.xlu1 %3209 }
 0x33f   : > { %v2296_v32 = vsel %vm1378_vm3, %v2293_v31, 0  ;;  %11249 = vmatprep.subr.mxu1 %v12708_v12  ;;  %11309 = vmatprep.subr.mxu0 %v12708_v12  ;;  %v3213_v47 = vsel %vm1378_vm3, %v3210_v45, 0 }
 0x340   : > { %v1462_v34 = vand.u32 4294901760, %v1461_v30  ;;  %v13075_v35 = vand.u32 4294901760, %v2296_v32  ;;  %v2379_v36 = vand.u32 4294901760, %v2378_v29  ;;  %v3283_v49 = vand.u32 4294901760, %v3213_v47 }
 0x341   : > { %11247 = vmatmul.mubr.f32.vlgmr.msra.gmra.mrb[0].mxu1 %v1453_v33 }
 0x342   : > { %v1463_v37 = vsub.f32 %v1461_v30, %v1462_v34  ;;  %v2367_v38 = vsub.f32 %v2296_v32, %v13075_v35  ;;  %11251 = vmatprep.mubr.msk.f32.mxu1 %vm12709_vm2, %v12708_v12  ;;  %v2380_v41 = vsub.f32 %v2378_v29, %v2379_v36  ;;  %v3212_v46 = vpop.permute.xlu0 %3211  ;;  %v3284_v51 = vsub.f32 %v3213_v47, %v3283_v49  ;;  %v4127_v59 = vpop.permute.xlu1 %4126 }
 0x343   : > { %v3215_v48 = vsel %vm1378_vm3, %v3212_v46, 0  ;;  %v4130_v61 = vsel %vm1378_vm3, %v4127_v59, 0 }
 0x344   : > { %v1464_v39 = vand.u32 4294901760, %v1463_v37  ;;  %v2368_v40 = vand.u32 4294901760, %v2367_v38  ;;  %v2381_v44 = vand.u32 4294901760, %v2380_v41  ;;  %v3218_v50 = vand.u32 4294901760, %v3215_v48 }
 0x345   : > { %v3285_v53 = vand.u32 4294901760, %v3284_v51  ;;  %v4200_v63 = vand.u32 4294901760, %v4130_v61 }
 0x346   : > { %v2369_v42 = vsub.f32 %v2367_v38, %v2368_v40  ;;  %11250 = vmatpush3.xpose.msra.mxu1 %v1464_v39  ;;  %v3295_v52 = vsub.f32 %v3215_v48, %v3218_v50  ;;  %v4129_v60 = vpop.permute.xlu0 %4128  ;;  %v5070_v9 = vpop.permute.xlu1 %5069 }
 0x347   : > { %11254 = vmatprep.subr.mxu1 %v12708_v12  ;;  %v3286_v55 = vsub.f32 %v3284_v51, %v3285_v53  ;;  %v4132_v62 = vsel %vm1378_vm3, %v4129_v60, 0  ;;  %v4201_v1 = vsub.f32 %v4130_v61, %v4200_v63  ;;  %v5073_v11 = vsel %vm1378_vm3, %v5070_v9, 0 }
 0x348   : > { %v2370_v43 = vand.u32 4294901760, %v2369_v42  ;;  %v3296_v54 = vand.u32 4294901760, %v3295_v52  ;;  %v4135_v0 = vand.u32 4294901760, %v4132_v62  ;;  %v5076_v14 = vand.u32 4294901760, %v5073_v11 }
 0x349   : > { %11252 = vmatmul.mubr.f32.vlgmr.msra.gmra.mrb[0].mxu1 %v13063_v19  ;;  %v3287_v57 = vand.u32 4294901760, %v3286_v55  ;;  %v4202_v3 = vand.u32 4294901760, %v4201_v1 }
 0x34a   : > { %11307 = vmatmul.mubr.f32.vlgmr.msra.gmra.mrb[2].mxu0 %v2370_v43  ;;  %11255 = vmatpush3.xpose.msra.mxu1 %v1461_v30  ;;  %v3297_v56 = vsub.f32 %v3295_v52, %v3296_v54  ;;  %v4212_v2 = vsub.f32 %v4132_v62, %v4135_v0  ;;  %v5153_v18 = vsub.f32 %v5073_v11, %v5076_v14  ;;  %v5985_v25 = vpop.permute.xlu0 %5984  ;;  %v5987_v26 = vpop.permute.xlu1 %5986 }
 0x34b   : > { %11310 = vmatpush3.xpose.msra.mxu0 %v2381_v44  ;;  %11256 = vmatprep.mubr.msk.f32.mxu1 %vm12709_vm2, %v12708_v12  ;;  %v4203_v5 = vsub.f32 %v4201_v1, %v4202_v3 }
 0x34c   : > { %11259 = vmatprep.subr.mxu1 %v12708_v12  ;;  %11311 = vmatprep.mubr.msk.f32.mxu0 %vm12709_vm2, %v12708_v12  ;;  %v3298_v58 = vand.u32 4294901760, %v3297_v56  ;;  %v4213_v4 = vand.u32 4294901760, %v4212_v2 }
 0x34d   : > { %11314 = vmatprep.subr.mxu0 %v12708_v12  ;;  %v4204_v7 = vand.u32 4294901760, %v4203_v5 }
 0x34e   : > { %v4214_v6 = vsub.f32 %v4212_v2, %v4213_v4  ;;  %v6902_v39 = vpop.permute.xlu0 %6901 }
 0x34f   : > { %v6905_v41 = vsel %vm1378_vm3, %v6902_v39, 0  ;;  %v13267_v39 = vld [vmem:[%s13814_s16 + $0x1] ss:$0 sm:$0xff] }
 0x350   : > { %v4215_v8 = vand.u32 4294901760, %v4214_v6  ;;  %v6975_v43 = vand.u32 4294901760, %v6905_v41 }
 0x351   : > { %11257 = vmatmul.mubr.f32.vlgmr.msra.gmra.mrb[0].mxu1 %v1450_v20  ;;  %v5154_v20 = vand.u32 4294901760, %v5153_v18 }
 0x352   : > { %11260 = vmatpush3.xpose.msra.mxu1 %v1384_v28  ;;  %11312 = vmatmul.mubr.f32.vlgmr.msra.gmra.mrb[2].mxu0 %v13075_v35  ;;  %v6976_v45 = vsub.f32 %v6905_v41, %v6975_v43 }
 0x353   : > { %11315 = vmatpush3.xpose.msra.mxu0 %v2378_v29  ;;  %11261 = vmatprep.mubr.msk.f32.mxu1 %vm12709_vm2, %v12708_v12  ;;  %v5155_v22 = vsub.f32 %v5153_v18, %v5154_v20 }
 0x354   : > { %11264 = vmatprep.subr.mxu1 %v12708_v12  ;;  %11316 = vmatprep.mubr.msk.f32.mxu0 %vm12709_vm2, %v12708_v12  ;;  %v6977_v47 = vand.u32 4294901760, %v6976_v45 }
 0x355   : > { %11319 = vmatprep.subr.mxu0 %v12708_v12  ;;  %v5156_v24 = vand.u32 4294901760, %v5155_v22 }
 0x359   : > { %11262 = vmatmul.mubr.f32.vlgmr.msra.gmra.mrb[0].mxu1 %v1451_v21 }
 0x35a   : > { %11265 = vmatpush3.xpose.msra.mxu1 %v1462_v34  ;;  %11317 = vmatmul.mubr.f32.vlgmr.msra.gmra.mrb[2].mxu0 %v2367_v38 }
 0x35b   : > { %11320 = vmatpush3.xpose.msra.mxu0 %v13068_v27  ;;  %11266 = vmatprep.mubr.msk.f32.mxu1 %vm12709_vm2, %v12708_v12 }
 0x35c   : > { %11269 = vmatprep.subr.mxu1 %v12708_v12  ;;  %11321 = vmatprep.mubr.msk.f32.mxu0 %vm12709_vm2, %v12708_v12 }
 0x35d   : > { %11324 = vmatprep.subr.mxu0 %v12708_v12 }
 0x361   : > { %11267 = vmatmul.mubr.f32.vlgmr.msra.gmra.mrb[0].mxu1 %v13063_v19 }
 0x362   : > { %11270 = vmatpush3.xpose.msra.mxu1 %v1384_v28  ;;  %11322 = vmatmul.mubr.f32.vlgmr.msra.gmra.mrb[2].mxu0 %v2368_v40  ;;  %v5990_v28 = vsel %vm1378_vm3, %v5987_v26, 0  ;;  %v6904_v40 = vpop.permute.xlu1 %6903 }
 0x363   : > { %11325 = vmatpush3.xpose.msra.mxu0 %v2379_v36  ;;  %11271 = vmatprep.mubr.msk.f32.mxu1 %vm12709_vm2, %v12708_v12  ;;  %v5993_v30 = vand.u32 4294901760, %v5990_v28  ;;  %v6907_v42 = vsel %vm1378_vm3, %v6904_v40, 0 }
 0x364   : > { %11326 = vmatprep.mubr.msk.f32.mxu0 %vm12709_vm2, %v12708_v12  ;;  %11329 = vmatprep.subr.mxu0 %v12708_v12  ;;  %v6910_v44 = vand.u32 4294901760, %v6907_v42 }
 0x365   : > { %11274 = vmatprep.subr.mxu1 %v12708_v12  ;;  %v6070_v32 = vsub.f32 %v5990_v28, %v5993_v30 }
 0x366   : > { %v6987_v46 = vsub.f32 %v6907_v42, %v6910_v44  ;;  %v7821_v55 = vpop.permute.xlu1 %7820 }
 0x367   : > { %v6071_v34 = vand.u32 4294901760, %v6070_v32  ;;  %v7824_v60 = vsel %vm1378_vm3, %v7821_v55, 0 }
 0x368   : > { %v6988_v48 = vand.u32 4294901760, %v6987_v46 }
 0x369   : > { %11272 = vmatmul.mubr.f32.vlgmr.msra.gmra.mrb[0].mxu1 %v13063_v19  ;;  %v5143_v19 = vand.u32 4294901760, %v5142_v15  ;;  %v6072_v36 = vsub.f32 %v6070_v32, %v6071_v34 }
 0x36a   : > { %11327 = vmatmul.mubr.f32.vlgmr.msra.gmra.mrb[2].mxu0 %v13075_v35  ;;  %11276 = vmatprep.mubr.msk.f32.mxu1 %vm12709_vm2, %v12708_v12 }
 0x36b   : > { %11330 = vmatpush3.xpose.msra.mxu0 %v13068_v27  ;;  %11331 = vmatprep.mubr.msk.f32.mxu0 %vm12709_vm2, %v12708_v12  ;;  %v5144_v21 = vsub.f32 %v5142_v15, %v5143_v19  ;;  %v5988_v27 = vsel %vm1378_vm3, %v5985_v25, 0  ;;  %v6073_v38 = vand.u32 4294901760, %v6072_v36 }
 0x36c   : > { %11364 = vmatprep.subr.mxu0 %v12708_v12  ;;  %v6058_v29 = vand.u32 4294901760, %v5988_v27 }
 0x36d   : > { %v5145_v23 = vand.u32 4294901760, %v5144_v21 }
 0x36e   : > { %v6059_v31 = vsub.f32 %v5988_v27, %v6058_v29 }
 0x370   : > { %v6060_v33 = vand.u32 4294901760, %v6059_v31 }
 0x372   : > { %11332 = vmatmul.mubr.f32.vlgmr.msra.gmra.mrb[2].mxu0 %v13075_v35  ;;  %v6061_v35 = vsub.f32 %v6059_v31, %v6060_v33 }
 0x373   : > { %11365 = vmatpush3.xpose.msra.mxu0 %v3218_v50  ;;  %11366 = vmatprep.mubr.msk.f32.mxu0 %vm12709_vm2, %v12708_v12 }
 0x374   : > { %11369 = vmatprep.subr.mxu0 %v12708_v12  ;;  %v6062_v37 = vand.u32 4294901760, %v6061_v35 }
 0x376   : > { %11367 = vmatmul.mubr.f32.vlgmr.msra.gmra.mrb[4].mxu0 %v3287_v57 }
 0x377   : > { %11370 = vmatpush3.xpose.msra.mxu0 %v3298_v58  ;;  %11371 = vmatprep.mubr.msk.f32.mxu0 %vm12709_vm2, %v12708_v12 }
 0x378   : > { %11374 = vmatprep.subr.mxu0 %v12708_v12 }
 0x37e   : > { %11372 = vmatmul.mubr.f32.vlgmr.msra.gmra.mrb[4].mxu0 %v3283_v49 }
 0x37f   : > { %11375 = vmatpush3.xpose.msra.mxu0 %v3295_v52  ;;  %11376 = vmatprep.mubr.msk.f32.mxu0 %vm12709_vm2, %v12708_v12 }
 0x380   : > { %11379 = vmatprep.subr.mxu0 %v12708_v12 }
 0x386   : > { %11377 = vmatmul.mubr.f32.vlgmr.msra.gmra.mrb[4].mxu0 %v3284_v51 }
 0x387   : > { %11380 = vmatpush3.xpose.msra.mxu0 %v3218_v50  ;;  %11381 = vmatprep.mubr.msk.f32.mxu0 %vm12709_vm2, %v12708_v12 }
 0x388   : > { %11384 = vmatprep.subr.mxu0 %v12708_v12 }
 0x38e   : > { %11382 = vmatmul.mubr.f32.vlgmr.msra.gmra.mrb[4].mxu0 %v3285_v53  ;;  %v7819_v53 = vpop.permute.xlu0 %7818 }
 0x38f   : > { %11385 = vmatpush3.xpose.msra.mxu0 %v3296_v54  ;;  %11386 = vmatprep.mubr.msk.f32.mxu0 %vm12709_vm2, %v12708_v12  ;;  %v13216_v54 = vld [vmem:[%s13814_s16] ss:$0 sm:$0xff]  ;;  %v7822_v57 = vsel %vm1378_vm3, %v7819_v53, 0 }
 0x390   : > { %11389 = vmatprep.subr.mxu0 %v12708_v12  ;;  %v7892_v62 = vand.u32 4294901760, %v7822_v57 }
 0x396   : > { %11387 = vmatmul.mubr.f32.vlgmr.msra.gmra.mrb[4].mxu0 %v3283_v49 }
 0x397   : > { %11390 = vmatpush3.xpose.msra.mxu0 %v3218_v50  ;;  %11391 = vmatprep.mubr.msk.f32.mxu0 %vm12709_vm2, %v12708_v12  ;;  %v6989_v50 = vsub.f32 %v6987_v46, %v6988_v48 }
 0x398   : > { %11424 = vmatprep.subr.mxu0 %v12708_v12 }
 0x399   : > { %v6990_v52 = vand.u32 4294901760, %v6989_v50 }
 0x39e   : > { %11392 = vmatmul.mubr.f32.vlgmr.msra.gmra.mrb[4].mxu0 %v3283_v49  ;;  %v6978_v49 = vsub.f32 %v6976_v45, %v6977_v47 }
 0x39f   : > { %11425 = vmatpush3.xpose.msra.mxu0 %v4135_v0  ;;  %11426 = vmatprep.mubr.msk.f32.mxu0 %vm12709_vm2, %v12708_v12 }
 0x3a0   : > { %11429 = vmatprep.subr.mxu0 %v12708_v12  ;;  %v6979_v51 = vand.u32 4294901760, %v6978_v49 }
 0x3a2   : > { %11427 = vmatmul.mubr.f32.vlgmr.msra.gmra.mrb[6].mxu0 %v4204_v7 }
 0x3a3   : > { %11430 = vmatpush3.xpose.msra.mxu0 %v4215_v8  ;;  %11431 = vmatprep.mubr.msk.f32.mxu0 %vm12709_vm2, %v12708_v12 }
 0x3a4   : > { %11434 = vmatprep.subr.mxu0 %v12708_v12 }
 0x3aa   : > { %11432 = vmatmul.mubr.f32.vlgmr.msra.gmra.mrb[6].mxu0 %v4200_v63 }
 0x3ab   : > { %11435 = vmatpush3.xpose.msra.mxu0 %v4212_v2  ;;  %11436 = vmatprep.mubr.msk.f32.mxu0 %vm12709_vm2, %v12708_v12 }
 0x3ac   : > { %11439 = vmatprep.subr.mxu0 %v12708_v12 }
 0x3b2   : > { %11437 = vmatmul.mubr.f32.vlgmr.msra.gmra.mrb[6].mxu0 %v4201_v1 }
 0x3b3   : > { %11440 = vmatpush3.xpose.msra.mxu0 %v4135_v0  ;;  %11441 = vmatprep.mubr.msk.f32.mxu0 %vm12709_vm2, %v12708_v12 }
 0x3b4   : > { %11444 = vmatprep.subr.mxu0 %v12708_v12 }
 0x3ba   : > { %11442 = vmatmul.mubr.f32.vlgmr.msra.gmra.mrb[6].mxu0 %v4202_v3 }
 0x3bb   : > { %11445 = vmatpush3.xpose.msra.mxu0 %v4213_v4  ;;  %11446 = vmatprep.mubr.msk.f32.mxu0 %vm12709_vm2, %v12708_v12 }
 0x3bc   : > { %11449 = vmatprep.subr.mxu0 %v12708_v12 }
 0x3c2   : > { %11447 = vmatmul.mubr.f32.vlgmr.msra.gmra.mrb[6].mxu0 %v4200_v63 }
 0x3c3   : > { %11450 = vmatpush3.xpose.msra.mxu0 %v4135_v0  ;;  %11451 = vmatprep.mubr.msk.f32.mxu0 %vm12709_vm2, %v12708_v12  ;;  %v7893_v0 = vsub.f32 %v7822_v57, %v7892_v62 }
 0x3c4   : > { %11484 = vmatprep.subr.mxu0 %v12708_v12 }
 0x3c5   : > { %v7894_v5 = vand.u32 4294901760, %v7893_v0 }
 0x3c7   : > { %v7895_v8 = vsub.f32 %v7893_v0, %v7894_v5 }
 0x3c9   : > { %v7896_v10 = vand.u32 4294901760, %v7895_v8 }
 0x3ca   : > { %11452 = vmatmul.mubr.f32.vlgmr.msra.gmra.mrb[6].mxu0 %v4200_v63  ;;  %v7827_v63 = vand.u32 4294901760, %v7824_v60 }
 0x3cb   : > { %11485 = vmatpush3.xpose.msra.mxu0 %v5076_v14  ;;  %11486 = vmatprep.mubr.msk.f32.mxu0 %vm12709_vm2, %v12708_v12 }
 0x3cc   : > { %11489 = vmatprep.subr.mxu0 %v12708_v12  ;;  %v7904_v1 = vsub.f32 %v7824_v60, %v7827_v63 }
 0x3ce   : > { %11487 = vmatmul.mubr.f32.vlgmr.msra.gmra.mrb[8].mxu0 %v5145_v23  ;;  %v7905_v7 = vand.u32 4294901760, %v7904_v1 }
 0x3cf   : > { %11490 = vmatpush3.xpose.msra.mxu0 %v5156_v24  ;;  %11491 = vmatprep.mubr.msk.f32.mxu0 %vm12709_vm2, %v12708_v12 }
 0x3d0   : > { %11494 = vmatprep.subr.mxu0 %v12708_v12  ;;  %v7906_v9 = vsub.f32 %v7904_v1, %v7905_v7 }
 0x3d2   : > { %v7907_v11 = vand.u32 4294901760, %v7906_v9 }
 0x3d6   : > { %11492 = vmatmul.mubr.f32.vlgmr.msra.gmra.mrb[8].mxu0 %v5141_v13 }
 0x3d7   : > { %11495 = vmatpush3.xpose.msra.mxu0 %v5153_v18  ;;  %11496 = vmatprep.mubr.msk.f32.mxu0 %vm12709_vm2, %v12708_v12 }
 0x3d8   : > { %11499 = vmatprep.subr.mxu0 %v12708_v12 }
 0x3de   : > { %11497 = vmatmul.mubr.f32.vlgmr.msra.gmra.mrb[8].mxu0 %v5142_v15 }
 0x3df   : > { %11500 = vmatpush3.xpose.msra.mxu0 %v5076_v14  ;;  %11501 = vmatprep.mubr.msk.f32.mxu0 %vm12709_vm2, %v12708_v12 }
 0x3e0   : > { %11504 = vmatprep.subr.mxu0 %v12708_v12 }
 0x3e6   : > { %11502 = vmatmul.mubr.f32.vlgmr.msra.gmra.mrb[8].mxu0 %v5143_v19 }
 0x3e7   : > { %11505 = vmatpush3.xpose.msra.mxu0 %v5154_v20  ;;  %11506 = vmatprep.mubr.msk.f32.mxu0 %vm12709_vm2, %v12708_v12 }
 0x3e8   : > { %11509 = vmatprep.subr.mxu0 %v12708_v12 }
 0x3ee   : > { %11507 = vmatmul.mubr.f32.vlgmr.msra.gmra.mrb[8].mxu0 %v5141_v13 }
 0x3ef   : > { %11510 = vmatpush3.xpose.msra.mxu0 %v5076_v14  ;;  %11511 = vmatprep.mubr.msk.f32.mxu0 %vm12709_vm2, %v12708_v12 }
 0x3f0   : > { %11544 = vmatprep.subr.mxu0 %v12708_v12 }
 0x3f6   : > { %11512 = vmatmul.mubr.f32.vlgmr.msra.gmra.mrb[8].mxu0 %v5141_v13 }
 0x3f7   : > { %11545 = vmatpush3.xpose.msra.mxu0 %v5993_v30  ;;  %11546 = vmatprep.mubr.msk.f32.mxu0 %vm12709_vm2, %v12708_v12 }
 0x3f8   : > { %11549 = vmatprep.subr.mxu0 %v12708_v12 }
 0x3fa   : > { %11547 = vmatmul.mubr.f32.vlgmr.msra.gmra.mrb[10].mxu0 %v6062_v37 }
 0x3fb   : > { %11550 = vmatpush3.xpose.msra.mxu0 %v6073_v38  ;;  %11551 = vmatprep.mubr.msk.f32.mxu0 %vm12709_vm2, %v12708_v12 }
 0x3fc   : > { %11554 = vmatprep.subr.mxu0 %v12708_v12 }
 0x402   : > { %11552 = vmatmul.mubr.f32.vlgmr.msra.gmra.mrb[10].mxu0 %v6058_v29 }
 0x403   : > { %11555 = vmatpush3.xpose.msra.mxu0 %v6070_v32  ;;  %11556 = vmatprep.mubr.msk.f32.mxu0 %vm12709_vm2, %v12708_v12 }
 0x404   : > { %11559 = vmatprep.subr.mxu0 %v12708_v12 }
 0x40a   : > { %11557 = vmatmul.mubr.f32.vlgmr.msra.gmra.mrb[10].mxu0 %v6059_v31 }
 0x40b   : > { %11560 = vmatpush3.xpose.msra.mxu0 %v5993_v30  ;;  %11561 = vmatprep.mubr.msk.f32.mxu0 %vm12709_vm2, %v12708_v12 }
 0x40c   : > { %11564 = vmatprep.subr.mxu0 %v12708_v12 }
 0x412   : > { %11562 = vmatmul.mubr.f32.vlgmr.msra.gmra.mrb[10].mxu0 %v6060_v33 }
 0x413   : > { %11565 = vmatpush3.xpose.msra.mxu0 %v6071_v34  ;;  %11566 = vmatprep.mubr.msk.f32.mxu0 %vm12709_vm2, %v12708_v12 }
 0x414   : > { %11569 = vmatprep.subr.mxu0 %v12708_v12 }
 0x41a   : > { %11567 = vmatmul.mubr.f32.vlgmr.msra.gmra.mrb[10].mxu0 %v6058_v29 }
 0x41b   : > { %11570 = vmatpush3.xpose.msra.mxu0 %v5993_v30  ;;  %11571 = vmatprep.mubr.msk.f32.mxu0 %vm12709_vm2, %v12708_v12 }
 0x41c   : > { %11604 = vmatprep.subr.mxu0 %v12708_v12 }
 0x422   : > { %11572 = vmatmul.mubr.f32.vlgmr.msra.gmra.mrb[10].mxu0 %v6058_v29 }
 0x423   : > { %11605 = vmatpush3.xpose.msra.mxu0 %v6910_v44  ;;  %11606 = vmatprep.mubr.msk.f32.mxu0 %vm12709_vm2, %v12708_v12 }
 0x424   : > { %11609 = vmatprep.subr.mxu0 %v12708_v12 }
 0x426   : > { %11607 = vmatmul.mubr.f32.vlgmr.msra.gmra.mrb[12].mxu0 %v6979_v51 }
 0x427   : > { %11610 = vmatpush3.xpose.msra.mxu0 %v6990_v52  ;;  %11611 = vmatprep.mubr.msk.f32.mxu0 %vm12709_vm2, %v12708_v12 }
 0x428   : > { %11614 = vmatprep.subr.mxu0 %v12708_v12 }
 0x42e   : > { %11612 = vmatmul.mubr.f32.vlgmr.msra.gmra.mrb[12].mxu0 %v6975_v43 }
 0x42f   : > { %11615 = vmatpush3.xpose.msra.mxu0 %v6987_v46  ;;  %11616 = vmatprep.mubr.msk.f32.mxu0 %vm12709_vm2, %v12708_v12 }
 0x430   : > { %11619 = vmatprep.subr.mxu0 %v12708_v12 }
 0x436   : > { %11617 = vmatmul.mubr.f32.vlgmr.msra.gmra.mrb[12].mxu0 %v6976_v45 }
 0x437   : > { %11620 = vmatpush3.xpose.msra.mxu0 %v6910_v44  ;;  %11621 = vmatprep.mubr.msk.f32.mxu0 %vm12709_vm2, %v12708_v12 }
 0x438   : > { %11624 = vmatprep.subr.mxu0 %v12708_v12 }
 0x43c   : > { %v1825_v56 = vpop.f32.mrb[0].mxu1 }
 0x43d   : > { %v12212_v58 = vadd.f32 %v13216_v54, %v1825_v56  ;;  %v11273_v59 = vpop.f32.mrb[1].mxu1 }
 0x43e   : > { %11622 = vmatmul.mubr.f32.vlgmr.msra.gmra.mrb[12].mxu0 %v6977_v47 }
 0x43f   : > { %11625 = vmatpush3.xpose.msra.mxu0 %v6988_v48  ;;  %v1829_v61 = vsel %vm1378_vm3, %v12212_v58, -inf  ;;  %11626 = vmatprep.mubr.msk.f32.mxu0 %vm12709_vm2, %v12708_v12 }
 0x440   : > { %1830 = vmax.xlane.f32.xlu0 %v1829_v61  ;;  %11629 = vmatprep.subr.mxu0 %v12708_v12 }
 0x445   : > { %v2742_v2 = vpop.f32.mrb[2].mxu0 }
 0x446   : > { %v12213_v3 = vadd.f32 %v13216_v54, %v2742_v2  ;;  %v11333_v4 = vpop.f32.mrb[3].mxu0  ;;  %11627 = vmatmul.mubr.f32.vlgmr.msra.gmra.mrb[12].mxu0 %v6975_v43 }
 0x447   : > { %11630 = vmatpush3.xpose.msra.mxu0 %v6910_v44  ;;  %11631 = vmatprep.mubr.msk.f32.mxu0 %vm12709_vm2, %v12708_v12 }
 0x448   : > { %v2746_v6 = vsel %vm1378_vm3, %v12213_v3, -inf  ;;  %11664 = vmatprep.subr.mxu0 %v12708_v12 }
 0x449   : > { %2747 = vmax.xlane.f32.xlu1 %v2746_v6 }
 0x44e   : > { %11632 = vmatmul.mubr.f32.vlgmr.msra.gmra.mrb[12].mxu0 %v6975_v43 }
 0x44f   : > { %11665 = vmatpush3.xpose.msra.mxu0 %v7827_v63  ;;  %11666 = vmatprep.mubr.msk.f32.mxu0 %vm12709_vm2, %v12708_v12 }
 0x450   : > { %11669 = vmatprep.subr.mxu0 %v12708_v12 }
 0x452   : > { %11667 = vmatmul.mubr.f32.vlgmr.msra.gmra.mrb[14].mxu0 %v7896_v10 }
 0x453   : > { %11670 = vmatpush3.xpose.msra.mxu0 %v7907_v11  ;;  %11671 = vmatprep.mubr.msk.f32.mxu0 %vm12709_vm2, %v12708_v12 }
 0x454   : > { %11674 = vmatprep.subr.mxu0 %v12708_v12 }
 0x45a   : > { %1840 = vrot.lane.b32.xlu1 %v13043_v16, %s12717_s0  ;;  %11672 = vmatmul.mubr.f32.vlgmr.msra.gmra.mrb[14].mxu0 %v7892_v62 }
 0x45b   : > { %11675 = vmatpush3.xpose.msra.mxu0 %v7904_v1  ;;  %11676 = vmatprep.mubr.msk.f32.mxu0 %vm12709_vm2, %v12708_v12 }
 0x45c   : > { %11679 = vmatprep.subr.mxu0 %v12708_v12 }
 0x462   : > { %11677 = vmatmul.mubr.f32.vlgmr.msra.gmra.mrb[14].mxu0 %v7893_v0 }
 0x463   : > { %11680 = vmatpush3.xpose.msra.mxu0 %v7827_v63  ;;  %11681 = vmatprep.mubr.msk.f32.mxu0 %vm12709_vm2, %v12708_v12 }
 0x464   : > { %11684 = vmatprep.subr.mxu0 %v12708_v12 }
 0x46a   : > { %11682 = vmatmul.mubr.f32.vlgmr.msra.gmra.mrb[14].mxu0 %v7894_v5 }
 0x46b   : > { %11685 = vmatpush3.xpose.msra.mxu0 %v7905_v7  ;;  %11686 = vmatprep.mubr.msk.f32.mxu0 %vm12709_vm2, %v12708_v12 }
 0x46c   : > { %11689 = vmatprep.subr.mxu0 %v12708_v12 }
 0x471   : > { %v3659_v13 = vpop.f32.mrb[4].mxu0 }
 0x472   : > { %v11393_v14 = vpop.f32.mrb[5].mxu0  ;;  %11687 = vmatmul.mubr.f32.vlgmr.msra.gmra.mrb[14].mxu0 %v7892_v62  ;;  %v12214_v30 = vadd.f32 %v13216_v54, %v3659_v13 }
 0x473   : > { %11690 = vmatpush3.xpose.msra.mxu0 %v7827_v63  ;;  %11691 = vmatprep.mubr.msk.f32.mxu0 %vm12709_vm2, %v12708_v12 }
 0x474   : > { %v3663_v33 = vsel %vm1378_vm3, %v12214_v30, -inf }
 0x47a   : > { %11692 = vmatmul.mubr.f32.vlgmr.msra.gmra.mrb[14].mxu0 %v7892_v62 }
 0x49d   : > { %v4576_v15 = vpop.f32.mrb[6].mxu0 }
 0x49e   : > { %v11453_v18 = vpop.f32.mrb[7].mxu0  ;;  %v12215_v32 = vadd.f32 %v13216_v54, %v4576_v15 }
 0x4a0   : > { %v4580_v34 = vsel %vm1378_vm3, %v12215_v32, -inf }
 0x4c9   : > { %v5517_v19 = vpop.f32.mrb[8].mxu0 }
 0x4ca   : > { %v11513_v20 = vpop.f32.mrb[9].mxu0  ;;  %v13270_v40 = vadd.f32 %v13267_v39, %v5517_v19 }
 0x4cc   : > { %v5521_v41 = vsel %vm1378_vm3, %v13270_v40, -inf }
 0x4cd   : > { %v1831_v21 = vpop.xlane.xlu0 %1830 }
 0x4ce   : > { %v1832_v22 = vsub.f32 %v12212_v58, %v1831_v21 }
 0x4d0   : > { %v1833_v23 = vmul.f32 1.442695, %v1832_v22 }
 0x4d2   : > { %12511 = vpow2.f32 %v1833_v23 }
 0x4d6   : > { %v2748_v24 = vpop.xlane.xlu1 %2747 }
 0x4d7   : > { %v2749_v25 = vsub.f32 %v12213_v3, %v2748_v24 }
 0x4d9   : > { %v2750_v26 = vmul.f32 1.442695, %v2749_v25 }
 0x4da   : > { %v1841_v27 = vpop.permute.xlu1 %1840 }
 0x4db   : > { %v13249_v28 = vand.u32 4294901760, %v1841_v27  ;;  %12513 = vpow2.f32 %v2750_v26 }
 0x4dc   : > { %v12512_v29 = vpop.eup %12511 }
 0x4dd   : > { %11275 = vmatpush3.msra.mxu1 %v13249_v28  ;;  %v1835_v31 = vsel %vm1378_vm3, %v12512_v29, 0.0  ;;  %v1924_v54 = vsub.f32 %v1841_v27, %v13249_v28 }
 0x4de   : > { %1836 = vadd.xlane.f32.xlu0 %v1835_v31  ;;  %11279 = vmatprep.subr.mxu1 %v12708_v12 }
 0x4df   : > { %v1925_v58 = vand.u32 4294901760, %v1924_v54 }
 0x4e1   : > { %v1926_v62 = vsub.f32 %v1924_v54, %v1925_v58 }
 0x4e2   : > { %3664 = vmax.xlane.f32.xlu0 %v3663_v33 }
 0x4e3   : > { %v1927_v3 = vand.u32 4294901760, %v1926_v62 }
 0x4e5   : > { %v13258_v35 = vpop.eup %12513 }
 0x4e6   : > { %4581 = vmax.xlane.f32.xlu0 %v4580_v34  ;;  %v2752_v36 = vsel %vm1378_vm3, %v13258_v35, 0.0 }
 0x4ea   : > { %2753 = vadd.xlane.f32.xlu0 %v2752_v36 }
 0x4f5   : > { %v6434_v37 = vpop.f32.mrb[10].mxu0 }
 0x4f6   : > { %v11573_v38 = vpop.f32.mrb[11].mxu0  ;;  %v13287_v4 = vadd.f32 %v13267_v39, %v6434_v37 }
 0x4f8   : > { %v6438_v7 = vsel %vm1378_vm3, %v13287_v4, -inf }
 0x500   : > { %2757 = vrot.lane.b32.xlu0 %v13043_v16, %s12718_s4 }
 0x51f   : > { %5522 = vmax.xlane.f32.xlu0 %v5521_v41 }
 0x521   : > { %v13274_v42 = vpop.f32.mrb[12].mxu0 }
 0x522   : > { %v11633_v43 = vpop.f32.mrb[13].mxu0  ;;  %v13325_v27 = vadd.f32 %v13267_v39, %v13274_v42 }
 0x54d   : > { %v13276_v44 = vpop.f32.mrb[14].mxu0 }
 0x54e   : > { %v11693_v45 = vpop.f32.mrb[15].mxu0 }
 0x56b   : > { %v1837_v46 = vpop.xlane.xlu0 %1836 }
 0x56c   : > { %12515 = vrcp.f32 %v1837_v46 }
 0x56f   : > { %v3665_v47 = vpop.xlane.xlu0 %3664 }
 0x570   : > { %v3666_v48 = vsub.f32 %v12214_v30, %v3665_v47 }
 0x572   : > { %v3667_v49 = vmul.f32 1.442695, %v3666_v48 }
 0x573   : > { %v4582_v50 = vpop.xlane.xlu0 %4581 }
 0x574   : > { %12517 = vpow2.f32 %v3667_v49  ;;  %v4583_v51 = vsub.f32 %v12215_v32, %v4582_v50 }
 0x576   : > { %v12516_v52 = vpop.eup %12515  ;;  %v4584_v53 = vmul.f32 1.442695, %v4583_v51 }
 0x577   : > { %v1839_v55 = vmul.f32 %v12516_v52, %v12512_v29  ;;  %v2754_v6 = vpop.xlane.xlu0 %2753  ;;  %v7355_v29 = vsel %vm1378_vm3, %v13325_v27, -inf }
 0x578   : > { %12519 = vpow2.f32 %v4584_v53 }
 0x579   : > { %v1844_v56 = vsel %vm1378_vm3, %v1839_v55, 0  ;;  %12521 = vrcp.f32 %v2754_v6 }
 0x57a   : > { %v1912_v57 = vand.u32 4294901760, %v1844_v56 }
 0x57b   : > { %v2758_v11 = vpop.permute.xlu0 %2757 }
 0x57c   : > { %v1913_v59 = vsub.f32 %v1844_v56, %v1912_v57  ;;  %v2764_v14 = vand.u32 4294901760, %v2758_v11 }
 0x57e   : > { %v13280_v60 = vpop.eup %12517  ;;  %v1914_v61 = vand.u32 4294901760, %v1913_v59  ;;  %v2841_v15 = vsub.f32 %v2758_v11, %v2764_v14 }
 0x57f   : > { %v3669_v63 = vsel %vm1378_vm3, %v13280_v60, 0.0 }
 0x580   : > { %3670 = vadd.xlane.f32.xlu1 %v3669_v63  ;;  %v1915_v0 = vsub.f32 %v1913_v59, %v1914_v61  ;;  %v2842_v19 = vand.u32 4294901760, %v2841_v15 }
 0x582   : > { %v13284_v1 = vpop.eup %12519  ;;  %v1916_v2 = vand.u32 4294901760, %v1915_v0  ;;  %v2843_v21 = vsub.f32 %v2841_v15, %v2842_v19 }
 0x583   : > { %v4586_v5 = vsel %vm1378_vm3, %v13284_v1, 0.0  ;;  %v12522_v8 = vpop.eup %12521 }
 0x584   : > { %11277 = vmatmul.mubr.f32.vlgmr.msra.gmra.mrb[2].mxu1 %v1916_v2  ;;  %4587 = vadd.xlane.f32.xlu0 %v4586_v5  ;;  %v2756_v9 = vmul.f32 %v12522_v8, %v13258_v35  ;;  %v2844_v25 = vand.u32 4294901760, %v2843_v21 }
 0x585   : > { %11280 = vmatpush3.msra.mxu1 %v1927_v3  ;;  %11281 = vmatprep.mubr.msk.f32.mxu1 %vm12709_vm2, %v12708_v12 }
 0x586   : > { %11284 = vmatprep.subr.mxu1 %v12708_v12  ;;  %v2761_v10 = vsel %vm1378_vm3, %v2756_v9, 0 }
 0x587   : > { %v2829_v13 = vand.u32 4294901760, %v2761_v10 }
 0x588   : > { %6439 = vmax.xlane.f32.xlu0 %v6438_v7 }
 0x58c   : > { %11282 = vmatmul.mubr.f32.vlgmr.msra.gmra.mrb[2].mxu1 %v1912_v57 }
 0x58d   : > { %11285 = vmatpush3.msra.mxu1 %v1924_v54  ;;  %11286 = vmatprep.mubr.msk.f32.mxu1 %vm12709_vm2, %v12708_v12 }
 0x58e   : > { %11289 = vmatprep.subr.mxu1 %v12708_v12 }
 0x591   : > { %3674 = vrot.lane.b32.xlu1 %v13043_v16, %s12719_s1 }
 0x594   : > { %11287 = vmatmul.mubr.f32.vlgmr.msra.gmra.mrb[2].mxu1 %v1913_v59 }
 0x595   : > { %11290 = vmatpush3.msra.mxu1 %v13249_v28  ;;  %4591 = vrot.lane.b32.xlu1 %v13043_v16, %s12720_s29  ;;  %v2830_v16 = vsub.f32 %v2761_v10, %v2829_v13 }
 0x596   : > { %11291 = vmatprep.mubr.msk.f32.mxu1 %vm12709_vm2, %v12708_v12  ;;  %11294 = vmatprep.subr.mxu1 %v12708_v12 }
 0x597   : > { %v2831_v18 = vand.u32 4294901760, %v2830_v16 }
 0x599   : > { %v2832_v20 = vsub.f32 %v2830_v16, %v2831_v18 }
 0x59b   : > { %v2833_v24 = vand.u32 4294901760, %v2832_v20 }
 0x59c   : > { %11292 = vmatmul.mubr.f32.vlgmr.msra.gmra.mrb[2].mxu1 %v1914_v61 }
 0x59d   : > { %11295 = vmatpush3.msra.mxu1 %v1925_v58  ;;  %11296 = vmatprep.mubr.msk.f32.mxu1 %vm12709_vm2, %v12708_v12 }
 0x59e   : > { %11299 = vmatprep.subr.mxu1 %v12708_v12 }
 0x5a4   : > { %11297 = vmatmul.mubr.f32.vlgmr.msra.gmra.mrb[2].mxu1 %v1912_v57 }
 0x5a5   : > { %11300 = vmatpush3.msra.mxu1 %v13249_v28  ;;  %11301 = vmatprep.mubr.msk.f32.mxu1 %vm12709_vm2, %v12708_v12  ;;  %v13329_v28 = vadd.f32 %v13267_v39, %v13276_v44 }
 0x5a6   : > { %11334 = vmatprep.subr.mxu1 %v12708_v12 }
 0x5a7   : > { %v8272_v31 = vsel %vm1378_vm3, %v13329_v28, -inf }
 0x5ac   : > { %11302 = vmatmul.mubr.f32.vlgmr.msra.gmra.mrb[2].mxu1 %v1912_v57  ;;  %v5523_v22 = vpop.xlane.xlu0 %5522 }
 0x5ad   : > { %11335 = vmatpush3.msra.mxu1 %v2764_v14  ;;  %v5524_v23 = vsub.f32 %v13270_v40, %v5523_v22  ;;  %11336 = vmatprep.mubr.msk.f32.mxu1 %vm12709_vm2, %v12708_v12 }
 0x5ae   : > { %11339 = vmatprep.subr.mxu1 %v12708_v12 }
 0x5af   : > { %v5525_v26 = vmul.f32 1.442695, %v5524_v23 }
 0x5b0   : > { %11337 = vmatmul.mubr.f32.vlgmr.msra.gmra.mrb[4].mxu1 %v2833_v24 }
 0x5b1   : > { %12523 = vpow2.f32 %v5525_v26  ;;  %11340 = vmatpush3.msra.mxu1 %v2844_v25  ;;  %11341 = vmatprep.mubr.msk.f32.mxu1 %vm12709_vm2, %v12708_v12 }
 0x5b2   : > { %11344 = vmatprep.subr.mxu1 %v12708_v12 }
 0x5b8   : > { %11342 = vmatmul.mubr.f32.vlgmr.msra.gmra.mrb[4].mxu1 %v2829_v13 }
 0x5b9   : > { %11345 = vmatpush3.msra.mxu1 %v2841_v15  ;;  %7356 = vmax.xlane.f32.xlu1 %v7355_v29 }
 0x5ba   : > { %11346 = vmatprep.mubr.msk.f32.mxu1 %vm12709_vm2, %v12708_v12  ;;  %11349 = vmatprep.subr.mxu1 %v12708_v12 }
 0x5bb   : > { %v13336_v30 = vpop.eup %12523 }
 0x5bc   : > { %v5527_v32 = vsel %vm1378_vm3, %v13336_v30, 0.0 }
 0x5bd   : > { %8273 = vmax.xlane.f32.xlu1 %v8272_v31  ;;  %5528 = vadd.xlane.f32.xlu0 %v5527_v32 }
 0x5c0   : > { %11347 = vmatmul.mubr.f32.vlgmr.msra.gmra.mrb[4].mxu1 %v2830_v16 }
 0x5c1   : > { %11350 = vmatpush3.msra.mxu1 %v2764_v14  ;;  %11351 = vmatprep.mubr.msk.f32.mxu1 %vm12709_vm2, %v12708_v12 }
 0x5c2   : > { %11354 = vmatprep.subr.mxu1 %v12708_v12 }
 0x5c8   : > { %11352 = vmatmul.mubr.f32.vlgmr.msra.gmra.mrb[4].mxu1 %v2831_v18 }
 0x5c9   : > { %11355 = vmatpush3.msra.mxu1 %v2842_v19  ;;  %11356 = vmatprep.mubr.msk.f32.mxu1 %vm12709_vm2, %v12708_v12 }
 0x5ca   : > { %11359 = vmatprep.subr.mxu1 %v12708_v12 }
 0x5ce   : > { %6449 = vrot.lane.b32.xlu1 %v13051_v17, %s12718_s4 }
 0x5d0   : > { %11357 = vmatmul.mubr.f32.vlgmr.msra.gmra.mrb[4].mxu1 %v2829_v13 }
 0x5d1   : > { %11360 = vmatpush3.msra.mxu1 %v2764_v14  ;;  %11361 = vmatprep.mubr.msk.f32.mxu1 %vm12709_vm2, %v12708_v12 }
 0x5d2   : > { %7366 = vrot.lane.b32.xlu1 %v13051_v17, %s12719_s1  ;;  %11394 = vmatprep.subr.mxu1 %v12708_v12 }
 0x5d3   : > { %5532 = vrot.lane.b32.xlu0 %v13051_v17, %s12717_s0 }
 0x5d6   : > { %8283 = vrot.lane.b32.xlu1 %v13051_v17, %s12720_s29 }
 0x5d8   : > { %11362 = vmatmul.mubr.f32.vlgmr.msra.gmra.mrb[4].mxu1 %v2829_v13 }
 0x5d9   : > { %11396 = vmatprep.mubr.msk.f32.mxu1 %vm12709_vm2, %v12708_v12 }
 0x60d   : > { %v3671_v33 = vpop.xlane.xlu1 %3670 }
 0x60e   : > { %12525 = vrcp.f32 %v3671_v33 }
 0x611   : > { %v3675_v34 = vpop.permute.xlu1 %3674  ;;  %v4588_v35 = vpop.xlane.xlu0 %4587 }
 0x612   : > { %v3681_v36 = vand.u32 4294901760, %v3675_v34 }
 0x614   : > { %11395 = vmatpush3.msra.mxu1 %v3681_v36  ;;  %v3758_v17 = vsub.f32 %v3675_v34, %v3681_v36 }
 0x615   : > { %v6440_v37 = vpop.xlane.xlu0 %6439  ;;  %11399 = vmatprep.subr.mxu1 %v12708_v12  ;;  %v4592_v56 = vpop.permute.xlu1 %4591 }
 0x616   : > { %v6441_v38 = vsub.f32 %v13287_v4, %v6440_v37  ;;  %v3759_v44 = vand.u32 4294901760, %v3758_v17  ;;  %v4598_v58 = vand.u32 4294901760, %v4592_v56 }
 0x618   : > { %v12526_v39 = vpop.eup %12525  ;;  %v6442_v40 = vmul.f32 1.442695, %v6441_v38  ;;  %v3760_v47 = vsub.f32 %v3758_v17, %v3759_v44 }
 0x619   : > { %v3673_v41 = vmul.f32 %v12526_v39, %v13280_v60  ;;  %v4675_v60 = vsub.f32 %v4592_v56, %v4598_v58 }
 0x61a   : > { %12527 = vpow2.f32 %v6442_v40  ;;  %v3761_v51 = vand.u32 4294901760, %v3760_v47 }
 0x61b   : > { %v3678_v42 = vsel %vm1378_vm3, %v3673_v41, 0  ;;  %12529 = vrcp.f32 %v4588_v35  ;;  %v4676_v0 = vand.u32 4294901760, %v4675_v60 }
 0x61c   : > { %v3746_v43 = vand.u32 4294901760, %v3678_v42 }
 0x61d   : > { %v4677_v5 = vsub.f32 %v4675_v60, %v4676_v0 }
 0x61e   : > { %v3747_v45 = vsub.f32 %v3678_v42, %v3746_v43 }
 0x61f   : > { %v4678_v8 = vand.u32 4294901760, %v4677_v5 }
 0x620   : > { %v3748_v46 = vand.u32 4294901760, %v3747_v45 }
 0x622   : > { %v3749_v48 = vsub.f32 %v3747_v45, %v3748_v46 }
 0x624   : > { %v13365_v49 = vpop.eup %12527  ;;  %v3750_v50 = vand.u32 4294901760, %v3749_v48 }
 0x625   : > { %v6444_v52 = vsel %vm1378_vm3, %v13365_v49, 0.0  ;;  %v12530_v53 = vpop.eup %12529 }
 0x626   : > { %11397 = vmatmul.mubr.f32.vlgmr.msra.gmra.mrb[6].mxu1 %v3750_v50  ;;  %6445 = vadd.xlane.f32.xlu0 %v6444_v52  ;;  %v4590_v54 = vmul.f32 %v12530_v53, %v13284_v1 }
 0x627   : > { %11400 = vmatpush3.msra.mxu1 %v3761_v51  ;;  %11401 = vmatprep.mubr.msk.f32.mxu1 %vm12709_vm2, %v12708_v12 }
 0x628   : > { %11404 = vmatprep.subr.mxu1 %v12708_v12  ;;  %v4595_v55 = vsel %vm1378_vm3, %v4590_v54, 0 }
 0x629   : > { %v13383_v57 = vand.u32 4294901760, %v4595_v55 }
 0x62b   : > { %v4664_v59 = vsub.f32 %v4595_v55, %v13383_v57 }
 0x62d   : > { %v4665_v63 = vand.u32 4294901760, %v4664_v59 }
 0x62e   : > { %11402 = vmatmul.mubr.f32.vlgmr.msra.gmra.mrb[6].mxu1 %v3746_v43 }
 0x62f   : > { %11405 = vmatpush3.msra.mxu1 %v3758_v17  ;;  %11406 = vmatprep.mubr.msk.f32.mxu1 %vm12709_vm2, %v12708_v12  ;;  %v4666_v4 = vsub.f32 %v4664_v59, %v4665_v63 }
 0x630   : > { %11409 = vmatprep.subr.mxu1 %v12708_v12 }
 0x631   : > { %v4667_v7 = vand.u32 4294901760, %v4666_v4 }
 0x636   : > { %11407 = vmatmul.mubr.f32.vlgmr.msra.gmra.mrb[6].mxu1 %v3747_v45 }
 0x637   : > { %11410 = vmatpush3.msra.mxu1 %v3681_v36  ;;  %11411 = vmatprep.mubr.msk.f32.mxu1 %vm12709_vm2, %v12708_v12 }
 0x638   : > { %11414 = vmatprep.subr.mxu1 %v12708_v12 }
 0x63e   : > { %11412 = vmatmul.mubr.f32.vlgmr.msra.gmra.mrb[6].mxu1 %v3748_v46 }
 0x63f   : > { %11415 = vmatpush3.msra.mxu1 %v3759_v44  ;;  %11416 = vmatprep.mubr.msk.f32.mxu1 %vm12709_vm2, %v12708_v12 }
 0x640   : > { %11419 = vmatprep.subr.mxu1 %v12708_v12 }
 0x646   : > { %v7357_v61 = vpop.xlane.xlu1 %7356  ;;  %11417 = vmatmul.mubr.f32.vlgmr.msra.gmra.mrb[6].mxu1 %v3746_v43 }
 0x647   : > { %v7358_v62 = vsub.f32 %v13325_v27, %v7357_v61  ;;  %11420 = vmatpush3.msra.mxu1 %v3681_v36  ;;  %11421 = vmatprep.mubr.msk.f32.mxu1 %vm12709_vm2, %v12708_v12 }
 0x648   : > { %11454 = vmatprep.subr.mxu1 %v12708_v12 }
 0x649   : > { %v7359_v1 = vmul.f32 1.442695, %v7358_v62 }
 0x64a   : > { %v8274_v2 = vpop.xlane.xlu1 %8273  ;;  %v5529_v10 = vpop.xlane.xlu0 %5528 }
 0x64b   : > { %12531 = vpow2.f32 %v7359_v1  ;;  %v8275_v3 = vsub.f32 %v13329_v28, %v8274_v2 }
 0x64d   : > { %v8276_v6 = vmul.f32 1.442695, %v8275_v3 }
 0x64e   : > { %11422 = vmatmul.mubr.f32.vlgmr.msra.gmra.mrb[6].mxu1 %v3746_v43  ;;  %v5533_v19 = vpop.permute.xlu0 %5532  ;;  %v6450_v32 = vpop.permute.xlu1 %6449 }
 0x64f   : > { %12533 = vpow2.f32 %v8276_v6  ;;  %11455 = vmatpush3.msra.mxu1 %v4598_v58  ;;  %11456 = vmatprep.mubr.msk.f32.mxu1 %vm12709_vm2, %v12708_v12  ;;  %v5539_v21 = vand.u32 4294901760, %v5533_v19  ;;  %v6456_v33 = vand.u32 4294901760, %v6450_v32 }
 0x650   : > { %11459 = vmatprep.subr.mxu1 %v12708_v12  ;;  %12535 = vrcp.f32 %v5529_v10 }
 0x651   : > { %v5616_v23 = vsub.f32 %v5533_v19, %v5539_v21  ;;  %v6533_v38 = vsub.f32 %v6450_v32, %v6456_v33 }
 0x652   : > { %11457 = vmatmul.mubr.f32.vlgmr.msra.gmra.mrb[8].mxu1 %v4667_v7 }
 0x653   : > { %11460 = vmatpush3.msra.mxu1 %v4678_v8  ;;  %11461 = vmatprep.mubr.msk.f32.mxu1 %vm12709_vm2, %v12708_v12  ;;  %v5617_v25 = vand.u32 4294901760, %v5616_v23  ;;  %v6534_v17 = vand.u32 4294901760, %v6533_v38 }
 0x654   : > { %11464 = vmatprep.subr.mxu1 %v12708_v12 }
 0x655   : > { %v13397_v9 = vpop.eup %12531  ;;  %v5618_v27 = vsub.f32 %v5616_v23, %v5617_v25  ;;  %v6535_v44 = vsub.f32 %v6533_v38, %v6534_v17 }
 0x656   : > { %v7361_v11 = vsel %vm1378_vm3, %v13397_v9, 0.0 }
 0x657   : > { %7362 = vadd.xlane.f32.xlu0 %v7361_v11  ;;  %v5619_v29 = vand.u32 4294901760, %v5618_v27  ;;  %v6536_v47 = vand.u32 4294901760, %v6535_v44  ;;  %v8753_v44 = vld [vmem:[%s12950_s24 + $0x18] sm:$0xff] }
 0x659   : > { %v13401_v13 = vpop.eup %12533 }
 0x65a   : > { %11462 = vmatmul.mubr.f32.vlgmr.msra.gmra.mrb[8].mxu1 %v13383_v57  ;;  %v8278_v14 = vsel %vm1378_vm3, %v13401_v13, 0.0  ;;  %v12536_v16 = vpop.eup %12535 }
 0x65b   : > { %11465 = vmatpush3.msra.mxu1 %v4675_v60  ;;  %8279 = vadd.xlane.f32.xlu0 %v8278_v14  ;;  %v5531_v15 = vmul.f32 %v12536_v16, %v13336_v30 }
 0x65c   : > { %11466 = vmatprep.mubr.msk.f32.mxu1 %vm12709_vm2, %v12708_v12  ;;  %11469 = vmatprep.subr.mxu1 %v12708_v12 }
 0x65d   : > { %v5536_v18 = vsel %vm1378_vm3, %v5531_v15, 0 }
 0x65e   : > { %v5604_v20 = vand.u32 4294901760, %v5536_v18 }
 0x660   : > { %v5605_v22 = vsub.f32 %v5536_v18, %v5604_v20 }
 0x662   : > { %11467 = vmatmul.mubr.f32.vlgmr.msra.gmra.mrb[8].mxu1 %v4664_v59  ;;  %v5606_v24 = vand.u32 4294901760, %v5605_v22 }
 0x663   : > { %11470 = vmatpush3.msra.mxu1 %v4598_v58  ;;  %11471 = vmatprep.mubr.msk.f32.mxu1 %vm12709_vm2, %v12708_v12 }
 0x664   : > { %11474 = vmatprep.subr.mxu1 %v12708_v12  ;;  %v5607_v26 = vsub.f32 %v5605_v22, %v5606_v24 }
 0x666   : > { %v5608_v28 = vand.u32 4294901760, %v5607_v26 }
 0x66a   : > { %11472 = vmatmul.mubr.f32.vlgmr.msra.gmra.mrb[8].mxu1 %v4665_v63 }
 0x66b   : > { %11475 = vmatpush3.msra.mxu1 %v4676_v0  ;;  %11476 = vmatprep.mubr.msk.f32.mxu1 %vm12709_vm2, %v12708_v12 }
 0x66c   : > { %11479 = vmatprep.subr.mxu1 %v12708_v12 }
 0x672   : > { %11477 = vmatmul.mubr.f32.vlgmr.msra.gmra.mrb[8].mxu1 %v13383_v57 }
 0x673   : > { %11480 = vmatpush3.msra.mxu1 %v4598_v58  ;;  %11481 = vmatprep.mubr.msk.f32.mxu1 %vm12709_vm2, %v12708_v12 }
 0x674   : > { %11514 = vmatprep.subr.mxu1 %v12708_v12 }
 0x67a   : > { %11482 = vmatmul.mubr.f32.vlgmr.msra.gmra.mrb[8].mxu1 %v13383_v57 }
 0x67b   : > { %11515 = vmatpush3.msra.mxu1 %v5539_v21  ;;  %11516 = vmatprep.mubr.msk.f32.mxu1 %vm12709_vm2, %v12708_v12 }
 0x67c   : > { %11519 = vmatprep.subr.mxu1 %v12708_v12 }
 0x67e   : > { %11517 = vmatmul.mubr.f32.vlgmr.msra.gmra.mrb[10].mxu1 %v5608_v28 }
 0x67f   : > { %11520 = vmatpush3.msra.mxu1 %v5619_v29  ;;  %v13425_v30 = vpop.f32.mrb[2].mxu1  ;;  %11521 = vmatprep.mubr.msk.f32.mxu1 %vm12709_vm2, %v12708_v12 }
 0x680   : > { %v11303_v31 = vpop.f32.mrb[3].mxu1  ;;  %11524 = vmatprep.subr.mxu1 %v12708_v12 }
 0x686   : > { %11522 = vmatmul.mubr.f32.vlgmr.msra.gmra.mrb[10].mxu1 %v5604_v20 }
 0x687   : > { %11525 = vmatpush3.msra.mxu1 %v5616_v23  ;;  %11526 = vmatprep.mubr.msk.f32.mxu1 %vm12709_vm2, %v12708_v12 }
 0x688   : > { %11529 = vmatprep.subr.mxu1 %v12708_v12 }
 0x68e   : > { %11527 = vmatmul.mubr.f32.vlgmr.msra.gmra.mrb[10].mxu1 %v5605_v22 }
 0x68f   : > { %11530 = vmatpush3.msra.mxu1 %v5539_v21  ;;  %11531 = vmatprep.mubr.msk.f32.mxu1 %vm12709_vm2, %v12708_v12 }
 0x690   : > { %11534 = vmatprep.subr.mxu1 %v12708_v12 }
 0x696   : > { %11532 = vmatmul.mubr.f32.vlgmr.msra.gmra.mrb[10].mxu1 %v5606_v24 }
 0x697   : > { %11535 = vmatpush3.msra.mxu1 %v5617_v25  ;;  %11536 = vmatprep.mubr.msk.f32.mxu1 %vm12709_vm2, %v12708_v12 }
 0x698   : > { %11539 = vmatprep.subr.mxu1 %v12708_v12 }
 0x69e   : > { %11537 = vmatmul.mubr.f32.vlgmr.msra.gmra.mrb[10].mxu1 %v5604_v20 }
 0x69f   : > { %11540 = vmatpush3.msra.mxu1 %v5539_v21  ;;  %11541 = vmatprep.mubr.msk.f32.mxu1 %vm12709_vm2, %v12708_v12 }
 0x6a0   : > { %11574 = vmatprep.subr.mxu1 %v12708_v12 }
 0x6a6   : > { %11542 = vmatmul.mubr.f32.vlgmr.msra.gmra.mrb[10].mxu1 %v5604_v20 }
 0x6a7   : > { %11575 = vmatpush3.msra.mxu1 %v6456_v33  ;;  %11576 = vmatprep.mubr.msk.f32.mxu1 %vm12709_vm2, %v12708_v12 }
 0x6a8   : > { %11579 = vmatprep.subr.mxu1 %v12708_v12 }
 0x6ab   : > { %v3205_v34 = vpop.f32.mrb[4].mxu1 }
 0x6ac   : > { %5044 = vrot.lane.b32.xlu0 %v3205_v34, %s12721_s20  ;;  %v11363_v35 = vpop.f32.mrb[5].mxu1 }
 0x6b3   : > { %v6446_v36 = vpop.xlane.xlu0 %6445 }
 0x6b4   : > { %12537 = vrcp.f32 %v6446_v36 }
 0x6be   : > { %v12538_v37 = vpop.eup %12537 }
 0x6bf   : > { %v6448_v39 = vmul.f32 %v12538_v37, %v13365_v49  ;;  %v7367_v49 = vpop.permute.xlu1 %7366  ;;  %v8750_v37 = vld [vmem:[%s12950_s24] sm:$0xff] }
 0x6c0   : > { %v7373_v50 = vand.u32 4294901760, %v7367_v49 }
 0x6c1   : > { %v6453_v40 = vsel %vm1378_vm3, %v6448_v39, 0  ;;  %v8768_v39 = vand.u32 4294901760, %v8750_v37 }
 0x6c2   : > { %v6521_v41 = vand.u32 4294901760, %v6453_v40  ;;  %v7450_v52 = vsub.f32 %v7367_v49, %v7373_v50 }
 0x6c3   : > { %v8284_v3 = vpop.permute.xlu1 %8283 }
 0x6c4   : > { %v6522_v42 = vsub.f32 %v6453_v40, %v6521_v41  ;;  %v7451_v56 = vand.u32 4294901760, %v7450_v52  ;;  %v8290_v5 = vand.u32 4294901760, %v8284_v3 }
 0x6c6   : > { %v6523_v43 = vand.u32 4294901760, %v6522_v42  ;;  %v7452_v59 = vsub.f32 %v7450_v52, %v7451_v56  ;;  %v8367_v7 = vsub.f32 %v8284_v3, %v8290_v5 }
 0x6c8   : > { %v6524_v45 = vsub.f32 %v6522_v42, %v6523_v43  ;;  %v7453_v62 = vand.u32 4294901760, %v7452_v59 }
 0x6ca   : > { %v6525_v46 = vand.u32 4294901760, %v6524_v45 }
 0x6cc   : > { %11577 = vmatmul.mubr.f32.vlgmr.msra.gmra.mrb[12].mxu1 %v6525_v46  ;;  %v8777_v46 = vand.u32 4294901760, %v8753_v44 }
 0x6cd   : > { %11580 = vmatpush3.msra.mxu1 %v6536_v47  ;;  %11581 = vmatprep.mubr.msk.f32.mxu1 %vm12709_vm2, %v12708_v12 }
 0x6ce   : > { %11584 = vmatprep.subr.mxu1 %v12708_v12 }
 0x6d4   : > { %11582 = vmatmul.mubr.f32.vlgmr.msra.gmra.mrb[12].mxu1 %v6521_v41 }
 0x6d5   : > { %11585 = vmatpush3.msra.mxu1 %v6533_v38  ;;  %11586 = vmatprep.mubr.msk.f32.mxu1 %vm12709_vm2, %v12708_v12  ;;  %v8751_v38 = vld [vmem:[%s12950_s24 + $0x8] sm:$0xff] }
 0x6d6   : > { %11589 = vmatprep.subr.mxu1 %v12708_v12  ;;  %v8771_v40 = vand.u32 4294901760, %v8751_v38 }
 0x6dc   : > { %11587 = vmatmul.mubr.f32.vlgmr.msra.gmra.mrb[12].mxu1 %v6522_v42  ;;  %v8865_v42 = vsub.f32 %v8751_v38, %v8771_v40 }
 0x6dd   : > { %11590 = vmatpush3.msra.mxu1 %v6456_v33  ;;  %11591 = vmatprep.mubr.msk.f32.mxu1 %vm12709_vm2, %v12708_v12 }
 0x6de   : > { %11594 = vmatprep.subr.mxu1 %v12708_v12 }
 0x6e4   : > { %11592 = vmatmul.mubr.f32.vlgmr.msra.gmra.mrb[12].mxu1 %v6523_v43  ;;  %v7363_v48 = vpop.xlane.xlu0 %7362  ;;  %v8752_v43 = vld [vmem:[%s12950_s24 + $0x10] sm:$0xff] }
 0x6e5   : > { %11595 = vmatpush3.msra.mxu1 %v6534_v17  ;;  %12539 = vrcp.f32 %v7363_v48  ;;  %11596 = vmatprep.mubr.msk.f32.mxu1 %vm12709_vm2, %v12708_v12  ;;  %v8858_v17 = vsub.f32 %v8750_v37, %v8768_v39  ;;  %v8774_v45 = vand.u32 4294901760, %v8752_v43  ;;  %v8866_v48 = vand.u32 4294901760, %v8865_v42 }
 0x6e6   : > { %11599 = vmatprep.subr.mxu1 %v12708_v12 }
 0x6e7   : > { %v8859_v47 = vand.u32 4294901760, %v8858_v17  ;;  %v13530_v49 = vpack.c.bf16 %v8777_v46, %v8774_v45 }
 0x6e8   : > { %v8280_v63 = vpop.xlane.xlu0 %8279 }
 0x6e9   : > { %12541 = vrcp.f32 %v8280_v63 }
 0x6ec   : > { %11597 = vmatmul.mubr.f32.vlgmr.msra.gmra.mrb[12].mxu1 %v6521_v41 }
 0x6ed   : > { %11600 = vmatpush3.msra.mxu1 %v6456_v33  ;;  %11601 = vmatprep.mubr.msk.f32.mxu1 %vm12709_vm2, %v12708_v12 }
 0x6ee   : > { %11634 = vmatprep.subr.mxu1 %v12708_v12 }
 0x6ef   : > { %v12540_v51 = vpop.eup %12539 }
 0x6f0   : > { %v7365_v53 = vmul.f32 %v12540_v51, %v13397_v9  ;;  %v8368_v9 = vand.u32 4294901760, %v8367_v7  ;;  %v8867_v51 = vsub.f32 %v8865_v42, %v8866_v48 }
 0x6f2   : > { %v7370_v54 = vsel %vm1378_vm3, %v7365_v53, 0  ;;  %v8369_v14 = vsub.f32 %v8367_v7, %v8368_v9  ;;  %v8879_v53 = vsub.f32 %v8753_v44, %v8777_v46  ;;  %v9345_v44 = vld [vmem:[%s12967_s27 + $0x18] sm:$0xff] }
 0x6f3   : > { %v7438_v55 = vand.u32 4294901760, %v7370_v54  ;;  %v12542_v0 = vpop.eup %12541  ;;  %v9369_v46 = vand.u32 4294901760, %v9345_v44 }
 0x6f4   : > { %11602 = vmatmul.mubr.f32.vlgmr.msra.gmra.mrb[12].mxu1 %v6521_v41  ;;  %v8282_v1 = vmul.f32 %v12542_v0, %v13401_v13  ;;  %v8370_v15 = vand.u32 4294901760, %v8369_v14  ;;  %v13524_v41 = vpack.c.bf16 %v8771_v40, %v8768_v39  ;;  %v9342_v40 = vld [vmem:[%s12967_s27] sm:$0xff] }
 0x6f5   : > { %11635 = vmatpush3.msra.mxu1 %v7373_v50  ;;  %11636 = vmatprep.mubr.msk.f32.mxu1 %vm12709_vm2, %v12708_v12  ;;  %v7439_v57 = vsub.f32 %v7370_v54, %v7438_v55 }
 0x6f6   : > { %11639 = vmatprep.subr.mxu1 %v12708_v12  ;;  %v8287_v2 = vsel %vm1378_vm3, %v8282_v1, 0  ;;  %12019 = vmatprep.subr.bf16.mxu0 %v13524_v41 }
 0x6f7   : > { %v7440_v58 = vand.u32 4294901760, %v7439_v57  ;;  %v8355_v4 = vand.u32 4294901760, %v8287_v2  ;;  %12021 = vmatpush3.bf16.msra.mxu0 %v13524_v41 }
 0x6f8   : > { %12023 = vmatprep.subr.bf16.mxu0 %v13530_v49 }
 0x6f9   : > { %v7441_v60 = vsub.f32 %v7439_v57, %v7440_v58  ;;  %v8356_v6 = vsub.f32 %v8287_v2, %v8355_v4  ;;  %v12034_v2 = vpack.c.bf16 %v8865_v42, %v8858_v17  ;;  %v9360_v42 = vand.u32 4294901760, %v9342_v40 }
 0x6fb   : > { %v7442_v61 = vand.u32 4294901760, %v7441_v60  ;;  %v8357_v8 = vand.u32 4294901760, %v8356_v6  ;;  %12025 = vmatpush3.bf16.msra.mxu0 %v13530_v49 }
 0x6fd   : > { %11637 = vmatmul.mubr.f32.vlgmr.msra.gmra.mrb[14].mxu1 %v7442_v61  ;;  %v8358_v13 = vsub.f32 %v8356_v6, %v8357_v8 }
 0x6fe   : > { %11640 = vmatpush3.msra.mxu1 %v7453_v62  ;;  %11641 = vmatprep.mubr.msk.f32.mxu1 %vm12709_vm2, %v12708_v12 }
 0x6ff   : > { %11644 = vmatprep.subr.mxu1 %v12708_v12  ;;  %v8359_v16 = vand.u32 4294901760, %v8358_v13 }
 0x705   : > { %11642 = vmatmul.mubr.f32.vlgmr.msra.gmra.mrb[14].mxu1 %v7438_v55 }
 0x706   : > { %11645 = vmatpush3.msra.mxu1 %v7450_v52  ;;  %11646 = vmatprep.mubr.msk.f32.mxu1 %vm12709_vm2, %v12708_v12  ;;  %v8872_v52 = vsub.f32 %v8752_v43, %v8774_v45 }
 0x707   : > { %11649 = vmatprep.subr.mxu1 %v12708_v12 }
 0x708   : > { %v12038_v3 = vpack.c.bf16 %v8879_v53, %v8872_v52 }
 0x70d   : > { %11647 = vmatmul.mubr.f32.vlgmr.msra.gmra.mrb[14].mxu1 %v7439_v57  ;;  %v8880_v57 = vand.u32 4294901760, %v8879_v53 }
 0x70e   : > { %11650 = vmatpush3.msra.mxu1 %v7373_v50  ;;  %11651 = vmatprep.mubr.msk.f32.mxu1 %vm12709_vm2, %v12708_v12 }
 0x70f   : > { %11654 = vmatprep.subr.mxu1 %v12708_v12  ;;  %v8881_v61 = vsub.f32 %v8879_v53, %v8880_v57 }
 0x711   : > { %v8882_v0 = vand.u32 4294901760, %v8881_v61 }
 0x715   : > { %11652 = vmatmul.mubr.f32.vlgmr.msra.gmra.mrb[14].mxu1 %v7440_v58 }
 0x716   : > { %11655 = vmatpush3.msra.mxu1 %v7451_v56  ;;  %11656 = vmatprep.mubr.msk.f32.mxu1 %vm12709_vm2, %v12708_v12  ;;  %v8873_v56 = vand.u32 4294901760, %v8872_v52 }
 0x717   : > { %11659 = vmatprep.subr.mxu1 %v12708_v12 }
 0x718   : > { %v8874_v59 = vsub.f32 %v8872_v52, %v8873_v56 }
 0x71a   : > { %v8875_v63 = vand.u32 4294901760, %v8874_v59 }
 0x71c   : > { %v12030_v1 = vpack.c.bf16 %v8882_v0, %v8875_v63 }
 0x71d   : > { %11657 = vmatmul.mubr.f32.vlgmr.msra.gmra.mrb[14].mxu1 %v7438_v55 }
 0x71e   : > { %11660 = vmatpush3.msra.mxu1 %v7373_v50  ;;  %11661 = vmatprep.mubr.msk.f32.mxu1 %vm12709_vm2, %v12708_v12  ;;  %v5045_v22 = vpop.permute.xlu0 %5044  ;;  %v8860_v50 = vsub.f32 %v8858_v17, %v8859_v47  ;;  %v9344_v17 = vld [vmem:[%s12967_s27 + $0x10] sm:$0xff] }
 0x71f   : > { %11694 = vmatprep.subr.mxu1 %v12708_v12  ;;  %v5055_v24 = vsel %vm1378_vm3, %v13425_v30, %v5045_v22  ;;  %v9366_v45 = vand.u32 4294901760, %v9344_v17 }
 0x720   : > { %v8861_v54 = vand.u32 4294901760, %v8860_v50 }
 0x721   : > { %v4122_v10 = vpop.f32.mrb[6].mxu1 }
 0x722   : > { %5048 = vrot.lane.b32.xlu1 %v4122_v10, %s12722_s23  ;;  %v11423_v11 = vpop.f32.mrb[7].mxu1 }
 0x725   : > { %11662 = vmatmul.mubr.f32.vlgmr.msra.gmra.mrb[14].mxu1 %v7438_v55  ;;  %v8868_v55 = vand.u32 4294901760, %v8867_v51 }
 0x726   : > { %11695 = vmatpush3.msra.mxu1 %v8290_v5  ;;  %11696 = vmatprep.mubr.msk.f32.mxu1 %vm12709_vm2, %v12708_v12 }
 0x727   : > { %11699 = vmatprep.subr.mxu1 %v12708_v12  ;;  %v12026_v58 = vpack.c.bf16 %v8868_v55, %v8861_v54  ;;  %v9464_v55 = vsub.f32 %v9344_v17, %v9366_v45  ;;  %v9908_v17 = vld [vmem:[%s12977_s25 + $0x18] sm:$0xff] }
 0x729   : > { %11697 = vmatmul.mubr.f32.vlgmr.msra.gmra.mrb[16].mxu1 %v8359_v16  ;;  %12027 = vmatprep.subr.bf16.mxu0 %v12026_v58  ;;  %v9465_v59 = vand.u32 4294901760, %v9464_v55 }
 0x72a   : > { %11700 = vmatpush3.msra.mxu1 %v8370_v15  ;;  %11701 = vmatprep.mubr.msk.f32.mxu1 %vm12709_vm2, %v12708_v12 }
 0x72b   : > { %11704 = vmatprep.subr.mxu1 %v12708_v12 }
 0x731   : > { %11702 = vmatmul.mubr.f32.vlgmr.msra.gmra.mrb[16].mxu1 %v8355_v4 }
 0x732   : > { %11705 = vmatpush3.msra.mxu1 %v8367_v7  ;;  %11706 = vmatprep.mubr.msk.f32.mxu1 %vm12709_vm2, %v12708_v12 }
 0x733   : > { %11709 = vmatprep.subr.mxu1 %v12708_v12 }
 0x739   : > { %11707 = vmatmul.mubr.f32.vlgmr.msra.gmra.mrb[16].mxu1 %v8356_v6 }
 0x73a   : > { %11710 = vmatpush3.msra.mxu1 %v8290_v5  ;;  %11711 = vmatprep.mubr.msk.f32.mxu1 %vm12709_vm2, %v12708_v12 }
 0x73b   : > { %11714 = vmatprep.subr.mxu1 %v12708_v12 }
 0x741   : > { %11712 = vmatmul.mubr.f32.vlgmr.msra.gmra.mrb[16].mxu1 %v8357_v8 }
 0x742   : > { %11715 = vmatpush3.msra.mxu1 %v8368_v9  ;;  %11716 = vmatprep.mubr.msk.f32.mxu1 %vm12709_vm2, %v12708_v12 }
 0x743   : > { %11719 = vmatprep.subr.mxu1 %v12708_v12 }
 0x749   : > { %11717 = vmatmul.mubr.f32.vlgmr.msra.gmra.mrb[16].mxu1 %v8355_v4 }
 0x74a   : > { %11720 = vmatpush3.msra.mxu1 %v8290_v5  ;;  %11721 = vmatprep.mubr.msk.f32.mxu1 %vm12709_vm2, %v12708_v12  ;;  %v12054_v5 = vpack.c.bf16 %v8880_v57, %v8873_v56  ;;  %v9471_v56 = vsub.f32 %v9345_v44, %v9369_v46 }
 0x74d   : > { %v5039_v18 = vpop.f32.mrb[8].mxu1 }
 0x74e   : > { %5052 = vrot.lane.b32.xlu1 %v5039_v18, %s12723_s19  ;;  %v11483_v19 = vpop.f32.mrb[9].mxu1 }
 0x751   : > { %11722 = vmatmul.mubr.f32.vlgmr.msra.gmra.mrb[16].mxu1 %v8355_v4  ;;  %v12050_v4 = vpack.c.bf16 %v8866_v48, %v8859_v47  ;;  %v13569_v48 = vpack.c.bf16 %v9369_v46, %v9366_v45  ;;  %v9909_v45 = vld [vmem:[%s12977_s25 + $0x20] sm:$0xff]  ;;  %v9910_v46 = vld [vmem:[%s12977_s25 + $0x28] sm:$0xff] }
 0x779   : > { %v13504_v20 = vpop.f32.mrb[10].mxu1 }
 0x77a   : > { %v11543_v21 = vpop.f32.mrb[11].mxu1 }
 0x794   : > { %v5049_v23 = vpop.permute.xlu1 %5048 }
 0x795   : > { %v5057_v25 = vsel %vm5056_vm4, %v5055_v24, %v5049_v23 }
 0x7c0   : > { %v5053_v12 = vpop.permute.xlu1 %5052 }
 0x7c1   : > { %v5059_v26 = vsel %vm5058_vm5, %v5057_v25, %v5053_v12  ;;  %v12555_v25 = vld [vmem:[#allocation2 + $0x8] sm:$0xff] }
 0x7c2   : > { %v8762_v27 = vsel %vm833_vm1, %v5059_v26, 0  ;;  %v12556_v26 = vld [vmem:[#allocation2] sm:$0xff] }
 0x7c3   : > { %v13511_v28 = vand.u32 4294901760, %v8762_v27 }
 0x7c5   : > { %v13514_v29 = vsub.f32 %v8762_v27, %v13511_v28 }
 0x7c7   : > { %v6897_v31 = vpop.f32.mrb[12].mxu1  ;;  %v8838_v32 = vand.u32 4294901760, %v13514_v29 }
 0x7c8   : > { %8736 = vrot.lane.b32.xlu1 %v6897_v31, %s12721_s20  ;;  %v11603_v30 = vpop.f32.mrb[13].mxu1 }
 0x7c9   : > { %v8839_v33 = vsub.f32 %v13514_v29, %v8838_v32 }
 0x7cb   : > { %v8840_v34 = vand.u32 4294901760, %v8839_v33 }
 0x7cd   : > { %11732 = vmatprep.mubr.f32.mxu0 %v8840_v34 }
 0x7f8   : > { %v7814_v35 = vpop.f32.mrb[14].mxu1 }
 0x7f9   : > { %8740 = vrot.lane.b32.xlu1 %v7814_v35, %s12722_s23  ;;  %v11663_v36 = vpop.f32.mrb[15].mxu1 }
 0x824   : > { %v8731_v60 = vpop.f32.mrb[16].mxu1 }
 0x825   : > { %8744 = vrot.lane.b32.xlu1 %v8731_v60, %s12723_s19  ;;  %v11723_v62 = vpop.f32.mrb[17].mxu1  ;;  %v9472_v60 = vand.u32 4294901760, %v9471_v56 }
 0x826   : > { %v9466_v62 = vsub.f32 %v9464_v55, %v9465_v59 }
 0x827   : > { %v9473_v63 = vsub.f32 %v9471_v56, %v9472_v60 }
 0x828   : > { %v9467_v0 = vand.u32 4294901760, %v9466_v62 }
 0x83a   : > { %v8737_v6 = vpop.permute.xlu1 %8736 }
 0x83b   : > { %v8747_v8 = vsel %vm1378_vm3, %v13504_v20, %v8737_v6  ;;  %v10802_v20 = vld [vmem:[%s13815_s18] ss:$0 sm:$0xff]  ;;  %v12102_v6 = vpack.c.bf16 %v9472_v60, %v9465_v59 }
 0x86b   : > { %v8741_v7 = vpop.permute.xlu1 %8740 }
 0x86c   : > { %v8748_v9 = vsel %vm5056_vm4, %v8747_v8, %v8741_v7 }
 0x897   : > { %v8745_v10 = vpop.permute.xlu1 %8744 }
 0x898   : > { %v8749_v11 = vsel %vm5058_vm5, %v8748_v9, %v8745_v10 }
 0x899   : > { %v8765_v13 = vsel %vm833_vm1, %v8749_v11, 0 }
 0x89a   : > { %v8846_v14 = vand.u32 4294901760, %v8765_v13 }
 0x89c   : > { %v8847_v16 = vsub.f32 %v8765_v13, %v8846_v14 }
 0x89e   : > { %v8848_v15 = vand.u32 4294901760, %v8847_v16 }
 0x8a0   : > { %v8849_v18 = vsub.f32 %v8847_v16, %v8848_v15 }
 0x8a2   : > { %v8850_v19 = vand.u32 4294901760, %v8849_v18  ;;  %v10804_v18 = vld [vmem:[%s13817_s6] ss:$0 sm:$0xff] }
 0x8a4   : > { %11733 = vmatmul.mubr.f32.vlgmr.msra.gmra.mrb[16].mxu0 %v8850_v19 }
 0x8a5   : > { %12029 = vmatpush3.bf16.msra.mxu0 %v12026_v58  ;;  %11743 = vmatprep.mubr.f32.mxu0 %v13511_v28 }
 0x8a6   : > { %12031 = vmatprep.subr.bf16.mxu0 %v12030_v1 }
 0x8a9   : > { %12033 = vmatpush3.bf16.msra.mxu0 %v12030_v1  ;;  %v9474_v1 = vand.u32 4294901760, %v9473_v63 }
 0x8aa   : > { %12035 = vmatprep.subr.bf16.mxu0 %v12034_v2 }
 0x8ac   : > { %11744 = vmatmul.mubr.f32.vlgmr.msra.gmra.mrb[16].mxu0 %v8846_v14 }
 0x8ad   : > { %12037 = vmatpush3.bf16.msra.mxu0 %v12034_v2  ;;  %11754 = vmatprep.mubr.f32.mxu0 %v13514_v29  ;;  %v12078_v2 = vpack.c.bf16 %v9474_v1, %v9467_v0 }
 0x8ae   : > { %12039 = vmatprep.subr.bf16.mxu0 %v12038_v3 }
 0x8b1   : > { %12041 = vmatpush3.bf16.msra.mxu0 %v12038_v3 }
 0x8b2   : > { %12043 = vmatprep.subr.bf16.mxu0 %v13524_v41 }
 0x8b4   : > { %11755 = vmatmul.mubr.f32.vlgmr.msra.gmra.mrb[16].mxu0 %v8847_v16  ;;  %v10803_v16 = vld [vmem:[%s13816_s28] ss:$0 sm:$0xff] }
 0x8b5   : > { %12045 = vmatpush3.bf16.msra.mxu0 %v13524_v41  ;;  %11765 = vmatprep.mubr.f32.mxu0 %v8838_v32 }
 0x8b6   : > { %12047 = vmatprep.subr.bf16.mxu0 %v13530_v49 }
 0x8b9   : > { %12049 = vmatpush3.bf16.msra.mxu0 %v13530_v49 }
 0x8ba   : > { %12051 = vmatprep.subr.bf16.mxu0 %v12050_v4 }
 0x8bc   : > { %11766 = vmatmul.mubr.f32.vlgmr.msra.gmra.mrb[16].mxu0 %v8848_v15 }
 0x8bd   : > { %12053 = vmatpush3.bf16.msra.mxu0 %v12050_v4  ;;  %11776 = vmatprep.mubr.f32.mxu0 %v13511_v28  ;;  %v12086_v4 = vpack.c.bf16 %v9471_v56, %v9464_v55 }
 0x8be   : > { %12055 = vmatprep.subr.bf16.mxu0 %v12054_v5 }
 0x8c1   : > { %12057 = vmatpush3.bf16.msra.mxu0 %v12054_v5 }
 0x8c2   : > { %12059 = vmatprep.subr.bf16.mxu0 %v13524_v41 }
 0x8c4   : > { %11777 = vmatmul.mubr.f32.vlgmr.msra.gmra.mrb[16].mxu0 %v8846_v14 }
 0x8c5   : > { %12061 = vmatpush3.bf16.msra.mxu0 %v13524_v41  ;;  %11787 = vmatprep.mubr.f32.mxu0 %v13511_v28  ;;  %v9343_v41 = vld [vmem:[%s12967_s27 + $0x8] sm:$0xff] }
 0x8c6   : > { %12063 = vmatprep.subr.bf16.mxu0 %v13530_v49  ;;  %v9363_v43 = vand.u32 4294901760, %v9343_v41 }
 0x8c8   : > { %v13567_v47 = vpack.c.bf16 %v9363_v43, %v9360_v42  ;;  %v9457_v50 = vsub.f32 %v9343_v41, %v9363_v43  ;;  %v9907_v41 = vld [vmem:[%s12977_s25 + $0x10] sm:$0xff]  ;;  %v9937_v43 = vand.u32 4294901760, %v9908_v17 }
 0x8c9   : > { %12065 = vmatpush3.bf16.msra.mxu0 %v13530_v49  ;;  %v9450_v49 = vsub.f32 %v9342_v40, %v9360_v42  ;;  %v9934_v42 = vand.u32 4294901760, %v9907_v41 }
 0x8ca   : > { %12067 = vmatprep.subr.bf16.mxu1 %v13567_v47  ;;  %v9458_v52 = vand.u32 4294901760, %v9457_v50  ;;  %v10043_v63 = vsub.f32 %v9908_v17, %v9937_v43 }
 0x8cb   : > { %12069 = vmatpush3.bf16.msra.mxu1 %v13567_v47  ;;  %v9451_v51 = vand.u32 4294901760, %v9450_v49  ;;  %v12082_v3 = vpack.c.bf16 %v9457_v50, %v9450_v49  ;;  %v13611_v44 = vpack.c.bf16 %v9937_v43, %v9934_v42  ;;  %v10036_v62 = vsub.f32 %v9907_v41, %v9934_v42 }
 0x8cc   : > { %11788 = vmatmul.mubr.f32.vlgmr.msra.gmra.mrb[16].mxu0 %v8846_v14  ;;  %12071 = vmatprep.subr.bf16.mxu1 %v13569_v48  ;;  %v9459_v54 = vsub.f32 %v9457_v50, %v9458_v52  ;;  %v9911_v50 = vld [vmem:[%s12977_s25 + $0x30] sm:$0xff] }
 0x8cd   : > { %v9452_v53 = vsub.f32 %v9450_v49, %v9451_v51  ;;  %v12098_v5 = vpack.c.bf16 %v9458_v52, %v9451_v51  ;;  %v9912_v51 = vld [vmem:[%s12977_s25 + $0x38] sm:$0xff]  ;;  %v9946_v52 = vand.u32 4294901760, %v9911_v50 }
 0x8ce   : > { %v9460_v58 = vand.u32 4294901760, %v9459_v54 }
 0x8cf   : > { %12073 = vmatpush3.bf16.msra.mxu1 %v13569_v48  ;;  %v9453_v57 = vand.u32 4294901760, %v9452_v53  ;;  %v9949_v53 = vand.u32 4294901760, %v9912_v51 }
 0x8d1   : > { %v12074_v61 = vpack.c.bf16 %v9460_v58, %v9453_v57  ;;  %v13627_v54 = vpack.c.bf16 %v9949_v53, %v9946_v52 }
 0x8d3   : > { %12075 = vmatprep.subr.bf16.mxu1 %v12074_v61 }
 0x99f   : > { %v11789_v21 = vpop.f32.mrb[16].mxu0 }
 0x9a0   : > { %v12220_v22 = vadd.f32 %v11789_v21, %v10802_v20  ;;  %v9285_v23 = vpop.f32.mrb[17].mxu0 }
 0x9a1   : > { %v12221_v24 = vadd.f32 %v10802_v20, %v9285_v23 }
 0x9a2   : > { %v9296_v12 = vadd.f32 %v12555_v25, %v12220_v22 }
 0x9a3   : > { %v9295_v27 = vadd.f32 %v12556_v26, %v12221_v24 }
 0x9a4   : > { %v9302_v28 = vsel %vm833_vm1, %v9296_v12, 0.0 }
 0x9a5   : > { %9303 = vadd.xlane.f32.xlu1 %v9302_v28  ;;  %v9299_v29 = vsel %vm833_vm1, %v9295_v27, 0.0 }
 0x9a6   : > { %9300 = vadd.xlane.f32.xlu0 %v9299_v29 }
 0xa32   : > { %v9304_v31 = vpop.xlane.xlu1 %9303 }
 0xa33   : > { %v9307_v32 = vmul.f32 0.03125, %v9304_v31  ;;  %v9301_v30 = vpop.xlane.xlu0 %9300 }
 0xa34   : > { %v9306_v33 = vmul.f32 0.03125, %v9301_v30 }
 0xa35   : > { %v9309_v34 = vsub.f32 %v9296_v12, %v9307_v32 }
 0xa36   : > { %v9308_v35 = vsub.f32 %v9295_v27, %v9306_v33 }
 0xa37   : > { %v9311_v38 = vmul.f32 %v9309_v34, %v9309_v34 }
 0xa38   : > { %v9310_v36 = vmul.f32 %v9308_v35, %v9308_v35 }
 0xa39   : > { %v9315_v39 = vsel %vm833_vm1, %v9311_v38, 0.0 }
 0xa3a   : > { %v9312_v37 = vsel %vm833_vm1, %v9310_v36, 0.0  ;;  %v9905_v36 = vld [vmem:[%s12977_s25] sm:$0xff] }
 0xa3b   : > { %9313 = vadd.xlane.f32.xlu0 %v9312_v37  ;;  %v9906_v37 = vld [vmem:[%s12977_s25 + $0x8] sm:$0xff]  ;;  %v9928_v38 = vand.u32 4294901760, %v9905_v36 }
 0xa3d   : > { %v10022_v55 = vsub.f32 %v9905_v36, %v9928_v38 }
 0xa3f   : > { %9316 = vadd.xlane.f32.xlu0 %v9315_v39  ;;  %v9931_v39 = vand.u32 4294901760, %v9906_v37  ;;  %v10023_v57 = vand.u32 4294901760, %v10022_v55 }
 0xa41   : > { %v13603_v40 = vpack.c.bf16 %v9931_v39, %v9928_v38  ;;  %v10029_v56 = vsub.f32 %v9906_v37, %v9931_v39  ;;  %v10024_v60 = vsub.f32 %v10022_v55, %v10023_v57  ;;  %v10805_v38 = vld [vmem:[%s750_s3] ss:$0 sm:$0xff] }
 0xa43   : > { %12163 = vmatprep.subr.bf16.mxu0 %v13603_v40  ;;  %v10030_v58 = vand.u32 4294901760, %v10029_v56  ;;  %v10025_v0 = vand.u32 4294901760, %v10024_v60 }
 0xa44   : > { %12165 = vmatpush3.bf16.msra.mxu0 %v13603_v40 }
 0xa45   : > { %12167 = vmatprep.subr.bf16.mxu0 %v13611_v44  ;;  %v13633_v59 = vpack.c.bf16 %v10030_v58, %v10023_v57 }
 0xa48   : > { %12169 = vmatpush3.bf16.msra.mxu0 %v13611_v44 }
 0xac8   : > { %v9314_v7 = vpop.xlane.xlu0 %9313 }
 0xac9   : > { %v9318_v8 = vmul.f32 0.03125, %v9314_v7 }
 0xacb   : > { %v9320_v9 = vadd.f32 1e-12, %v9318_v8 }
 0xacc   : > { %v9317_v10 = vpop.xlane.xlu0 %9316 }
 0xacd   : > { %12543 = vrsqrt.f32 %v9320_v9  ;;  %v9319_v11 = vmul.f32 0.03125, %v9317_v10 }
 0xacf   : > { %v9321_v13 = vadd.f32 1e-12, %v9319_v11 }
 0xad1   : > { %12545 = vrsqrt.f32 %v9321_v13 }
 0xad7   : > { %v12544_v14 = vpop.eup %12543 }
 0xad8   : > { %v9324_v15 = vmul.f32 %v12544_v14, %v9308_v35 }
 0xada   : > { %v9332_v19 = vmul.f32 %v10803_v16, %v9324_v15 }
 0xadb   : > { %v12546_v20 = vpop.eup %12545 }
 0xadc   : > { %v9325_v21 = vmul.f32 %v12546_v20, %v9309_v34  ;;  %v13585_v22 = vadd.f32 %v10804_v18, %v9332_v19  ;;  %v10064_v19 = vsub.f32 %v9911_v50, %v9946_v52 }
 0xade   : > { %v9333_v23 = vmul.f32 %v10803_v16, %v9325_v21  ;;  %v9354_v24 = vsel %vm833_vm1, %v13585_v22, 0  ;;  %v10071_v21 = vsub.f32 %v9912_v51, %v9949_v53 }
 0xadf   : > { %v9428_v25 = vand.u32 4294901760, %v9354_v24 }
 0xae0   : > { %v13589_v12 = vadd.f32 %v10804_v18, %v9333_v23  ;;  %v13657_v37 = vpack.c.bf16 %v10071_v21, %v10064_v19 }
 0xae1   : > { %v9429_v26 = vsub.f32 %v9354_v24, %v9428_v25 }
 0xae2   : > { %v9357_v27 = vsel %vm833_vm1, %v13589_v12, 0 }
 0xae3   : > { %v9430_v28 = vand.u32 4294901760, %v9429_v26  ;;  %v9438_v29 = vand.u32 4294901760, %v9357_v27 }
 0xae5   : > { %v9431_v31 = vsub.f32 %v9429_v26, %v9430_v28  ;;  %v9439_v32 = vsub.f32 %v9357_v27, %v9438_v29 }
 0xae7   : > { %v9432_v30 = vand.u32 4294901760, %v9431_v31  ;;  %v9440_v33 = vand.u32 4294901760, %v9439_v32 }
 0xae9   : > { %11798 = vmatprep.mubr.f32.mxu1 %v9432_v30  ;;  %v9441_v34 = vsub.f32 %v9439_v32, %v9440_v33 }
 0xaeb   : > { %v9442_v35 = vand.u32 4294901760, %v9441_v34  ;;  %v13651_v34 = vpack.c.bf16 %v10029_v56, %v10022_v55 }
 0xaed   : > { %11799 = vmatmul.mubr.f32.vlgmr.msra.gmra.mrb[18].mxu1 %v9442_v35  ;;  %v13653_v35 = vpack.c.bf16 %v10043_v63, %v10036_v62 }
 0xaee   : > { %12077 = vmatpush3.bf16.msra.mxu1 %v12074_v61  ;;  %11809 = vmatprep.mubr.f32.mxu1 %v9428_v25  ;;  %v10031_v61 = vsub.f32 %v10029_v56, %v10030_v58 }
 0xaef   : > { %12079 = vmatprep.subr.bf16.mxu1 %v12078_v2 }
 0xaf0   : > { %v10032_v1 = vand.u32 4294901760, %v10031_v61 }
 0xaf2   : > { %12081 = vmatpush3.bf16.msra.mxu1 %v12078_v2  ;;  %v10037_v2 = vand.u32 4294901760, %v10036_v62 }
 0xaf3   : > { %12083 = vmatprep.subr.bf16.mxu1 %v12082_v3 }
 0xaf5   : > { %11810 = vmatmul.mubr.f32.vlgmr.msra.gmra.mrb[18].mxu1 %v9438_v29 }
 0xaf6   : > { %12085 = vmatpush3.bf16.msra.mxu1 %v12082_v3  ;;  %11820 = vmatprep.mubr.f32.mxu1 %v9429_v26  ;;  %v10044_v3 = vand.u32 4294901760, %v10043_v63  ;;  %v10072_v26 = vand.u32 4294901760, %v10071_v21 }
 0xaf7   : > { %12087 = vmatprep.subr.bf16.mxu1 %v12086_v4 }
 0xaf8   : > { %v13638_v8 = vpack.c.bf16 %v10044_v3, %v10037_v2  ;;  %v10045_v9 = vsub.f32 %v10043_v63, %v10044_v3  ;;  %v10073_v31 = vsub.f32 %v10071_v21, %v10072_v26 }
 0xafa   : > { %12089 = vmatpush3.bf16.msra.mxu1 %v12086_v4  ;;  %v13636_v4 = vpack.c.bf16 %v10032_v1, %v10025_v0  ;;  %v10046_v14 = vand.u32 4294901760, %v10045_v9  ;;  %v10074_v30 = vand.u32 4294901760, %v10073_v31 }
 0xafb   : > { %12091 = vmatprep.subr.bf16.mxu1 %v13567_v47 }
 0xafd   : > { %11821 = vmatmul.mubr.f32.vlgmr.msra.gmra.mrb[18].mxu1 %v9439_v32 }
 0xafe   : > { %12093 = vmatpush3.bf16.msra.mxu1 %v13567_v47  ;;  %11831 = vmatprep.mubr.f32.mxu1 %v9430_v28 }
 0xaff   : > { %12095 = vmatprep.subr.bf16.mxu1 %v13569_v48 }
 0xb02   : > { %12097 = vmatpush3.bf16.msra.mxu1 %v13569_v48 }
 0xb03   : > { %12099 = vmatprep.subr.bf16.mxu1 %v12098_v5 }
 0xb05   : > { %11832 = vmatmul.mubr.f32.vlgmr.msra.gmra.mrb[18].mxu1 %v9440_v33 }
 0xb06   : > { %12101 = vmatpush3.bf16.msra.mxu1 %v12098_v5  ;;  %11842 = vmatprep.mubr.f32.mxu1 %v9428_v25  ;;  %v10038_v5 = vsub.f32 %v10036_v62, %v10037_v2 }
 0xb07   : > { %12103 = vmatprep.subr.bf16.mxu1 %v12102_v6 }
 0xb08   : > { %v10039_v10 = vand.u32 4294901760, %v10038_v5 }
 0xb0a   : > { %12105 = vmatpush3.bf16.msra.mxu1 %v12102_v6  ;;  %v13643_v20 = vpack.c.bf16 %v10046_v14, %v10039_v10 }
 0xb0b   : > { %12107 = vmatprep.subr.bf16.mxu1 %v13567_v47 }
 0xb0d   : > { %11843 = vmatmul.mubr.f32.vlgmr.msra.gmra.mrb[18].mxu1 %v9438_v29 }
 0xb0e   : > { %12109 = vmatpush3.bf16.msra.mxu1 %v13567_v47  ;;  %11853 = vmatprep.mubr.f32.mxu1 %v9428_v25  ;;  %v9940_v47 = vand.u32 4294901760, %v9909_v45  ;;  %v10065_v25 = vand.u32 4294901760, %v10064_v19 }
 0xb0f   : > { %12111 = vmatprep.subr.bf16.mxu1 %v13569_v48 }
 0xb10   : > { %v10050_v6 = vsub.f32 %v9909_v45, %v9940_v47  ;;  %v10066_v28 = vsub.f32 %v10064_v19, %v10065_v25 }
 0xb12   : > { %12113 = vmatpush3.bf16.msra.mxu1 %v13569_v48  ;;  %v9943_v48 = vand.u32 4294901760, %v9910_v46  ;;  %v10051_v11 = vand.u32 4294901760, %v10050_v6  ;;  %v10067_v32 = vand.u32 4294901760, %v10066_v28 }
 0xb13   : > { %12115 = vmatprep.subr.bf16.mxu1 %v13603_v40 }
 0xb14   : > { %v13619_v49 = vpack.c.bf16 %v9943_v48, %v9940_v47  ;;  %v10057_v7 = vsub.f32 %v9910_v46, %v9943_v48  ;;  %v10052_v15 = vsub.f32 %v10050_v6, %v10051_v11  ;;  %v13649_v33 = vpack.c.bf16 %v10074_v30, %v10067_v32 }
 0xb15   : > { %11854 = vmatmul.mubr.f32.vlgmr.msra.gmra.mrb[18].mxu1 %v9438_v29  ;;  %v13647_v29 = vpack.c.bf16 %v10072_v26, %v10065_v25 }
 0xb16   : > { %12117 = vmatpush3.bf16.msra.mxu1 %v13603_v40  ;;  %12171 = vmatprep.subr.bf16.mxu0 %v13619_v49  ;;  %v10058_v13 = vand.u32 4294901760, %v10057_v7  ;;  %v10053_v23 = vand.u32 4294901760, %v10052_v15  ;;  %v13655_v36 = vpack.c.bf16 %v10057_v7, %v10050_v6 }
 0xb17   : > { %12119 = vmatprep.subr.bf16.mxu1 %v13611_v44  ;;  %12173 = vmatpush3.bf16.msra.mxu0 %v13619_v49 }
 0xb18   : > { %12175 = vmatprep.subr.bf16.mxu0 %v13627_v54  ;;  %v13641_v16 = vpack.c.bf16 %v10058_v13, %v10051_v11  ;;  %v10059_v18 = vsub.f32 %v10057_v7, %v10058_v13 }
 0xb1a   : > { %12121 = vmatpush3.bf16.msra.mxu1 %v13611_v44  ;;  %v10060_v24 = vand.u32 4294901760, %v10059_v18 }
 0xb1b   : > { %12123 = vmatprep.subr.bf16.mxu1 %v13619_v49  ;;  %12177 = vmatpush3.bf16.msra.mxu0 %v13627_v54 }
 0xb1c   : > { %12179 = vmatprep.subr.bf16.mxu0 %v13633_v59  ;;  %v13645_v27 = vpack.c.bf16 %v10060_v24, %v10053_v23 }
 0xb1e   : > { %12125 = vmatpush3.bf16.msra.mxu1 %v13619_v49 }
 0xb1f   : > { %12127 = vmatprep.subr.bf16.mxu1 %v13627_v54 }
 0xb22   : > { %12129 = vmatpush3.bf16.msra.mxu1 %v13627_v54 }
 0xb23   : > { %12131 = vmatprep.subr.bf16.mxu1 %v13636_v4 }
 0xbe8   : > { %v11855_v39 = vpop.f32.mrb[18].mxu1 }
 0xbe9   : > { %v12222_v41 = vadd.f32 %v11855_v39, %v10805_v38  ;;  %v9877_v17 = vpop.f32.mrb[19].mxu1  ;;  %v10807_v39 = vld [vmem:[%s761_s30] ss:$0 sm:$0xff] }
 0xbea   : > { %v12223_v42 = vadd.f32 %v10805_v38, %v9877_v17 }
 0xbeb   : > { %v9888_v43 = vmul.f32 %v12222_v41, %v12222_v41 }
 0xbec   : > { %v9887_v45 = vmul.f32 %v12223_v42, %v12223_v42 }
 0xbed   : > { %v9890_v46 = vmul.f32 %v12222_v41, %v9888_v43 }
 0xbee   : > { %v9889_v47 = vmul.f32 %v12223_v42, %v9887_v45 }
 0xbef   : > { %v9892_v48 = vmul.f32 0.044715, %v9890_v46 }
 0xbf0   : > { %v9891_v50 = vmul.f32 0.044715, %v9889_v47 }
 0xbf1   : > { %v9894_v51 = vadd.f32 %v12222_v41, %v9892_v48 }
 0xbf2   : > { %v9893_v52 = vadd.f32 %v12223_v42, %v9891_v50 }
 0xbf3   : > { %v9896_v53 = vmul.f32 0.7978846, %v9894_v51 }
 0xbf4   : > { %v9895_v55 = vmul.f32 0.7978846, %v9893_v52 }
 0xbf5   : > { %12547 = vtanh.f32 %v9896_v53 }
 0xbf6   : > { %12549 = vtanh.f32 %v9895_v55 }
 0xbff   : > { %v12548_v56 = vpop.eup %12547 }
 0xc00   : > { %v12550_v57 = vpop.eup %12549  ;;  %v9900_v58 = vadd.f32 1.0, %v12548_v56 }
 0xc01   : > { %v9899_v60 = vadd.f32 1.0, %v12550_v57 }
 0xc02   : > { %v9902_v61 = vmul.f32 0.5, %v9900_v58 }
 0xc03   : > { %v9901_v62 = vmul.f32 0.5, %v9899_v60 }
 0xc04   : > { %v9904_v63 = vmul.f32 %v12222_v41, %v9902_v61 }
 0xc05   : > { %v9903_v0 = vmul.f32 %v12223_v42, %v9901_v62  ;;  %v10808_v42 = vld [vmem:[%s764_s10] ss:$0 sm:$0xff] }
 0xc06   : > { %v9925_v1 = vsel %vm9920_vm6, %v9904_v63, 0 }
 0xc07   : > { %v10010_v2 = vand.u32 4294901760, %v9925_v1  ;;  %v9922_v3 = vsel %vm9920_vm6, %v9903_v0, 0 }
 0xc08   : > { %v10000_v5 = vand.u32 4294901760, %v9922_v3 }
 0xc09   : > { %v10011_v6 = vsub.f32 %v9925_v1, %v10010_v2 }
 0xc0a   : > { %v10001_v7 = vsub.f32 %v9922_v3, %v10000_v5 }
 0xc0b   : > { %v10012_v9 = vand.u32 4294901760, %v10011_v6 }
 0xc0c   : > { %v10002_v10 = vand.u32 4294901760, %v10001_v7 }
 0xc0d   : > { %v10013_v11 = vsub.f32 %v10011_v6, %v10012_v9 }
 0xc0e   : > { %11929 = vmatprep.mubr.f32.mxu0 %v10002_v10  ;;  %v10003_v13 = vsub.f32 %v10001_v7, %v10002_v10 }
 0xc0f   : > { %11930 = vmatmul.mubr.f32.vlgmr.msra.gmra.mrb[18].mxu0 %v10012_v9  ;;  %v10014_v15 = vand.u32 4294901760, %v10013_v11 }
 0xc10   : > { %12181 = vmatpush3.bf16.msra.mxu0 %v13633_v59  ;;  %11948 = vmatprep.mubr.f32.mxu0 %v10000_v5  ;;  %v10004_v14 = vand.u32 4294901760, %v10003_v13 }
 0xc11   : > { %12183 = vmatprep.subr.bf16.mxu0 %v13638_v8 }
 0xc12   : > { %11872 = vmatprep.mubr.f32.mxu1 %v10004_v14 }
 0xc13   : > { %11873 = vmatmul.mubr.f32.vlgmr.msra.gmra.mrb[20].mxu1 %v10014_v15 }
 0xc14   : > { %12133 = vmatpush3.bf16.msra.mxu1 %v13636_v4  ;;  %12185 = vmatpush3.bf16.msra.mxu0 %v13638_v8 }
 0xc15   : > { %11891 = vmatprep.mubr.f32.mxu1 %v10000_v5  ;;  %12135 = vmatprep.subr.bf16.mxu1 %v13643_v20 }
 0xc16   : > { %12187 = vmatprep.subr.bf16.mxu0 %v13641_v16 }
 0xc18   : > { %12137 = vmatpush3.bf16.msra.mxu1 %v13643_v20  ;;  %12189 = vmatpush3.bf16.msra.mxu0 %v13641_v16 }
 0xc19   : > { %12139 = vmatprep.subr.bf16.mxu1 %v13645_v27  ;;  %12191 = vmatprep.subr.bf16.mxu0 %v13647_v29 }
 0xc1c   : > { %12141 = vmatpush3.bf16.msra.mxu1 %v13645_v27  ;;  %12193 = vmatpush3.bf16.msra.mxu0 %v13647_v29 }
 0xc1d   : > { %12143 = vmatprep.subr.bf16.mxu1 %v13649_v33  ;;  %12195 = vmatprep.subr.bf16.mxu0 %v13603_v40 }
 0xc1f   : > { %11949 = vmatmul.mubr.f32.vlgmr.msra.gmra.mrb[18].mxu0 %v10010_v2 }
 0xc20   : > { %12145 = vmatpush3.bf16.msra.mxu1 %v13649_v33  ;;  %12197 = vmatpush3.bf16.msra.mxu0 %v13603_v40 }
 0xc21   : > { %11967 = vmatprep.mubr.f32.mxu0 %v10000_v5  ;;  %12147 = vmatprep.subr.bf16.mxu1 %v13651_v34 }
 0xc22   : > { %12199 = vmatprep.subr.bf16.mxu0 %v13611_v44 }
 0xc23   : > { %11892 = vmatmul.mubr.f32.vlgmr.msra.gmra.mrb[20].mxu1 %v10010_v2 }
 0xc24   : > { %12149 = vmatpush3.bf16.msra.mxu1 %v13651_v34  ;;  %11910 = vmatprep.mubr.f32.mxu1 %v10001_v7 }
 0xc25   : > { %12201 = vmatpush3.bf16.msra.mxu0 %v13611_v44  ;;  %12151 = vmatprep.subr.bf16.mxu1 %v13653_v35 }
 0xc26   : > { %12203 = vmatprep.subr.bf16.mxu0 %v13619_v49 }
 0xc28   : > { %12153 = vmatpush3.bf16.msra.mxu1 %v13653_v35 }
 0xc29   : > { %12205 = vmatpush3.bf16.msra.mxu0 %v13619_v49  ;;  %12155 = vmatprep.subr.bf16.mxu1 %v13655_v36  ;;  %v10806_v49 = vld [vmem:[%s758_s14] ss:$0 sm:$0xff] }
 0xc2a   : > { %12207 = vmatprep.subr.bf16.mxu0 %v13627_v54 }
 0xc2c   : > { %12157 = vmatpush3.bf16.msra.mxu1 %v13655_v36 }
 0xc2d   : > { %12209 = vmatpush3.bf16.msra.mxu0 %v13627_v54  ;;  %12159 = vmatprep.subr.bf16.mxu1 %v13657_v37 }
 0xc30   : > { %11968 = vmatmul.mubr.f32.vlgmr.msra.gmra.mrb[18].mxu0 %v10010_v2  ;;  %12161 = vmatpush3.bf16.msra.mxu1 %v13657_v37 }
 0xc33   : > { %11911 = vmatmul.mubr.f32.vlgmr.msra.gmra.mrb[20].mxu1 %v10011_v6 }
 0xd03   : > { %v11969_v40 = vpop.f32.mrb[18].mxu0 }
 0xd04   : > { %v10497_v44 = vpop.f32.mrb[19].mxu0 }
 0xd06   : > { %v11912_v59 = vpop.f32.mrb[20].mxu1 }
 0xd07   : > { %v12224_v4 = vadd.f32 %v11912_v59, %v10806_v49  ;;  %v10221_v8 = vpop.f32.mrb[21].mxu1 }
 0xd08   : > { %v12226_v16 = vadd.f32 %v10806_v49, %v10221_v8 }
 0xd09   : > { %v12225_v18 = vadd.f32 %v12224_v4, %v11969_v40 }
 0xd0a   : > { %v12227_v19 = vadd.f32 %v12226_v16, %v10497_v44 }
 0xd0b   : > { %v10508_v54 = vadd.f32 %v12225_v18, %v13589_v12 }
 0xd0c   : > { %v10507_v20 = vadd.f32 %v12227_v19, %v13585_v22 }
 0xd0d   : > { %v10514_v21 = vsel %vm833_vm1, %v10508_v54, 0.0 }
 0xd0e   : > { %10515 = vadd.xlane.f32.xlu0 %v10514_v21  ;;  %v10511_v23 = vsel %vm833_vm1, %v10507_v20, 0.0 }
 0xd0f   : > { %10512 = vadd.xlane.f32.xlu1 %v10511_v23 }
 0xd9b   : > { %v10516_v24 = vpop.xlane.xlu0 %10515 }
 0xd9c   : > { %v10518_v25 = vmul.f32 0.03125, %v10516_v24  ;;  %v10513_v26 = vpop.xlane.xlu1 %10512 }
 0xd9d   : > { %v10517_v27 = vmul.f32 0.03125, %v10513_v26 }
 0xd9e   : > { %v10520_v28 = vsub.f32 %v10508_v54, %v10518_v25 }
 0xd9f   : > { %v10519_v29 = vsub.f32 %v10507_v20, %v10517_v27 }
 0xda0   : > { %v10522_v31 = vmul.f32 %v10520_v28, %v10520_v28 }
 0xda1   : > { %v10521_v32 = vmul.f32 %v10519_v29, %v10519_v29 }
 0xda2   : > { %v10526_v30 = vsel %vm833_vm1, %v10522_v31, 0.0 }
 0xda3   : > { %10527 = vadd.xlane.f32.xlu0 %v10526_v30  ;;  %v10523_v22 = vsel %vm833_vm1, %v10521_v32, 0.0 }
 0xda4   : > { %10524 = vadd.xlane.f32.xlu1 %v10523_v22 }
 0xe30   : > { %v10528_v12 = vpop.xlane.xlu0 %10527 }
 0xe31   : > { %v10530_v33 = vmul.f32 0.03125, %v10528_v12  ;;  %v10525_v34 = vpop.xlane.xlu1 %10524 }
 0xe32   : > { %v10529_v35 = vmul.f32 0.03125, %v10525_v34 }
 0xe33   : > { %v10532_v36 = vadd.f32 1e-12, %v10530_v33 }
 0xe34   : > { %v10531_v37 = vadd.f32 1e-12, %v10529_v35 }
 0xe35   : > { %12551 = vrsqrt.f32 %v10532_v36 }
 0xe36   : > { %12553 = vrsqrt.f32 %v10531_v37 }
 0xe3f   : > { %v12552_v38 = vpop.eup %12551 }
 0xe40   : > { %v12554_v41 = vpop.eup %12553  ;;  %v10536_v17 = vmul.f32 %v12552_v38, %v10520_v28 }
 0xe41   : > { %v10535_v43 = vmul.f32 %v12554_v41, %v10519_v29  ;;  %10558 = sbr.rel (%p10809_p6) target bundleno = 3656 (0xe48), region = 104 }
 0xe42   : > { %v10544_v45 = vmul.f32 %v10807_v39, %v10536_v17 }
 0xe43   : > { %v10543_v46 = vmul.f32 %v10807_v39, %v10535_v43 }
 0xe44   : > { %v10552_v47 = vadd.f32 %v10808_v42, %v10544_v45 }
 0xe45   : > { %v10551_v48 = vadd.f32 %v10808_v42, %v10543_v46 }
 0xe46   : > { %10554 = vst.msk [vmem:[#allocation2 + $0x8] sm:$0xff] %vm833_vm1, %v10552_v47  ;;  %10560 = vst.msk [vmem:[#allocation9 + $0x8] sm:$0xff] (!%p10809_p6), %vm833_vm1, %v10552_v47 }
 0xe47   : > { %10553 = vst.msk [vmem:[#allocation2] sm:$0xff] %vm833_vm1, %v10551_v48  ;;  %10559 = vst.msk [vmem:[#allocation9] sm:$0xff] (!%p10809_p6), %vm833_vm1, %v10551_v48 }
 0xe48 PF: > { %s13820_s30 = sld [smem:[#allocation14_spill]]  ;;  %s12724_s18 = smov [#allocation9]  }
 0xe49   : > { %s10570_s27 = sshll.u32 %s12724_s18, 4  ;;  %s10571_s27 = int_to_ptr.vmem [resolvable:$true] %s10570_s27 }
 0xe4a   : > { %s12641_s15 = scalar_lea.vmem %s10571_s27, 256  ;;  %p12648_p13 = scmp.lt.s32.totalorder %s10571_s27, %s10571_s27 }
 0xe4b   : > { %p12642_p10 = scmp.ne.s32.totalorder %s10571_s27, %s12641_s15  ;;  %p12649_p0 = scmp.lt.s32.totalorder %s12641_s15, %s12641_s15 }
 0xe4d   : > { %p12650_p1 = por %p12649_p0, %p12648_p13 }
 0xe4e   : > { %s13821_s2 = sadd.s32 4294967295, %s13820_s30  }
 0xe4f   : > { %p13722_p9 = scmp.eq.s32.totalorder %s13821_s2, 1 }
 0xe51   : > { %p12643_p11 = pnand %p12642_p10, %p13722_p9 }
 0xe53   : > { %p12644_p12 = pneg %p12643_p11 }
 0xe55   : > { %p12651_p4 = pnand %p12650_p1, %p12644_p12 }
 0xe57   : > { %12654 = shalt.err (!%p12651_p4)
}
 0xe58   : > { %s13823_s0 = sld [smem:[#allocation25_spill]] }
 0xe5e   : > { %s12655_s4 = scalar_lea.hbm %s13823_s0, 256 }
 0xe5f   : > { %p12656_p7 = scmp.ne.s32.totalorder %s13823_s0, %s12655_s4  ;;  %p12661_p8 = scmp.lt.u32.totalorder %s12655_s4, %s13823_s0 }
 0xe61   : > { %p12657_p2 = pnand %p12656_p7, %p13722_p9 }
 0xe63   : > { %p12658_p3 = pneg %p12657_p2 }
 0xe65   : > { %p12663_p5 = pnand %p12661_p8, %p12658_p3 }
 0xe67   : > { %12666 = shalt.err (!%p12663_p5)
}
 0xe68   : > { %s12725_s1 = smov 128  }
 0xe69   : > { %12439 = dma.vmem_to_hbm [thread:$0]  (%p13722_p9), %s10571_s27, 256, %s13823_s0, [#allocation5], %s12725_s1, %s12725_s1, %s12721_s20  }
 0xe6a   : > { %12688 = dma.done.wait (%p13722_p9), [#allocation5], 256  }
 0xe6b   : > { %12690 = vsyncadd (%p13722_p9), [#allocation5], 4294967040 }
 0xe6c PF: > { %s13824_s23 = sld [smem:[#allocation14_spill]]  ;;  %s13825_s21 = sld [smem:[#allocation13_spill]] }
 0xe6d   : > { %s13826_s22 = sld [smem:[#allocation15_spill]] }
 0xe72   : > { %s29_s23 = sadd.s32 1, %s13824_s23  }
 0xe73   : > { %p26_p6 = scmp.ge.s32.totalorder %s29_s23, 4  }
 0xe75   :  { %28 = sbr.rel (!%p26_p6) target bundleno = 15 (0xf), region = 171 }
 0xe7c   :  { %10586 = vsyncpa [#allocation4], 1 }
 0xe7d   :  { %10588 = vsyncpa [#allocation4 + $0x1], 1 }
 0xe7e   :  { %10589 = vsyncpa [#allocation7], 1 }
 0xe7f   :  { %10590 = vsyncpa [#allocation5], 1 }
 0xe80   :  { %10592 = vsyncpa [#allocation5 + $0x1], 1 }

</bundles_post_ra>
